<compile_context>
chip_gen: v5e
topology: v5e:2x2
jax: 0.10.0
libtpu: 0.0.40
codegen_flags: <defaults>
</compile_context>

<pallas_src>
import math
import jax
import jax.numpy as jnp
from jax import lax
from jax.experimental import pallas as pl
from jax.experimental.pallas import tpu as pltpu


# --------------------------------------------------------------------------
# helpers
# --------------------------------------------------------------------------
def _row_tile(m, row_bytes, budget=4 << 20, cap=512):
    """Pick a row-block size bounded by a per-operand VMEM budget.

    Returns (bm, m_pad).  If m fits in one block we use the full (possibly
    non-multiple-of-8) extent, which Pallas allows; otherwise bm is a multiple
    of 8 and m is padded up to a multiple of bm (padded rows are sliced off).
    """
    bm = max(8, min(cap, budget // max(int(row_bytes), 1)))
    bm = (bm // 8) * 8
    if m <= bm:
        return m, m
    m_pad = ((m + bm - 1) // bm) * bm
    return bm, m_pad


def _align_as_matmul(c_in, c_out, w, b):
    """Express Align (1x1 conv / zero channel-pad / identity) as x @ A + a."""
    if c_in > c_out:
        return w.astype(jnp.float32), b.reshape(1, c_out).astype(jnp.float32)
    # c_in <= c_out: identity embedding (zero pad) or plain identity.
    return (jnp.eye(c_in, c_out, dtype=jnp.float32),
            jnp.zeros((1, c_out), jnp.float32))


def _mosaic(sems):
    return pltpu.CompilerParams(dimension_semantics=sems,
                                vmem_limit_bytes=32 * 1024 * 1024)


# --------------------------------------------------------------------------
# Temporal causal conv (Kt,1) + GLU + fused Align residual
# --------------------------------------------------------------------------
def _tconv_glu_kernel(x_ref, w_ref, b_ref, aw_ref, ab_ref, o_ref):
    # x_ref : (1, T*N, c_in)       one batch element, full time window
    # w_ref : (Kt, c_in, 2*c_out)  p/q halves fused in one weight
    # b_ref : (1, 2*c_out)
    # aw_ref: (c_in, c_out)        Align as a matmul
    # ab_ref: (1, c_out)
    # o_ref : (1, T_out*N, c_out)
    kt = w_ref.shape[0]
    c_out = w_ref.shape[2] // 2
    rows_out = o_ref.shape[1]                       # T_out * N
    step = (x_ref.shape[1] - rows_out) // (kt - 1) if kt > 1 else 0   # = n_vertex

    xb = x_ref[0]                                   # (T*N, c_in)

    # Kt causal taps = contiguous static row windows; one fused dot per tap.
    xk = xb[0:rows_out, :]
    acc = jnp.dot(xk, w_ref[0], preferred_element_type=jnp.float32)
    for k in range(1, kt):
        xk = xb[k * step:k * step + rows_out, :]
        acc = acc + jnp.dot(xk, w_ref[k], preferred_element_type=jnp.float32)
    acc = acc + b_ref[...]

    # Residual input x_in = Align(x)[:, Kt-1:, :, :]  (xk is the last tap).
    res = jnp.dot(xk, aw_ref[...], preferred_element_type=jnp.float32) + ab_ref[...]

    p = acc[:, :c_out]
    q = acc[:, c_out:]
    o_ref[0] = ((p + res) * jax.nn.sigmoid(q)).astype(o_ref.dtype)


def temporal_conv_glu(x, Kt, c_out, conv_w, conv_b, align_w=None, align_b=None):
    # x: (B, T, N, c_in); conv_w: (Kt, c_in, 2*c_out); conv_b: (2*c_out,)
    bsz, t, n, c_in = x.shape
    t_out = t - Kt + 1
    aw, ab = _align_as_matmul(c_in, c_out, align_w, align_b)
    x2 = x.reshape(bsz, t * n, c_in)                 # free metadata reshape

    out = pl.pallas_call(
        _tconv_glu_kernel,
        out_shape=jax.ShapeDtypeStruct((bsz, t_out * n, c_out), x.dtype),
        grid=(bsz,),
        in_specs=[
            pl.BlockSpec((1, t * n, c_in), lambda i: (i, 0, 0)),
            pl.BlockSpec((Kt, c_in, 2 * c_out), lambda i: (0, 0, 0)),
            pl.BlockSpec((1, 2 * c_out), lambda i: (0, 0)),
            pl.BlockSpec((c_in, c_out), lambda i: (0, 0)),
            pl.BlockSpec((1, c_out), lambda i: (0, 0)),
        ],
        out_specs=pl.BlockSpec((1, t_out * n, c_out), lambda i: (i, 0, 0)),
        compiler_params=_mosaic(("parallel",)),
    )(x2, conv_w, conv_b.reshape(1, 2 * c_out), aw, ab)
    return out.reshape(bsz, t_out, n, c_out)


# --------------------------------------------------------------------------
# GraphConvLayer (Align + Chebyshev conv + residual) + block ReLU
# --------------------------------------------------------------------------
def _mm_bias_relu_kernel(x_ref, w_ref, b_ref, o_ref):
    acc = jnp.dot(x_ref[...], w_ref[...], preferred_element_type=jnp.float32)
    o_ref[...] = jnp.maximum(acc + b_ref[...], 0.0).astype(o_ref.dtype)


def _cheb_relu_kernel(x_ref, gso_ref, aw_ref, ab_ref, w_ref, b_ref, o_ref):
    # General (large-graph) fallback: one (N, c) slab per grid step.
    ks = w_ref.shape[0]
    x0 = jnp.dot(x_ref[0], aw_ref[...], preferred_element_type=jnp.float32) + ab_ref[...]
    gso = gso_ref[...]
    acc = jnp.dot(x0, w_ref[0], preferred_element_type=jnp.float32)
    if ks >= 2:
        x1 = jnp.dot(gso, x0, preferred_element_type=jnp.float32)
        acc = acc + jnp.dot(x1, w_ref[1], preferred_element_type=jnp.float32)
        x_km2, x_km1 = x0, x1
        for k in range(2, ks):
            x_k = 2.0 * jnp.dot(gso, x_km1, preferred_element_type=jnp.float32) - x_km2
            acc = acc + jnp.dot(x_k, w_ref[k], preferred_element_type=jnp.float32)
            x_km2, x_km1 = x_km1, x_k
    acc = acc + b_ref[...] + x0
    o_ref[0] = jnp.maximum(acc, 0.0).astype(o_ref.dtype)


def graph_conv_relu(x, gso, cheb_w, cheb_b, align_w=None, align_b=None):
    # x: (B, T, N, c_in); cheb_w: (Ks, c1, c1); output (B, T, N, c1)
    bsz, t, n, c_in = x.shape
    ks, _, c1 = cheb_w.shape
    bt = bsz * t
    aw, ab = _align_as_matmul(c_in, c1, align_w, align_b)
    gso_f = gso.astype(jnp.float32)

    if n * c1 <= 512:
        # ---- Kronecker-folded operator: whole layer = one lane-dense matmul.
        # (In a real model BigW / bigb would be precomputed once per block.)
        polys = [jnp.eye(n, dtype=jnp.float32)]
        if ks >= 2:
            polys.append(gso_f)
            for _ in range(2, ks):
                polys.append(2.0 * gso_f @ polys[-1] - polys[-2])
        gm = sum(jnp.kron(tk.T, cheb_w[k].astype(jnp.float32))
                 for k, tk in enumerate(polys))
        gm_res = gm + jnp.eye(n * c1, dtype=jnp.float32)          # + residual
        aop = jnp.kron(jnp.eye(n, dtype=jnp.float32), aw)          # align
        big_w = aop @ gm_res                                       # (N*c_in, N*c1)
        big_b = (jnp.tile(ab.reshape(-1), n) @ gm_res
                 + jnp.tile(cheb_b.astype(jnp.float32), n)).reshape(1, n * c1)

        x2 = x.reshape(bt, n * c_in)                               # free reshape
        bm, m_pad = _row_tile(bt, max(n * c_in, n * c1) * 4)
        if m_pad != bt:
            x2 = jnp.pad(x2, ((0, m_pad - bt), (0, 0)))
        out = pl.pallas_call(
            _mm_bias_relu_kernel,
            out_shape=jax.ShapeDtypeStruct((m_pad, n * c1), x.dtype),
            grid=(m_pad // bm,),
            in_specs=[
                pl.BlockSpec((bm, n * c_in), lambda i: (i, 0)),
                pl.BlockSpec((n * c_in, n * c1), lambda i: (0, 0)),
                pl.BlockSpec((1, n * c1), lambda i: (0, 0)),
            ],
            out_specs=pl.BlockSpec((bm, n * c1), lambda i: (i, 0)),
            compiler_params=_mosaic(("parallel",)),
        )(x2, big_w, big_b)
        return out[:bt].reshape(bsz, t, n, c1)

    # ---- General fallback for large graphs (Kron operator would be too big).
    # TODO(synk): optimize large-graph path (batch slabs + lane-dense layout).
    x3 = x.reshape(bt, n, c_in)
    out = pl.pallas_call(
        _cheb_relu_kernel,
        out_shape=jax.ShapeDtypeStruct((bt, n, c1), x.dtype),
        grid=(bt,),
        in_specs=[
            pl.BlockSpec((1, n, c_in), lambda i: (i, 0, 0)),
            pl.BlockSpec((n, n), lambda i: (0, 0)),
            pl.BlockSpec((c_in, c1), lambda i: (0, 0)),
            pl.BlockSpec((1, c1), lambda i: (0, 0)),
            pl.BlockSpec((ks, c1, c1), lambda i: (0, 0, 0)),
            pl.BlockSpec((1, c1), lambda i: (0, 0)),
        ],
        out_specs=pl.BlockSpec((1, n, c1), lambda i: (i, 0, 0)),
        compiler_params=_mosaic(("parallel",)),
    )(x3, gso_f, aw, ab, cheb_w, cheb_b.reshape(1, c1))
    return out.reshape(bsz, t, n, c1)


# --------------------------------------------------------------------------
# LayerNorm over (n_vertex, channel) — flattened to row-wise LN
# --------------------------------------------------------------------------
def _ln_kernel(x_ref, g_ref, b_ref, o_ref):
    xt = x_ref[...].astype(jnp.float32)                    # (bm, N*C)
    mean = jnp.mean(xt, axis=1, keepdims=True)
    xc = xt - mean
    var = jnp.mean(xc * xc, axis=1, keepdims=True)
    y = xc * lax.rsqrt(var + 1e-5)
    o_ref[...] = (y * g_ref[...] + b_ref[...]).astype(o_ref.dtype)


def layernorm_nv(x, gamma, beta):
    # x: (B, T, N, C); normalize each (N, C) slab (matches nn.LayerNorm([N, C]))
    bsz, t, n, c = x.shape
    bt = bsz * t
    d = n * c
    x2 = x.reshape(bt, d)
    g2 = gamma.reshape(1, d)
    b2 = beta.reshape(1, d)
    bm, m_pad = _row_tile(bt, d * 4)
    if m_pad != bt:
        x2 = jnp.pad(x2, ((0, m_pad - bt), (0, 0)))
    out = pl.pallas_call(
        _ln_kernel,
        out_shape=jax.ShapeDtypeStruct((m_pad, d), x.dtype),
        grid=(m_pad // bm,),
        in_specs=[
            pl.BlockSpec((bm, d), lambda i: (i, 0)),
            pl.BlockSpec((1, d), lambda i: (0, 0)),
            pl.BlockSpec((1, d), lambda i: (0, 0)),
        ],
        out_specs=pl.BlockSpec((bm, d), lambda i: (i, 0)),
        compiler_params=_mosaic(("parallel",)),
    )(x2, g2, b2)
    return out[:bt].reshape(bsz, t, n, c)


# --------------------------------------------------------------------------
# Full STConvBlock forward (Pallas)
# --------------------------------------------------------------------------
def stconv_block(x_nchw, params, Kt):
    # x_nchw: PyTorch layout (B, C, T, N)
    x = jnp.transpose(x_nchw, (0, 2, 3, 1))                       # -> (B, T, N, C)
    p = params
    c0 = p["tc1_w"].shape[-1] // 2
    c2 = p["tc2_w"].shape[-1] // 2
    x = temporal_conv_glu(x, Kt, c0, p["tc1_w"], p["tc1_b"], p["al1_w"], p["al1_b"])
    x = graph_conv_relu(x, p["gso"], p["cheb_w"], p["cheb_b"], p["alg_w"], p["alg_b"])
    x = temporal_conv_glu(x, Kt, c2, p["tc2_w"], p["tc2_b"], p["al2_w"], p["al2_b"])
    x = layernorm_nv(x, p["ln_g"], p["ln_b"])
    # dropout: identity in inference mode
    return jnp.transpose(x, (0, 3, 1, 2))                         # -> (B, C, T, N)


# --------------------------------------------------------------------------
# Pure-JAX reference (channel-last) used only to check the kernels
# --------------------------------------------------------------------------
def _ref_align(x, c_out, w=None, b=None):
    c_in = x.shape[-1]
    if c_in > c_out:
        return jnp.einsum("btnc,cd->btnd", x, w) + b
    if c_in < c_out:
        pad = jnp.zeros(x.shape[:-1] + (c_out - c_in,), x.dtype)
        return jnp.concatenate([x, pad], axis=-1)
    return x


def _ref_temporal(x, Kt, c_out, W, bvec, aw, ab):
    t_out = x.shape[1] - Kt + 1
    x_in = _ref_align(x, c_out, aw, ab)[:, Kt - 1:]
    conv = sum(jnp.einsum("btnc,cd->btnd", x[:, k:k + t_out], W[k]) for k in range(Kt)) + bvec
    pg, qg = conv[..., :c_out], conv[..., c_out:]
    return (pg + x_in) * jax.nn.sigmoid(qg)


def _ref_graph_relu(x, gso, W, bvec, aw, ab):
    ks, _, c1 = W.shape
    x_in = _ref_align(x, c1, aw, ab)
    xs = [x_in]
    if ks >= 2:
        xs.append(jnp.einsum("hi,btij->bthj", gso, x_in))
        for k in range(2, ks):
            xs.append(2.0 * jnp.einsum("hi,btij->bthj", gso, xs[k - 1]) - xs[k - 2])
    stacked = jnp.stack(xs, axis=2)
    gc = jnp.einsum("btkhi,kij->bthj", stacked, W) + bvec
    return jnp.maximum(gc + x_in, 0.0)


def _ref_ln(x, g, b):
    mean = jnp.mean(x, axis=(-2, -1), keepdims=True)
    var = jnp.mean(jnp.square(x - mean), axis=(-2, -1), keepdims=True)
    return (x - mean) / jnp.sqrt(var + 1e-5) * g + b


def stconv_block_ref(x_nchw, p, Kt):
    x = jnp.transpose(x_nchw, (0, 2, 3, 1))
    c0 = p["tc1_w"].shape[-1] // 2
    c2 = p["tc2_w"].shape[-1] // 2
    x = _ref_temporal(x, Kt, c0, p["tc1_w"], p["tc1_b"], p["al1_w"], p["al1_b"])
    x = _ref_graph_relu(x, p["gso"], p["cheb_w"], p["cheb_b"], p["alg_w"], p["alg_b"])
    x = _ref_temporal(x, Kt, c2, p["tc2_w"], p["tc2_b"], p["al2_w"], p["al2_b"])
    x = _ref_ln(x, p["ln_g"], p["ln_b"])
    return jnp.transpose(x, (0, 3, 1, 2))


# --------------------------------------------------------------------------
# main
# --------------------------------------------------------------------------
if __name__ == "__main__":
    # Small deterministic config
    B, T, N = 2, 12, 16
    last_block_channel = 4
    channels = [32, 16, 32]          # [c0, c1, c2]
    Kt, Ks = 3, 3
    c0, c1, c2 = channels

    key = jax.random.PRNGKey(0)
    ks_ = jax.random.split(key, 12)

    def rand(k, shape, fan_in):
        return (jax.random.normal(k, shape, jnp.float32) / math.sqrt(max(fan_in, 1)))

    # symmetric, scaled graph shift operator
    a = jax.random.uniform(ks_[0], (N, N), jnp.float32)
    gso = (a + a.T) * (0.5 / N)

    params = {
        "gso": gso,
        # Align for tmp_conv1 (only used if last_block_channel > c0; kept for fidelity)
        "al1_w": rand(ks_[1], (last_block_channel, c0), last_block_channel),
        "al1_b": rand(ks_[2], (c0,), last_block_channel),
        # Temporal conv 1: weight (Kt, c_in, 2*c_out)
        "tc1_w": rand(ks_[3], (Kt, last_block_channel, 2 * c0), Kt * last_block_channel),
        "tc1_b": rand(ks_[4], (2 * c0,), Kt * last_block_channel),
        # Align inside GraphConvLayer: c0 -> c1 (1x1 conv, c0 > c1)
        "alg_w": rand(ks_[5], (c0, c1), c0),
        "alg_b": rand(ks_[6], (c1,), c0),
        # Chebyshev graph conv weights
        "cheb_w": rand(ks_[7], (Ks, c1, c1), Ks * c1),
        "cheb_b": rand(ks_[8], (c1,), Ks * c1),
        # Align for tmp_conv2 (c1 < c2 -> zero pad; conv params unused)
        "al2_w": rand(ks_[9], (c1, c2), c1),
        "al2_b": jnp.zeros((c2,), jnp.float32),
        # Temporal conv 2
        "tc2_w": rand(ks_[10], (Kt, c1, 2 * c2), Kt * c1),
        "tc2_b": rand(ks_[11], (2 * c2,), Kt * c1),
        # LayerNorm affine over (n_vertex, c2)
        "ln_g": jnp.ones((N, c2), jnp.float32),
        "ln_b": jnp.zeros((N, c2), jnp.float32),
    }

    x = jax.random.normal(jax.random.PRNGKey(42), (B, last_block_channel, T, N), jnp.float32)

    stconv_jit = jax.jit(stconv_block, static_argnums=(2,))
    out = jax.block_until_ready(stconv_jit(x, params, Kt))
    ref = jax.block_until_ready(stconv_block_ref(x, params, Kt))

    expected_shape = (B, c2, T - 2 * (Kt - 1), N)
    assert out.shape == expected_shape, (out.shape, expected_shape)
    assert jnp.allclose(out, ref, rtol=2e-2, atol=2e-2), float(jnp.max(jnp.abs(out - ref)))

    print("KERNEL_OK")
</pallas_src>

<mosaic_0001>
module attributes {stable_mosaic.version = 11 : i64} {
  func.func @_tconv_glu_kernel(%arg0: i32, %arg1: memref<1x192x4xf32, #tpu.memory_space<vmem>>, %arg2: memref<3x4x64xf32, #tpu.memory_space<vmem>>, %arg3: memref<1x64xf32, #tpu.memory_space<vmem>>, %arg4: memref<4x32xf32, #tpu.memory_space<vmem>>, %arg5: memref<1x32xf32, #tpu.memory_space<vmem>>, %arg6: memref<1x160x32xf32, #tpu.memory_space<vmem>>) attributes {dimension_semantics = [#tpu.dimension_semantics<parallel>], iteration_bounds = array<i64: 2>, scalar_prefetch = 0 : i64, scratch_operands = 0 : i64, tpu.core_type = #tpu.core_type<tc>, window_params = [{transform_indices = @transform_0, window_bounds = array<i64: 1, 192, 4>}, {pipeline_mode = #tpu.pipeline_mode<synchronous>, transform_indices = @transform_1, window_bounds = array<i64: 3, 4, 64>}, {pipeline_mode = #tpu.pipeline_mode<synchronous>, transform_indices = @transform_2, window_bounds = array<i64: 1, 64>}, {pipeline_mode = #tpu.pipeline_mode<synchronous>, transform_indices = @transform_3, window_bounds = array<i64: 4, 32>}, {pipeline_mode = #tpu.pipeline_mode<synchronous>, transform_indices = @transform_4, window_bounds = array<i64: 1, 32>}, {transform_indices = @transform_5, window_bounds = array<i64: 1, 160, 32>}]} {
    %c0 = arith.constant 0 : index
    %c0_0 = arith.constant 0 : index
    %c0_1 = arith.constant 0 : index
    %0 = vector.load %arg1[%c0, %c0_0, %c0_1] : memref<1x192x4xf32, #tpu.memory_space<vmem>>, vector<1x192x4xf32>
    %1 = vector.shape_cast %0 : vector<1x192x4xf32> to vector<192x4xf32>
    %2 = vector.extract_strided_slice %1 {offsets = [0, 0], sizes = [160, 4], strides = [1, 1]} : vector<192x4xf32> to vector<160x4xf32>
    %c0_2 = arith.constant 0 : index
    %c0_3 = arith.constant 0 : index
    %c0_4 = arith.constant 0 : index
    %3 = vector.load %arg2[%c0_2, %c0_3, %c0_4] : memref<3x4x64xf32, #tpu.memory_space<vmem>>, vector<1x4x64xf32>
    %4 = vector.shape_cast %3 : vector<1x4x64xf32> to vector<4x64xf32>
    %cst = arith.constant dense<0.000000e+00> : vector<160x64xf32>
    %5 = tpu.matmul %2, %4, %cst {dimension_numbers = #tpu.dot_dimension_numbers<[1], [0], [0], [1], [0, 0, 1, 1], [], []>} : vector<160x4xf32>, vector<4x64xf32>, vector<160x64xf32> -> vector<160x64xf32>
    %6 = vector.extract_strided_slice %1 {offsets = [16, 0], sizes = [160, 4], strides = [1, 1]} : vector<192x4xf32> to vector<160x4xf32>
    %c1 = arith.constant 1 : index
    %c0_5 = arith.constant 0 : index
    %c0_6 = arith.constant 0 : index
    %7 = vector.load %arg2[%c1, %c0_5, %c0_6] : memref<3x4x64xf32, #tpu.memory_space<vmem>>, vector<1x4x64xf32>
    %8 = vector.shape_cast %7 : vector<1x4x64xf32> to vector<4x64xf32>
    %cst_7 = arith.constant dense<0.000000e+00> : vector<160x64xf32>
    %9 = tpu.matmul %6, %8, %cst_7 {dimension_numbers = #tpu.dot_dimension_numbers<[1], [0], [0], [1], [0, 0, 1, 1], [], []>} : vector<160x4xf32>, vector<4x64xf32>, vector<160x64xf32> -> vector<160x64xf32>
    %10 = arith.addf %5, %9 : vector<160x64xf32>
    %11 = vector.extract_strided_slice %1 {offsets = [32, 0], sizes = [160, 4], strides = [1, 1]} : vector<192x4xf32> to vector<160x4xf32>
    %c2 = arith.constant 2 : index
    %c0_8 = arith.constant 0 : index
    %c0_9 = arith.constant 0 : index
    %12 = vector.load %arg2[%c2, %c0_8, %c0_9] : memref<3x4x64xf32, #tpu.memory_space<vmem>>, vector<1x4x64xf32>
    %13 = vector.shape_cast %12 : vector<1x4x64xf32> to vector<4x64xf32>
    %cst_10 = arith.constant dense<0.000000e+00> : vector<160x64xf32>
    %14 = tpu.matmul %11, %13, %cst_10 {dimension_numbers = #tpu.dot_dimension_numbers<[1], [0], [0], [1], [0, 0, 1, 1], [], []>} : vector<160x4xf32>, vector<4x64xf32>, vector<160x64xf32> -> vector<160x64xf32>
    %15 = arith.addf %10, %14 : vector<160x64xf32>
    %c0_11 = arith.constant 0 : index
    %c0_12 = arith.constant 0 : index
    %16 = vector.load %arg3[%c0_11, %c0_12] : memref<1x64xf32, #tpu.memory_space<vmem>>, vector<1x64xf32>
    %17 = vector.broadcast %16 : vector<1x64xf32> to vector<160x64xf32>
    %18 = arith.addf %15, %17 : vector<160x64xf32>
    %c0_13 = arith.constant 0 : index
    %c0_14 = arith.constant 0 : index
    %19 = vector.load %arg4[%c0_13, %c0_14] : memref<4x32xf32, #tpu.memory_space<vmem>>, vector<4x32xf32>
    %cst_15 = arith.constant dense<0.000000e+00> : vector<160x32xf32>
    %20 = tpu.matmul %11, %19, %cst_15 {dimension_numbers = #tpu.dot_dimension_numbers<[1], [0], [0], [1], [0, 0, 1, 1], [], []>} : vector<160x4xf32>, vector<4x32xf32>, vector<160x32xf32> -> vector<160x32xf32>
    %c0_16 = arith.constant 0 : index
    %c0_17 = arith.constant 0 : index
    %21 = vector.load %arg5[%c0_16, %c0_17] : memref<1x32xf32, #tpu.memory_space<vmem>>, vector<1x32xf32>
    %22 = vector.broadcast %21 : vector<1x32xf32> to vector<160x32xf32>
    %23 = arith.addf %20, %22 : vector<160x32xf32>
    %24 = vector.extract_strided_slice %18 {offsets = [0, 0], sizes = [160, 32], strides = [1, 1]} : vector<160x64xf32> to vector<160x32xf32>
    %25 = vector.extract_strided_slice %18 {offsets = [0, 32], sizes = [160, 32], strides = [1, 1]} : vector<160x64xf32> to vector<160x32xf32>
    %26 = arith.addf %24, %23 : vector<160x32xf32>
    %27 = arith.negf %25 : vector<160x32xf32>
    %28 = math.exp %27 : vector<160x32xf32>
    %cst_18 = arith.constant 1.000000e+00 : f32
    %29 = vector.broadcast %cst_18 : f32 to vector<160x32xf32>
    %30 = arith.addf %29, %28 : vector<160x32xf32>
    %31 = arith.divf %29, %30 : vector<160x32xf32>
    %32 = arith.mulf %26, %31 : vector<160x32xf32>
    %c0_19 = arith.constant 0 : index
    %c0_20 = arith.constant 0 : index
    %c0_21 = arith.constant 0 : index
    %33 = vector.load %arg6[%c0_19, %c0_20, %c0_21] : memref<1x160x32xf32, #tpu.memory_space<vmem>>, vector<1x160x32xf32>
    %34 = vector.shape_cast %33 : vector<1x160x32xf32> to vector<160x32xf32>
    %35 = vector.shape_cast %32 : vector<160x32xf32> to vector<1x160x32xf32>
    tpu.vector_store %arg6[%c0_19, %c0_20, %c0_21], %35 {strides = array<i32>} : memref<1x160x32xf32, #tpu.memory_space<vmem>>, vector<1x160x32xf32>,
    return
  }
  func.func @transform_0(%arg0: i32) -> (i32, i32, i32) {
    %c0_i32 = arith.constant 0 : i32
    %c0_i32_0 = arith.constant 0 : i32
    %c0_i32_1 = arith.constant 0 : i32
    return %arg0, %c0_i32, %c0_i32_0 : i32, i32, i32
  }
  func.func @transform_1(%arg0: i32) -> (i32, i32, i32) {
    %c0_i32 = arith.constant 0 : i32
    %c0_i32_0 = arith.constant 0 : i32
    %c0_i32_1 = arith.constant 0 : i32
    %c0_i32_2 = arith.constant 0 : i32
    return %c0_i32, %c0_i32_0, %c0_i32_1 : i32, i32, i32
  }
  func.func @transform_2(%arg0: i32) -> (i32, i32) {
    %c0_i32 = arith.constant 0 : i32
    %c0_i32_0 = arith.constant 0 : i32
    %c0_i32_1 = arith.constant 0 : i32
    return %c0_i32, %c0_i32_0 : i32, i32
  }
  func.func @transform_3(%arg0: i32) -> (i32, i32) {
    %c0_i32 = arith.constant 0 : i32
    %c0_i32_0 = arith.constant 0 : i32
    %c0_i32_1 = arith.constant 0 : i32
    return %c0_i32, %c0_i32_0 : i32, i32
  }
  func.func @transform_4(%arg0: i32) -> (i32, i32) {
    %c0_i32 = arith.constant 0 : i32
    %c0_i32_0 = arith.constant 0 : i32
    %c0_i32_1 = arith.constant 0 : i32
    return %c0_i32, %c0_i32_0 : i32, i32
  }
  func.func @transform_5(%arg0: i32) -> (i32, i32, i32) {
    %c0_i32 = arith.constant 0 : i32
    %c0_i32_0 = arith.constant 0 : i32
    %c0_i32_1 = arith.constant 0 : i32
    return %arg0, %c0_i32, %c0_i32_0 : i32, i32, i32
  }
}

module attributes {stable_mosaic.version = 11 : i64} {
  func.func @_mm_bias_relu_kernel(%arg0: i32, %arg1: memref<20x512xf32, #tpu.memory_space<vmem>>, %arg2: memref<512x256xf32, #tpu.memory_space<vmem>>, %arg3: memref<1x256xf32, #tpu.memory_space<vmem>>, %arg4: memref<20x256xf32, #tpu.memory_space<vmem>>) attributes {dimension_semantics = [#tpu.dimension_semantics<parallel>], iteration_bounds = array<i64: 1>, scalar_prefetch = 0 : i64, scratch_operands = 0 : i64, tpu.core_type = #tpu.core_type<tc>, window_params = [{transform_indices = @transform_0, window_bounds = array<i64: 20, 512>}, {pipeline_mode = #tpu.pipeline_mode<synchronous>, transform_indices = @transform_1, window_bounds = array<i64: 512, 256>}, {pipeline_mode = #tpu.pipeline_mode<synchronous>, transform_indices = @transform_2, window_bounds = array<i64: 1, 256>}, {transform_indices = @transform_3, window_bounds = array<i64: 20, 256>}]} {
    %c0 = arith.constant 0 : index
    %c0_0 = arith.constant 0 : index
    %0 = vector.load %arg1[%c0, %c0_0] : memref<20x512xf32, #tpu.memory_space<vmem>>, vector<20x512xf32>
    %c0_1 = arith.constant 0 : index
    %c0_2 = arith.constant 0 : index
    %1 = vector.load %arg2[%c0_1, %c0_2] : memref<512x256xf32, #tpu.memory_space<vmem>>, vector<512x256xf32>
    %cst = arith.constant dense<0.000000e+00> : vector<20x256xf32>
    %2 = tpu.matmul %0, %1, %cst {dimension_numbers = #tpu.dot_dimension_numbers<[1], [0], [0], [1], [0, 0, 1, 1], [], []>} : vector<20x512xf32>, vector<512x256xf32>, vector<20x256xf32> -> vector<20x256xf32>
    %c0_3 = arith.constant 0 : index
    %c0_4 = arith.constant 0 : index
    %3 = vector.load %arg3[%c0_3, %c0_4] : memref<1x256xf32, #tpu.memory_space<vmem>>, vector<1x256xf32>
    %4 = vector.broadcast %3 : vector<1x256xf32> to vector<20x256xf32>
    %5 = arith.addf %2, %4 : vector<20x256xf32>
    %cst_5 = arith.constant 0.000000e+00 : f32
    %6 = vector.broadcast %cst_5 : f32 to vector<20x256xf32>
    %7 = arith.maximumf %5, %6 : vector<20x256xf32>
    %c0_6 = arith.constant 0 : index
    %c0_7 = arith.constant 0 : index
    %8 = vector.load %arg4[%c0_6, %c0_7] : memref<20x256xf32, #tpu.memory_space<vmem>>, vector<20x256xf32>
    tpu.vector_store %arg4[%c0_6, %c0_7], %7 {strides = array<i32>} : memref<20x256xf32, #tpu.memory_space<vmem>>, vector<20x256xf32>,
    return
  }
  func.func @transform_0(%arg0: i32) -> (i32, i32) {
    %c0_i32 = arith.constant 0 : i32
    %c0_i32_0 = arith.constant 0 : i32
    return %arg0, %c0_i32 : i32, i32
  }
  func.func @transform_1(%arg0: i32) -> (i32, i32) {
    %c0_i32 = arith.constant 0 : i32
    %c0_i32_0 = arith.constant 0 : i32
    %c0_i32_1 = arith.constant 0 : i32
    return %c0_i32, %c0_i32_0 : i32, i32
  }
  func.func @transform_2(%arg0: i32) -> (i32, i32) {
    %c0_i32 = arith.constant 0 : i32
    %c0_i32_0 = arith.constant 0 : i32
    %c0_i32_1 = arith.constant 0 : i32
    return %c0_i32, %c0_i32_0 : i32, i32
  }
  func.func @transform_3(%arg0: i32) -> (i32, i32) {
    %c0_i32 = arith.constant 0 : i32
    %c0_i32_0 = arith.constant 0 : i32
    return %arg0, %c0_i32 : i32, i32
  }
}

module attributes {stable_mosaic.version = 11 : i64} {
  func.func @_tconv_glu_kernel(%arg0: i32, %arg1: memref<1x160x16xf32, #tpu.memory_space<vmem>>, %arg2: memref<3x16x64xf32, #tpu.memory_space<vmem>>, %arg3: memref<1x64xf32, #tpu.memory_space<vmem>>, %arg4: memref<16x32xf32, #tpu.memory_space<vmem>>, %arg5: memref<1x32xf32, #tpu.memory_space<vmem>>, %arg6: memref<1x128x32xf32, #tpu.memory_space<vmem>>) attributes {dimension_semantics = [#tpu.dimension_semantics<parallel>], iteration_bounds = array<i64: 2>, scalar_prefetch = 0 : i64, scratch_operands = 0 : i64, tpu.core_type = #tpu.core_type<tc>, window_params = [{transform_indices = @transform_0, window_bounds = array<i64: 1, 160, 16>}, {pipeline_mode = #tpu.pipeline_mode<synchronous>, transform_indices = @transform_1, window_bounds = array<i64: 3, 16, 64>}, {pipeline_mode = #tpu.pipeline_mode<synchronous>, transform_indices = @transform_2, window_bounds = array<i64: 1, 64>}, {pipeline_mode = #tpu.pipeline_mode<synchronous>, transform_indices = @transform_3, window_bounds = array<i64: 16, 32>}, {pipeline_mode = #tpu.pipeline_mode<synchronous>, transform_indices = @transform_4, window_bounds = array<i64: 1, 32>}, {transform_indices = @transform_5, window_bounds = array<i64: 1, 128, 32>}]} {
    %c0 = arith.constant 0 : index
    %c0_0 = arith.constant 0 : index
    %c0_1 = arith.constant 0 : index
    %0 = vector.load %arg1[%c0, %c0_0, %c0_1] : memref<1x160x16xf32, #tpu.memory_space<vmem>>, vector<1x160x16xf32>
    %1 = vector.shape_cast %0 : vector<1x160x16xf32> to vector<160x16xf32>
    %2 = vector.extract_strided_slice %1 {offsets = [0, 0], sizes = [128, 16], strides = [1, 1]} : vector<160x16xf32> to vector<128x16xf32>
    %c0_2 = arith.constant 0 : index
    %c0_3 = arith.constant 0 : index
    %c0_4 = arith.constant 0 : index
    %3 = vector.load %arg2[%c0_2, %c0_3, %c0_4] : memref<3x16x64xf32, #tpu.memory_space<vmem>>, vector<1x16x64xf32>
    %4 = vector.shape_cast %3 : vector<1x16x64xf32> to vector<16x64xf32>
    %cst = arith.constant dense<0.000000e+00> : vector<128x64xf32>
    %5 = tpu.matmul %2, %4, %cst {dimension_numbers = #tpu.dot_dimension_numbers<[1], [0], [0], [1], [0, 0, 1, 1], [], []>} : vector<128x16xf32>, vector<16x64xf32>, vector<128x64xf32> -> vector<128x64xf32>
    %6 = vector.extract_strided_slice %1 {offsets = [16, 0], sizes = [128, 16], strides = [1, 1]} : vector<160x16xf32> to vector<128x16xf32>
    %c1 = arith.constant 1 : index
    %c0_5 = arith.constant 0 : index
    %c0_6 = arith.constant 0 : index
    %7 = vector.load %arg2[%c1, %c0_5, %c0_6] : memref<3x16x64xf32, #tpu.memory_space<vmem>>, vector<1x16x64xf32>
    %8 = vector.shape_cast %7 : vector<1x16x64xf32> to vector<16x64xf32>
    %cst_7 = arith.constant dense<0.000000e+00> : vector<128x64xf32>
    %9 = tpu.matmul %6, %8, %cst_7 {dimension_numbers = #tpu.dot_dimension_numbers<[1], [0], [0], [1], [0, 0, 1, 1], [], []>} : vector<128x16xf32>, vector<16x64xf32>, vector<128x64xf32> -> vector<128x64xf32>
    %10 = arith.addf %5, %9 : vector<128x64xf32>
    %11 = vector.extract_strided_slice %1 {offsets = [32, 0], sizes = [128, 16], strides = [1, 1]} : vector<160x16xf32> to vector<128x16xf32>
    %c2 = arith.constant 2 : index
    %c0_8 = arith.constant 0 : index
    %c0_9 = arith.constant 0 : index
    %12 = vector.load %arg2[%c2, %c0_8, %c0_9] : memref<3x16x64xf32, #tpu.memory_space<vmem>>, vector<1x16x64xf32>
    %13 = vector.shape_cast %12 : vector<1x16x64xf32> to vector<16x64xf32>
    %cst_10 = arith.constant dense<0.000000e+00> : vector<128x64xf32>
    %14 = tpu.matmul %11, %13, %cst_10 {dimension_numbers = #tpu.dot_dimension_numbers<[1], [0], [0], [1], [0, 0, 1, 1], [], []>} : vector<128x16xf32>, vector<16x64xf32>, vector<128x64xf32> -> vector<128x64xf32>
    %15 = arith.addf %10, %14 : vector<128x64xf32>
    %c0_11 = arith.constant 0 : index
    %c0_12 = arith.constant 0 : index
    %16 = vector.load %arg3[%c0_11, %c0_12] : memref<1x64xf32, #tpu.memory_space<vmem>>, vector<1x64xf32>
    %17 = vector.broadcast %16 : vector<1x64xf32> to vector<128x64xf32>
    %18 = arith.addf %15, %17 : vector<128x64xf32>
    %c0_13 = arith.constant 0 : index
    %c0_14 = arith.constant 0 : index
    %19 = vector.load %arg4[%c0_13, %c0_14] : memref<16x32xf32, #tpu.memory_space<vmem>>, vector<16x32xf32>
    %cst_15 = arith.constant dense<0.000000e+00> : vector<128x32xf32>
    %20 = tpu.matmul %11, %19, %cst_15 {dimension_numbers = #tpu.dot_dimension_numbers<[1], [0], [0], [1], [0, 0, 1, 1], [], []>} : vector<128x16xf32>, vector<16x32xf32>, vector<128x32xf32> -> vector<128x32xf32>
    %c0_16 = arith.constant 0 : index
    %c0_17 = arith.constant 0 : index
    %21 = vector.load %arg5[%c0_16, %c0_17] : memref<1x32xf32, #tpu.memory_space<vmem>>, vector<1x32xf32>
    %22 = vector.broadcast %21 : vector<1x32xf32> to vector<128x32xf32>
    %23 = arith.addf %20, %22 : vector<128x32xf32>
    %24 = vector.extract_strided_slice %18 {offsets = [0, 0], sizes = [128, 32], strides = [1, 1]} : vector<128x64xf32> to vector<128x32xf32>
    %25 = vector.extract_strided_slice %18 {offsets = [0, 32], sizes = [128, 32], strides = [1, 1]} : vector<128x64xf32> to vector<128x32xf32>
    %26 = arith.addf %24, %23 : vector<128x32xf32>
    %27 = arith.negf %25 : vector<128x32xf32>
    %28 = math.exp %27 : vector<128x32xf32>
    %cst_18 = arith.constant 1.000000e+00 : f32
    %29 = vector.broadcast %cst_18 : f32 to vector<128x32xf32>
    %30 = arith.addf %29, %28 : vector<128x32xf32>
    %31 = arith.divf %29, %30 : vector<128x32xf32>
    %32 = arith.mulf %26, %31 : vector<128x32xf32>
    %c0_19 = arith.constant 0 : index
    %c0_20 = arith.constant 0 : index
    %c0_21 = arith.constant 0 : index
    %33 = vector.load %arg6[%c0_19, %c0_20, %c0_21] : memref<1x128x32xf32, #tpu.memory_space<vmem>>, vector<1x128x32xf32>
    %34 = vector.shape_cast %33 : vector<1x128x32xf32> to vector<128x32xf32>
    %35 = vector.shape_cast %32 : vector<128x32xf32> to vector<1x128x32xf32>
    tpu.vector_store %arg6[%c0_19, %c0_20, %c0_21], %35 {strides = array<i32>} : memref<1x128x32xf32, #tpu.memory_space<vmem>>, vector<1x128x32xf32>,
    return
  }
  func.func @transform_0(%arg0: i32) -> (i32, i32, i32) {
    %c0_i32 = arith.constant 0 : i32
    %c0_i32_0 = arith.constant 0 : i32
    %c0_i32_1 = arith.constant 0 : i32
    return %arg0, %c0_i32, %c0_i32_0 : i32, i32, i32
  }
  func.func @transform_1(%arg0: i32) -> (i32, i32, i32) {
    %c0_i32 = arith.constant 0 : i32
    %c0_i32_0 = arith.constant 0 : i32
    %c0_i32_1 = arith.constant 0 : i32
    %c0_i32_2 = arith.constant 0 : i32
    return %c0_i32, %c0_i32_0, %c0_i32_1 : i32, i32, i32
  }
  func.func @transform_2(%arg0: i32) -> (i32, i32) {
    %c0_i32 = arith.constant 0 : i32
    %c0_i32_0 = arith.constant 0 : i32
    %c0_i32_1 = arith.constant 0 : i32
    return %c0_i32, %c0_i32_0 : i32, i32
  }
  func.func @transform_3(%arg0: i32) -> (i32, i32) {
    %c0_i32 = arith.constant 0 : i32
    %c0_i32_0 = arith.constant 0 : i32
    %c0_i32_1 = arith.constant 0 : i32
    return %c0_i32, %c0_i32_0 : i32, i32
  }
  func.func @transform_4(%arg0: i32) -> (i32, i32) {
    %c0_i32 = arith.constant 0 : i32
    %c0_i32_0 = arith.constant 0 : i32
    %c0_i32_1 = arith.constant 0 : i32
    return %c0_i32, %c0_i32_0 : i32, i32
  }
  func.func @transform_5(%arg0: i32) -> (i32, i32, i32) {
    %c0_i32 = arith.constant 0 : i32
    %c0_i32_0 = arith.constant 0 : i32
    %c0_i32_1 = arith.constant 0 : i32
    return %arg0, %c0_i32, %c0_i32_0 : i32, i32, i32
  }
}

module attributes {stable_mosaic.version = 11 : i64} {
  func.func @_ln_kernel(%arg0: i32, %arg1: memref<16x512xf32, #tpu.memory_space<vmem>>, %arg2: memref<1x512xf32, #tpu.memory_space<vmem>>, %arg3: memref<1x512xf32, #tpu.memory_space<vmem>>, %arg4: memref<16x512xf32, #tpu.memory_space<vmem>>) attributes {dimension_semantics = [#tpu.dimension_semantics<parallel>], iteration_bounds = array<i64: 1>, scalar_prefetch = 0 : i64, scratch_operands = 0 : i64, tpu.core_type = #tpu.core_type<tc>, window_params = [{transform_indices = @transform_0, window_bounds = array<i64: 16, 512>}, {pipeline_mode = #tpu.pipeline_mode<synchronous>, transform_indices = @transform_1, window_bounds = array<i64: 1, 512>}, {pipeline_mode = #tpu.pipeline_mode<synchronous>, transform_indices = @transform_2, window_bounds = array<i64: 1, 512>}, {transform_indices = @transform_3, window_bounds = array<i64: 16, 512>}]} {
    %c0 = arith.constant 0 : index
    %c0_0 = arith.constant 0 : index
    %0 = vector.load %arg1[%c0, %c0_0] : memref<16x512xf32, #tpu.memory_space<vmem>>, vector<16x512xf32>
    %cst = arith.constant dense<0.000000e+00> : vector<16xf32>
    %1 = vector.multi_reduction <add>, %0, %cst [1] : vector<16x512xf32> to vector<16xf32>
    %2 = vector.shape_cast %1 : vector<16xf32> to vector<16x1xf32>
    %cst_1 = arith.constant 5.120000e+02 : f32
    %3 = vector.broadcast %cst_1 : f32 to vector<16x1xf32>
    %4 = arith.divf %2, %3 : vector<16x1xf32>
    %5 = vector.broadcast %4 : vector<16x1xf32> to vector<16x512xf32>
    %6 = arith.subf %0, %5 : vector<16x512xf32>
    %7 = arith.mulf %6, %6 : vector<16x512xf32>
    %cst_2 = arith.constant dense<0.000000e+00> : vector<16xf32>
    %8 = vector.multi_reduction <add>, %7, %cst_2 [1] : vector<16x512xf32> to vector<16xf32>
    %9 = vector.shape_cast %8 : vector<16xf32> to vector<16x1xf32>
    %cst_3 = arith.constant 5.120000e+02 : f32
    %10 = vector.broadcast %cst_3 : f32 to vector<16x1xf32>
    %11 = arith.divf %9, %10 : vector<16x1xf32>
    %cst_4 = arith.constant 9.99999974E-6 : f32
    %12 = vector.broadcast %cst_4 : f32 to vector<16x1xf32>
    %13 = arith.addf %11, %12 : vector<16x1xf32>
    %14 = math.rsqrt %13 : vector<16x1xf32>
    %15 = vector.broadcast %14 : vector<16x1xf32> to vector<16x512xf32>
    %16 = arith.mulf %6, %15 : vector<16x512xf32>
    %c0_5 = arith.constant 0 : index
    %c0_6 = arith.constant 0 : index
    %17 = vector.load %arg2[%c0_5, %c0_6] : memref<1x512xf32, #tpu.memory_space<vmem>>, vector<1x512xf32>
    %18 = vector.broadcast %17 : vector<1x512xf32> to vector<16x512xf32>
    %19 = arith.mulf %16, %18 : vector<16x512xf32>
    %c0_7 = arith.constant 0 : index
    %c0_8 = arith.constant 0 : index
    %20 = vector.load %arg3[%c0_7, %c0_8] : memref<1x512xf32, #tpu.memory_space<vmem>>, vector<1x512xf32>
    %21 = vector.broadcast %20 : vector<1x512xf32> to vector<16x512xf32>
    %22 = arith.addf %19, %21 : vector<16x512xf32>
    %c0_9 = arith.constant 0 : index
    %c0_10 = arith.constant 0 : index
    %23 = vector.load %arg4[%c0_9, %c0_10] : memref<16x512xf32, #tpu.memory_space<vmem>>, vector<16x512xf32>
    tpu.vector_store %arg4[%c0_9, %c0_10], %22 {strides = array<i32>} : memref<16x512xf32, #tpu.memory_space<vmem>>, vector<16x512xf32>,
    return
  }
  func.func @transform_0(%arg0: i32) -> (i32, i32) {
    %c0_i32 = arith.constant 0 : i32
    %c0_i32_0 = arith.constant 0 : i32
    return %arg0, %c0_i32 : i32, i32
  }
  func.func @transform_1(%arg0: i32) -> (i32, i32) {
    %c0_i32 = arith.constant 0 : i32
    %c0_i32_0 = arith.constant 0 : i32
    %c0_i32_1 = arith.constant 0 : i32
    return %c0_i32, %c0_i32_0 : i32, i32
  }
  func.func @transform_2(%arg0: i32) -> (i32, i32) {
    %c0_i32 = arith.constant 0 : i32
    %c0_i32_0 = arith.constant 0 : i32
    %c0_i32_1 = arith.constant 0 : i32
    return %c0_i32, %c0_i32_0 : i32, i32
  }
  func.func @transform_3(%arg0: i32) -> (i32, i32) {
    %c0_i32 = arith.constant 0 : i32
    %c0_i32_0 = arith.constant 0 : i32
    return %arg0, %c0_i32 : i32, i32
  }
}

</mosaic_0001>

<bundles_post_ra>
// kernel: tile.11
= control target key start
LH: loop header
LB: loop body
LE: loop exit
PB: predicated region body
PF: predicated region fallthrough
CT: control target
= control target key end

     0   :  { %s28_s0 = inlined_call_operand.vmem [shape: f32[16], index: 0, kind: input, shape index: {}]   ;;  %s29_s1 = inlined_call_operand.vmem [shape: f32[16,16], index: 1, kind: output, shape index: {}]  }
   0x1   :  { %v4_v0 = vld [vmem:[%s28_s0] ss:$0 sm:$0xff] }
   0x2   :  { %5 = vst [vmem:[%s29_s1] sm:$0xff] %v4_v0 }
   0x3   :  { %8 = vst [vmem:[%s29_s1 + $0x8] sm:$0xff] %v4_v0 }

// kernel: tile.12
= control target key start
LH: loop header
LB: loop body
LE: loop exit
PB: predicated region body
PF: predicated region fallthrough
CT: control target
= control target key end

     0   :  { %s7_s6 = smov 3  ;;  %s21_s9 = smov 3  ;;  %vm4_vm0 = vcmask 130048   ;;  %vm11_vm1 = vcmask 1048448   ;;  %vm18_vm2 = vcmask 917248   ;;  %vm25_vm3 = vcmask 786048   ;;  %s119_s0 = inlined_call_operand.vmem [shape: f32[16,16], index: 0, kind: input, shape index: {}]   ;;  %s120_s1 = inlined_call_operand.vmem [shape: f32[256], index: 1, kind: output, shape index: {}]  }
   0x1   :  { %v61_v0 = vld [vmem:[%s119_s0 + $0x7] ss:$8 sm:%s7_s6]   ;;  %s75_s10 = smov 112   ;;  %v63_v1 = vld [vmem:[%s119_s0 + $0x5] ss:$8 sm:%s21_s9]   ;;  %s76_s13 = smov 80  }
   0x2   :  { %9 = vrot.lane.b32.xlu0 %v61_v0, %s75_s10  ;;  %23 = vrot.lane.b32.xlu1 %v63_v1, %s76_s13  ;;  %s14_s14 = smov 3  ;;  %s28_s15 = smov 3  ;;  %vm32_vm4 = vcmask 654848   ;;  %vm39_vm5 = vcmask 523648   ;;  %vm46_vm6 = vcmask 392448   ;;  %vm53_vm7 = vcmask 261248  }
   0x3   :  { %s35_s16 = smov 3  ;;  %v62_v3 = vld [vmem:[%s119_s0 + $0x6] ss:$8 sm:%s14_s14]   ;;  %s77_s21 = smov 48   ;;  %v64_v4 = vld [vmem:[%s119_s0 + $0x4] ss:$8 sm:%s28_s15]  }
   0x4   :  { %v65_v2 = vld [vmem:[%s119_s0 + $0x3] ss:$8 sm:%s35_s16]   ;;  %s42_s24 = smov 3  ;;  %s78_s25 = smov 96  }
   0x5   :  { %37 = vrot.lane.b32.xlu2 %v65_v2, %s77_s21  ;;  %s79_s26 = smov 64   ;;  %s49_s27 = smov 3  ;;  %v66_v5 = vld [vmem:[%s119_s0 + $0x2] ss:$8 sm:%s42_s24]  }
   0x6   :  { %v67_v6 = vld [vmem:[%s119_s0 + $0x1] ss:$8 sm:%s49_s27]   ;;  %s80_s3 = smov 32   ;;  %s81_s4 = smov 16  }
   0x7   :  { %s2_s5 = smov 3 }
   0x8   :  { %v3_v7 = vld [vmem:[%s119_s0] ss:$8 sm:%s2_s5]  }
   0x9   :  { %5 = vst.msk [vmem:[#allocation0] sm:$0x3] %vm4_vm0, %v3_v7  }
   0xa   :  { %16 = vrot.lane.b32.xlu0 %v62_v3, %s78_s25  ;;  %30 = vrot.lane.b32.xlu1 %v64_v4, %s79_s26 }
   0xd   :  { %44 = vrot.lane.b32.xlu2 %v66_v5, %s80_s3 }
  0x12   :  { %51 = vrot.lane.b32.xlu0 %v67_v6, %s81_s4 }
  0x5f   :  { %v38_v8 = vpop.permute.xlu2 %37  }
  0x67   :  { %v45_v9 = vpop.permute.xlu2 %44  }
  0x74   :  { %v10_v10 = vpop.permute.xlu0 %9   ;;  %v24_v11 = vpop.permute.xlu1 %23  }
  0x75   :  { %12 = vst.msk [vmem:[#allocation0] sm:$0x3] %vm11_vm1, %v10_v10  }
  0x7c   :  { %v17_v12 = vpop.permute.xlu0 %16   ;;  %v31_v13 = vpop.permute.xlu1 %30  }
  0x7d   :  { %19 = vst.msk [vmem:[#allocation0] sm:$0x3] %vm18_vm2, %v17_v12  }
  0x7e   :  { %26 = vst.msk [vmem:[#allocation0] sm:$0x3] %vm25_vm3, %v24_v11  }
  0x7f   :  { %33 = vst.msk [vmem:[#allocation0] sm:$0x3] %vm32_vm4, %v31_v13  }
  0x80   :  { %40 = vst.msk [vmem:[#allocation0] sm:$0x3] %vm39_vm5, %v38_v8  }
  0x81   :  { %47 = vst.msk [vmem:[#allocation0] sm:$0x3] %vm46_vm6, %v45_v9  }
  0x84   :  { %v52_v14 = vpop.permute.xlu0 %51  }
  0x85   :  { %54 = vst.msk [vmem:[#allocation0] sm:$0x3] %vm53_vm7, %v52_v14  }
  0x8c   :  { %v57_v15 = vld [vmem:[#allocation0] sm:$0x3] }
  0x8d   :  { %60 = vst [vmem:[%s120_s1] sm:$0x3] %v57_v15 }

// kernel: stconv_block.4
= control target key start
LH: loop header
LB: loop body
LE: loop exit
PB: predicated region body
PF: predicated region fallthrough
CT: control target
= control target key end

     0   :  { %s1520_s18 = smov 0   ;;  %s1896_s0 = inlined_call_operand.vmem [shape: f32[2,192,4], index: 0, kind: input, shape index: {}]   ;;  %s1897_s1 = inlined_call_operand.vmem [shape: f32[3,4,64], index: 1, kind: input, shape index: {}]   ;;  %s1898_s2 = inlined_call_operand.vmem [shape: f32[1,64], index: 2, kind: input, shape index: {}]   ;;  %s1899_s3 = inlined_call_operand.vmem [shape: f32[4,32], index: 3, kind: input, shape index: {}]   ;;  %s1900_s4 = inlined_call_operand.vmem [shape: f32[1,32], index: 4, kind: input, shape index: {}]   ;;  %s1901_s5 = inlined_call_operand.vmem [shape: f32[2,160,32], index: 5, kind: output, shape index: {}]  }
   0x1 LB: > { %s1273_s19 = sadd.s32 4294967295, %s1487_s18   ;;  %p1277_p0 = scmp.ge.s32.totalorder %s1487_s18, 1  ;;  %s1487_s18 = sphi %s1520_s18, %s15_s18  }
   0x2   : > { %p187_p1 = scmp.lt.s32.totalorder %s1487_s18, 3 }
   0x4   : > { %p188_p2 = pnand %p1277_p0, %p187_p1 }
   0x5   : > { %p215_p3 = scmp.lt.s32.totalorder (!%p188_p2), %s1273_s19, 1  ;;  %s1489_s9 = smov (!%p188_p2), 96  }
   0x6   : > { %191 = sbr.rel (%p188_p2) target bundleno = 450 (0x1c2), region = 40 }
   0xb   : > { %vm313_vm0 = vcmask 1043456   ;;  %v1323_v0 = vld [vmem:[%s1897_s1 + $0x8] sm:$0xf]  ;;  %v612_v1 = vld [vmem:[%s1899_s3] sm:$0xf]  ;;  %s1903_s19 = smov (!%p215_p3, %s1273_s19), 1 }
   0xc   : > { %1324 = vmatpush.msk.msra.mxu2 %vm313_vm0, %v1323_v0  ;;  %v1280_v2 = vld [vmem:[%s1897_s1 + $0x4] sm:$0xf]  ;;  %v249_v3 = vld [vmem:[%s1897_s1] sm:$0xf]  ;;  %1345 = vmatpush.msk.msra.mxu3 %vm313_vm0, %v612_v1  ;;  %s1388_s28 = smul.u32 192, %s1903_s19  ;;  %vm252_vm1 = vcmask 31744  }
   0xd   : > { %1281 = vmatpush.msk.msra.mxu0 %vm313_vm0, %v1280_v2  ;;  %1302 = vmatpush.msk.msra.mxu1 %vm313_vm0, %v249_v3  ;;  %v1640_v28 = vld [vmem:[%s1898_s2] ss:$0 sm:$0xff]  ;;  %s1389_s12 = smul.u32 160, %s1903_s19 }
   0xe   : > { %s1546_s6 = scalar_lea.vmem %s1896_s0, %s1388_s28 }
   0xf   : > { %v229_v4 = vld [vmem:[%s1546_s6 + $0x20] sm:$0xff]  ;;  %v227_v5 = vld [vmem:[%s1546_s6 + $0x10] sm:$0xff]  ;;  %v230_v7 = vld [vmem:[%s1546_s6 + $0x28] sm:$0xff]  ;;  %s1781_s15 = scalar_lea.vmem %s1901_s5, %s1389_s12 }
  0x10   : > { %v225_v6 = vld [vmem:[%s1546_s6] sm:$0xff]  ;;  %1325 = vmatmul.msk.f32.vlgmr.msra.gmra.mxu2 %vm252_vm1, %v229_v4  ;;  %1346 = vmatmul.msk.f32.vlgmr.msra.gmra.mxu3 %vm252_vm1, %v229_v4  ;;  %v228_v8 = vld [vmem:[%s1546_s6 + $0x18] sm:$0xff]  ;;  %v226_v9 = vld [vmem:[%s1546_s6 + $0x8] sm:$0xff] }
  0x11   : > { %1282 = vmatmul.msk.f32.vlgmr.msra.gmra.mxu0 %vm252_vm1, %v227_v5  ;;  %1303 = vmatmul.msk.f32.vlgmr.msra.gmra.mxu1 %vm252_vm1, %v225_v6  ;;  %v231_v10 = vld [vmem:[%s1546_s6 + $0x30] sm:$0xff]  ;;  %v232_v11 = vld [vmem:[%s1546_s6 + $0x38] sm:$0xff]  ;;  %v233_v12 = vld [vmem:[%s1546_s6 + $0x40] sm:$0xff] }
  0x12   : > { %v234_v13 = vld [vmem:[%s1546_s6 + $0x48] sm:$0xff]  ;;  %v235_v14 = vld [vmem:[%s1546_s6 + $0x50] sm:$0xff]  ;;  %v236_v15 = vld [vmem:[%s1546_s6 + $0x58] sm:$0xff] }
  0x13   : > { %v237_v16 = vld [vmem:[%s1546_s6 + $0x60] sm:$0xff]  ;;  %v238_v17 = vld [vmem:[%s1546_s6 + $0x68] sm:$0xff]  ;;  %v239_v18 = vld [vmem:[%s1546_s6 + $0x70] sm:$0xff] }
  0x14   : > { %v240_v19 = vld [vmem:[%s1546_s6 + $0x78] sm:$0xff]  ;;  %v241_v20 = vld [vmem:[%s1546_s6 + $0x80] sm:$0xff]  ;;  %v242_v21 = vld [vmem:[%s1546_s6 + $0x88] sm:$0xff] }
  0x15   : > { %v243_v22 = vld [vmem:[%s1546_s6 + $0x90] sm:$0xff]  ;;  %v244_v23 = vld [vmem:[%s1546_s6 + $0x98] sm:$0xff]  ;;  %v245_v24 = vld [vmem:[%s1546_s6 + $0xa0] sm:$0xff] }
  0x16   : > { %v246_v31 = vld [vmem:[%s1546_s6 + $0xa8] sm:$0xff]  ;;  %v247_v39 = vld [vmem:[%s1546_s6 + $0xb0] sm:$0xff]  ;;  %v248_v49 = vld [vmem:[%s1546_s6 + $0xb8] sm:$0xff] }
  0x18   : > { %1326 = vmatmul.msk.f32.gmra.mxu2 %vm252_vm1, %v230_v7  ;;  %1347 = vmatmul.msk.f32.gmra.mxu3 %vm252_vm1, %v230_v7 }
  0x19   : > { %1283 = vmatmul.msk.f32.gmra.mxu0 %vm252_vm1, %v228_v8  ;;  %1304 = vmatmul.msk.f32.gmra.mxu1 %vm252_vm1, %v226_v9 }
  0x20   : > { %1327 = vmatmul.msk.f32.gmra.mxu2 %vm252_vm1, %v231_v10  ;;  %1348 = vmatmul.msk.f32.gmra.mxu3 %vm252_vm1, %v231_v10 }
  0x21   : > { %1284 = vmatmul.msk.f32.gmra.mxu0 %vm252_vm1, %v229_v4  ;;  %1305 = vmatmul.msk.f32.gmra.mxu1 %vm252_vm1, %v227_v5 }
  0x28   : > { %1328 = vmatmul.msk.f32.gmra.mxu2 %vm252_vm1, %v232_v11  ;;  %1349 = vmatmul.msk.f32.gmra.mxu3 %vm252_vm1, %v232_v11 }
  0x29   : > { %1285 = vmatmul.msk.f32.gmra.mxu0 %vm252_vm1, %v230_v7  ;;  %1306 = vmatmul.msk.f32.gmra.mxu1 %vm252_vm1, %v228_v8 }
  0x30   : > { %1329 = vmatmul.msk.f32.gmra.mxu2 %vm252_vm1, %v233_v12  ;;  %1350 = vmatmul.msk.f32.gmra.mxu3 %vm252_vm1, %v233_v12 }
  0x31   : > { %1286 = vmatmul.msk.f32.gmra.mxu0 %vm252_vm1, %v231_v10  ;;  %1307 = vmatmul.msk.f32.gmra.mxu1 %vm252_vm1, %v229_v4 }
  0x38   : > { %1330 = vmatmul.msk.f32.gmra.mxu2 %vm252_vm1, %v234_v13  ;;  %1351 = vmatmul.msk.f32.gmra.mxu3 %vm252_vm1, %v234_v13 }
  0x39   : > { %1287 = vmatmul.msk.f32.gmra.mxu0 %vm252_vm1, %v232_v11  ;;  %1308 = vmatmul.msk.f32.gmra.mxu1 %vm252_vm1, %v230_v7 }
  0x40   : > { %1331 = vmatmul.msk.f32.gmra.mxu2 %vm252_vm1, %v235_v14  ;;  %1352 = vmatmul.msk.f32.gmra.mxu3 %vm252_vm1, %v235_v14 }
  0x41   : > { %1288 = vmatmul.msk.f32.gmra.mxu0 %vm252_vm1, %v233_v12  ;;  %1309 = vmatmul.msk.f32.gmra.mxu1 %vm252_vm1, %v231_v10 }
  0x48   : > { %1332 = vmatmul.msk.f32.gmra.mxu2 %vm252_vm1, %v236_v15  ;;  %1353 = vmatmul.msk.f32.gmra.mxu3 %vm252_vm1, %v236_v15 }
  0x49   : > { %1289 = vmatmul.msk.f32.gmra.mxu0 %vm252_vm1, %v234_v13  ;;  %1310 = vmatmul.msk.f32.gmra.mxu1 %vm252_vm1, %v232_v11 }
  0x50   : > { %1333 = vmatmul.msk.f32.gmra.mxu2 %vm252_vm1, %v237_v16  ;;  %1354 = vmatmul.msk.f32.gmra.mxu3 %vm252_vm1, %v237_v16 }
  0x51   : > { %1290 = vmatmul.msk.f32.gmra.mxu0 %vm252_vm1, %v235_v14  ;;  %1311 = vmatmul.msk.f32.gmra.mxu1 %vm252_vm1, %v233_v12 }
  0x58   : > { %1334 = vmatmul.msk.f32.gmra.mxu2 %vm252_vm1, %v238_v17  ;;  %1355 = vmatmul.msk.f32.gmra.mxu3 %vm252_vm1, %v238_v17 }
  0x59   : > { %1291 = vmatmul.msk.f32.gmra.mxu0 %vm252_vm1, %v236_v15  ;;  %1312 = vmatmul.msk.f32.gmra.mxu1 %vm252_vm1, %v234_v13 }
  0x60   : > { %1335 = vmatmul.msk.f32.gmra.mxu2 %vm252_vm1, %v239_v18  ;;  %1356 = vmatmul.msk.f32.gmra.mxu3 %vm252_vm1, %v239_v18 }
  0x61   : > { %1292 = vmatmul.msk.f32.gmra.mxu0 %vm252_vm1, %v237_v16  ;;  %1313 = vmatmul.msk.f32.gmra.mxu1 %vm252_vm1, %v235_v14 }
  0x68   : > { %1336 = vmatmul.msk.f32.gmra.mxu2 %vm252_vm1, %v240_v19  ;;  %1357 = vmatmul.msk.f32.gmra.mxu3 %vm252_vm1, %v240_v19 }
  0x69   : > { %1293 = vmatmul.msk.f32.gmra.mxu0 %vm252_vm1, %v238_v17  ;;  %1314 = vmatmul.msk.f32.gmra.mxu1 %vm252_vm1, %v236_v15 }
  0x70   : > { %1337 = vmatmul.msk.f32.gmra.mxu2 %vm252_vm1, %v241_v20  ;;  %1358 = vmatmul.msk.f32.gmra.mxu3 %vm252_vm1, %v241_v20 }
  0x71   : > { %1294 = vmatmul.msk.f32.gmra.mxu0 %vm252_vm1, %v239_v18  ;;  %1315 = vmatmul.msk.f32.gmra.mxu1 %vm252_vm1, %v237_v16 }
  0x78   : > { %1338 = vmatmul.msk.f32.gmra.mxu2 %vm252_vm1, %v242_v21  ;;  %1359 = vmatmul.msk.f32.gmra.mxu3 %vm252_vm1, %v242_v21 }
  0x79   : > { %1295 = vmatmul.msk.f32.gmra.mxu0 %vm252_vm1, %v240_v19  ;;  %1316 = vmatmul.msk.f32.gmra.mxu1 %vm252_vm1, %v238_v17 }
  0x80   : > { %1339 = vmatmul.msk.f32.gmra.mxu2 %vm252_vm1, %v243_v22  ;;  %1360 = vmatmul.msk.f32.gmra.mxu3 %vm252_vm1, %v243_v22 }
  0x81   : > { %1296 = vmatmul.msk.f32.gmra.mxu0 %vm252_vm1, %v241_v20  ;;  %1317 = vmatmul.msk.f32.gmra.mxu1 %vm252_vm1, %v239_v18 }
  0x88   : > { %1340 = vmatmul.msk.f32.gmra.mxu2 %vm252_vm1, %v244_v23  ;;  %1361 = vmatmul.msk.f32.gmra.mxu3 %vm252_vm1, %v244_v23 }
  0x89   : > { %1297 = vmatmul.msk.f32.gmra.mxu0 %vm252_vm1, %v242_v21  ;;  %1318 = vmatmul.msk.f32.gmra.mxu1 %vm252_vm1, %v240_v19 }
  0x8e   : > { %v334_v25 = vpop.f32.mrf.mxu0  ;;  %v420_v26 = vpop.f32.mrf.mxu1 }
  0x8f   : > { %v421_v27 = vadd.f32 %v420_v26, %v334_v25 }
  0x90   : > { %1341 = vmatmul.msk.f32.gmra.mxu2 %vm252_vm1, %v245_v24  ;;  %1362 = vmatmul.msk.f32.gmra.mxu3 %vm252_vm1, %v245_v24 }
  0x91   : > { %1298 = vmatmul.msk.f32.gmra.mxu0 %vm252_vm1, %v243_v22  ;;  %1319 = vmatmul.msk.f32.gmra.mxu1 %vm252_vm1, %v241_v20 }
  0x93   : > { %v508_v29 = vpop.f32.mrf.mxu2 }
  0x94   : > { %v568_v30 = vadd.f32 %v508_v29, %v421_v27 }
  0x96   : > { %v1644_v32 = vadd.f32 %v1640_v28, %v568_v30  ;;  %v337_v33 = vpop.f32.mrf.mxu0  ;;  %v423_v34 = vpop.f32.mrf.mxu1 }
  0x97   : > { %v424_v36 = vadd.f32 %v423_v34, %v337_v33 }
  0x98   : > { %v1366_v35 = vmul.f32 -1.442695, %v1644_v32  ;;  %1342 = vmatmul.msk.f32.gmra.mxu2 %vm252_vm1, %v246_v31  ;;  %1363 = vmatmul.msk.f32.gmra.mxu3 %vm252_vm1, %v246_v31 }
  0x99   : > { %1299 = vmatmul.msk.f32.gmra.mxu0 %vm252_vm1, %v244_v23  ;;  %1320 = vmatmul.msk.f32.gmra.mxu1 %vm252_vm1, %v242_v21 }
  0x9a   : > { %1401 = vpow2.f32 %v1366_v35 }
  0x9b   : > { %v511_v37 = vpop.f32.mrf.mxu2 }
  0x9c   : > { %v569_v38 = vadd.f32 %v511_v37, %v424_v36 }
  0x9e   : > { %v1653_v40 = vadd.f32 %v1640_v28, %v569_v38  ;;  %v340_v41 = vpop.f32.mrf.mxu0  ;;  %v426_v42 = vpop.f32.mrf.mxu1 }
  0x9f   : > { %v427_v45 = vadd.f32 %v426_v42, %v340_v41 }
  0xa0   : > { %v1402_v43 = vpop.eup %1401  ;;  %v1367_v44 = vmul.f32 -1.442695, %v1653_v40  ;;  %1343 = vmatmul.msk.f32.gmra.mxu2 %vm252_vm1, %v247_v39  ;;  %1364 = vmatmul.msk.f32.gmra.mxu3 %vm252_vm1, %v247_v39 }
  0xa1   : > { %v777_v46 = vadd.f32 1.0, %v1402_v43  ;;  %1300 = vmatmul.msk.f32.gmra.mxu0 %vm252_vm1, %v245_v24  ;;  %1321 = vmatmul.msk.f32.gmra.mxu1 %vm252_vm1, %v243_v22 }
  0xa2   : > { %1403 = vpow2.f32 %v1367_v44 }
  0xa3   : > { %1405 = vrcp.f32 %v777_v46  ;;  %v514_v47 = vpop.f32.mrf.mxu2  ;;  %v808_v62 = vand.u32 2147483648, %v777_v46  ;;  %v806_v3 = vand.u32 2147483647, %v777_v46  ;;  %vm802_vm3 = vweird.f32 %v777_v46 }
  0xa4   : > { %v570_v48 = vadd.f32 %v514_v47, %v427_v45 }
  0xa5   : > { %v809_v10 = vor.u32 1.1754944e-38, %v808_v62  ;;  %vm807_vm5 = vcmp.eq.f32.partialorder %v806_v3, 8.507059e+37 }
  0xa6   : > { %v1662_v50 = vadd.f32 %v1640_v28, %v570_v48  ;;  %v343_v51 = vpop.f32.mrf.mxu0  ;;  %v429_v52 = vpop.f32.mrf.mxu1 }
  0xa7   : > { %v430_v55 = vadd.f32 %v429_v52, %v343_v51 }
  0xa8   : > { %v1404_v53 = vpop.eup %1403  ;;  %v1368_v54 = vmul.f32 -1.442695, %v1662_v50  ;;  %1344 = vmatmul.msk.f32.gmra.mxu2 %vm252_vm1, %v248_v49  ;;  %1365 = vmatmul.msk.f32.gmra.mxu3 %vm252_vm1, %v248_v49 }
  0xa9   : > { %v1406_v56 = vpop.eup %1405  ;;  %v778_v57 = vadd.f32 1.0, %v1404_v53  ;;  %1301 = vmatmul.msk.f32.gmra.mxu0 %vm252_vm1, %v246_v31  ;;  %1322 = vmatmul.msk.f32.gmra.mxu1 %vm252_vm1, %v244_v23 }
  0xaa   : > { %1407 = vpow2.f32 %v1368_v54  ;;  %v798_v58 = vmul.f32 %v1406_v56, %v777_v46  ;;  %vm803_vm2 = vweird.f32 %v1406_v56 }
  0xab   : > { %1409 = vrcp.f32 %v778_v57  ;;  %v517_v59 = vpop.f32.mrf.mxu2  ;;  %vm804_vm4 = vmor %vm802_vm3, %vm803_vm2  ;;  %v823_v17 = vand.u32 2147483648, %v778_v57  ;;  %v821_v22 = vand.u32 2147483647, %v778_v57  ;;  %vm817_vm7 = vweird.f32 %v778_v57 }
  0xac   : > { %v571_v60 = vadd.f32 %v517_v59, %v430_v55  ;;  %v799_v61 = vsub.f32 1.0, %v798_v58 }
  0xad   : > { %v824_v30 = vor.u32 1.1754944e-38, %v823_v17  ;;  %vm822_vm9 = vcmp.eq.f32.partialorder %v821_v22, 8.507059e+37 }
  0xae   : > { %v1670_v63 = vadd.f32 %v1640_v28, %v571_v60  ;;  %v346_v0 = vpop.f32.mrf.mxu0  ;;  %v432_v1 = vpop.f32.mrf.mxu1  ;;  %v800_v2 = vmul.f32 %v1406_v56, %v799_v61 }
  0xaf   : > { %v433_v6 = vadd.f32 %v432_v1, %v346_v0 }
  0xb0   : > { %v1408_v4 = vpop.eup %1407  ;;  %v1369_v5 = vmul.f32 -1.442695, %v1670_v63  ;;  %v801_v7 = vadd.f32 %v1406_v56, %v800_v2 }
  0xb1   : > { %v1410_v8 = vpop.eup %1409  ;;  %v779_v9 = vadd.f32 1.0, %v1408_v4 }
  0xb2   : > { %1411 = vpow2.f32 %v1369_v5  ;;  %v805_v11 = vsel %vm804_vm4, %v1406_v56, %v801_v7  ;;  %v813_v12 = vmul.f32 %v1410_v8, %v778_v57  ;;  %vm818_vm6 = vweird.f32 %v1410_v8 }
  0xb3   : > { %1413 = vrcp.f32 %v779_v9  ;;  %v520_v13 = vpop.f32.mrf.mxu2  ;;  %v810_v14 = vsel %vm807_vm5, %v809_v10, %v805_v11  ;;  %vm819_vm8 = vmor %vm817_vm7, %vm818_vm6  ;;  %v838_v38 = vand.u32 2147483648, %v779_v9  ;;  %v836_v44 = vand.u32 2147483647, %v779_v9 }
  0xb4   : > { %v572_v15 = vadd.f32 %v520_v13, %v433_v6  ;;  %1117 = vrot.lane.b32.xlu0 %v810_v14, %s1489_s9  ;;  %v814_v16 = vsub.f32 1.0, %v813_v12  ;;  %vm832_vm11 = vweird.f32 %v779_v9 }
  0xb5   : > { %v839_v52 = vor.u32 1.1754944e-38, %v838_v38  ;;  %vm837_vm13 = vcmp.eq.f32.partialorder %v836_v44, 8.507059e+37 }
  0xb6   : > { %v1675_v18 = vadd.f32 %v1640_v28, %v572_v15  ;;  %v349_v19 = vpop.f32.mrf.mxu0  ;;  %v435_v20 = vpop.f32.mrf.mxu1  ;;  %v815_v21 = vmul.f32 %v1410_v8, %v814_v16 }
  0xb7   : > { %v436_v25 = vadd.f32 %v435_v20, %v349_v19 }
  0xb8   : > { %v1412_v23 = vpop.eup %1411  ;;  %v1370_v24 = vmul.f32 -1.442695, %v1675_v18  ;;  %v816_v26 = vadd.f32 %v1410_v8, %v815_v21 }
  0xb9   : > { %v1414_v27 = vpop.eup %1413  ;;  %v780_v29 = vadd.f32 1.0, %v1412_v23 }
  0xba   : > { %1415 = vpow2.f32 %v1370_v24  ;;  %v820_v31 = vsel %vm819_vm8, %v1410_v8, %v816_v26  ;;  %v828_v33 = vmul.f32 %v1414_v27, %v779_v9  ;;  %vm833_vm10 = vweird.f32 %v1414_v27 }
  0xbb   : > { %1417 = vrcp.f32 %v780_v29  ;;  %v523_v34 = vpop.f32.mrf.mxu2  ;;  %v825_v35 = vsel %vm822_vm9, %v824_v30, %v820_v31  ;;  %vm834_vm12 = vmor %vm832_vm11, %vm833_vm10  ;;  %v853_v59 = vand.u32 2147483648, %v780_v29  ;;  %v851_v1 = vand.u32 2147483647, %v780_v29 }
  0xbc   : > { %v573_v36 = vadd.f32 %v523_v34, %v436_v25  ;;  %1119 = vrot.lane.b32.xlu0 %v825_v35, %s1489_s9  ;;  %v829_v37 = vsub.f32 1.0, %v828_v33  ;;  %vm847_vm15 = vweird.f32 %v780_v29 }
  0xbd   : > { %v854_v8 = vor.u32 1.1754944e-38, %v853_v59  ;;  %vm852_vm1 = vcmp.eq.f32.partialorder %v851_v1, 8.507059e+37 }
  0xbe   : > { %v1680_v39 = vadd.f32 %v1640_v28, %v573_v36  ;;  %v352_v41 = vpop.f32.mrf.mxu0  ;;  %v438_v42 = vpop.f32.mrf.mxu1  ;;  %v830_v43 = vmul.f32 %v1414_v27, %v829_v37 }
  0xbf   : > { %v439_v47 = vadd.f32 %v438_v42, %v352_v41 }
  0xc0   : > { %v1416_v45 = vpop.eup %1415  ;;  %v1371_v46 = vmul.f32 -1.442695, %v1680_v39  ;;  %v831_v48 = vadd.f32 %v1414_v27, %v830_v43 }
  0xc1   : > { %v1418_v49 = vpop.eup %1417  ;;  %v781_v51 = vadd.f32 1.0, %v1416_v45 }
  0xc2   : > { %1419 = vpow2.f32 %v1371_v46  ;;  %v835_v53 = vsel %vm834_vm12, %v1414_v27, %v831_v48  ;;  %v843_v54 = vmul.f32 %v1418_v49, %v780_v29  ;;  %vm848_vm14 = vweird.f32 %v1418_v49 }
  0xc3   : > { %1421 = vrcp.f32 %v781_v51  ;;  %v526_v55 = vpop.f32.mrf.mxu2  ;;  %v840_v56 = vsel %vm837_vm13, %v839_v52, %v835_v53  ;;  %vm849_vm0 = vmor %vm847_vm15, %vm848_vm14  ;;  %v868_v15 = vand.u32 2147483648, %v781_v51  ;;  %v866_v21 = vand.u32 2147483647, %v781_v51 }
  0xc4   : > { %v574_v57 = vadd.f32 %v526_v55, %v439_v47  ;;  %1121 = vrot.lane.b32.xlu1 %v840_v56, %s1489_s9  ;;  %v844_v58 = vsub.f32 1.0, %v843_v54  ;;  %vm862_vm3 = vweird.f32 %v781_v51 }
  0xc5   : > { %v869_v29 = vor.u32 1.1754944e-38, %v868_v15  ;;  %vm867_vm5 = vcmp.eq.f32.partialorder %v866_v21, 8.507059e+37 }
  0xc6   : > { %v1685_v60 = vadd.f32 %v1640_v28, %v574_v57  ;;  %v355_v61 = vpop.f32.mrf.mxu0  ;;  %v441_v62 = vpop.f32.mrf.mxu1  ;;  %v845_v0 = vmul.f32 %v1418_v49, %v844_v58 }
  0xc7   : > { %v442_v4 = vadd.f32 %v441_v62, %v355_v61 }
  0xc8   : > { %v1420_v2 = vpop.eup %1419  ;;  %v1372_v3 = vmul.f32 -1.442695, %v1685_v60  ;;  %v846_v5 = vadd.f32 %v1418_v49, %v845_v0 }
  0xc9   : > { %v1422_v6 = vpop.eup %1421  ;;  %v782_v7 = vadd.f32 1.0, %v1420_v2 }
  0xca   : > { %1423 = vpow2.f32 %v1372_v3  ;;  %v850_v9 = vsel %vm849_vm0, %v1418_v49, %v846_v5  ;;  %v858_v10 = vmul.f32 %v1422_v6, %v781_v51  ;;  %vm863_vm2 = vweird.f32 %v1422_v6 }
  0xcb   : > { %1425 = vrcp.f32 %v782_v7  ;;  %v529_v11 = vpop.f32.mrf.mxu2  ;;  %v855_v12 = vsel %vm852_vm1, %v854_v8, %v850_v9  ;;  %vm864_vm4 = vmor %vm862_vm3, %vm863_vm2  ;;  %v883_v37 = vand.u32 2147483648, %v782_v7  ;;  %v881_v44 = vand.u32 2147483647, %v782_v7 }
  0xcc   : > { %v575_v13 = vadd.f32 %v529_v11, %v442_v4  ;;  %1123 = vrot.lane.b32.xlu1 %v855_v12, %s1489_s9  ;;  %v859_v14 = vsub.f32 1.0, %v858_v10  ;;  %vm877_vm7 = vweird.f32 %v782_v7  ;;  %v1703_v12 = vpop.f32.mrf.mxu3 }
  0xcd   : > { %v884_v52 = vor.u32 1.1754944e-38, %v883_v37  ;;  %vm882_vm9 = vcmp.eq.f32.partialorder %v881_v44, 8.507059e+37 }
  0xce   : > { %v1690_v16 = vadd.f32 %v1640_v28, %v575_v13  ;;  %v358_v17 = vpop.f32.mrf.mxu0  ;;  %v444_v19 = vpop.f32.mrf.mxu1  ;;  %v860_v20 = vmul.f32 %v1422_v6, %v859_v14 }
  0xcf   : > { %v445_v24 = vadd.f32 %v444_v19, %v358_v17 }
  0xd0   : > { %v1424_v22 = vpop.eup %1423  ;;  %v1373_v23 = vmul.f32 -1.442695, %v1690_v16  ;;  %v861_v25 = vadd.f32 %v1422_v6, %v860_v20 }
  0xd1   : > { %v1426_v26 = vpop.eup %1425  ;;  %v783_v27 = vadd.f32 1.0, %v1424_v22 }
  0xd2   : > { %1427 = vpow2.f32 %v1373_v23  ;;  %v865_v30 = vsel %vm864_vm4, %v1422_v6, %v861_v25  ;;  %v873_v31 = vmul.f32 %v1426_v26, %v782_v7  ;;  %vm878_vm6 = vweird.f32 %v1426_v26 }
  0xd3   : > { %1429 = vrcp.f32 %v783_v27  ;;  %v532_v33 = vpop.f32.mrf.mxu2  ;;  %v870_v34 = vsel %vm867_vm5, %v869_v29, %v865_v30  ;;  %vm879_vm8 = vmor %vm877_vm7, %vm878_vm6  ;;  %v898_v59 = vand.u32 2147483648, %v783_v27  ;;  %v896_v2 = vand.u32 2147483647, %v783_v27 }
  0xd4   : > { %v576_v35 = vadd.f32 %v532_v33, %v445_v24  ;;  %1125 = vrot.lane.b32.xlu2 %v870_v34, %s1489_s9  ;;  %v874_v36 = vsub.f32 1.0, %v873_v31  ;;  %vm892_vm11 = vweird.f32 %v783_v27 }
  0xd5   : > { %v899_v9 = vor.u32 1.1754944e-38, %v898_v59  ;;  %vm897_vm13 = vcmp.eq.f32.partialorder %v896_v2, 8.507059e+37 }
  0xd6   : > { %v1695_v38 = vadd.f32 %v1640_v28, %v576_v35  ;;  %v361_v41 = vpop.f32.mrf.mxu0  ;;  %v447_v42 = vpop.f32.mrf.mxu1  ;;  %v875_v43 = vmul.f32 %v1426_v26, %v874_v36 }
  0xd7   : > { %v448_v47 = vadd.f32 %v447_v42, %v361_v41 }
  0xd8   : > { %v1428_v45 = vpop.eup %1427  ;;  %v1374_v46 = vmul.f32 -1.442695, %v1695_v38  ;;  %v876_v48 = vadd.f32 %v1426_v26, %v875_v43  ;;  %v1711_v43 = vpop.f32.mrf.mxu3 }
  0xd9   : > { %v1430_v49 = vpop.eup %1429  ;;  %v784_v51 = vadd.f32 1.0, %v1428_v45 }
  0xda   : > { %1431 = vpow2.f32 %v1374_v46  ;;  %v880_v53 = vsel %vm879_vm8, %v1426_v26, %v876_v48  ;;  %v888_v54 = vmul.f32 %v1430_v49, %v783_v27  ;;  %vm893_vm10 = vweird.f32 %v1430_v49 }
  0xdb   : > { %1433 = vrcp.f32 %v784_v51  ;;  %v535_v55 = vpop.f32.mrf.mxu2  ;;  %v885_v56 = vsel %vm882_vm9, %v884_v52, %v880_v53  ;;  %vm894_vm12 = vmor %vm892_vm11, %vm893_vm10  ;;  %v913_v19 = vand.u32 2147483648, %v784_v51  ;;  %v911_v24 = vand.u32 2147483647, %v784_v51 }
  0xdc   : > { %v577_v57 = vadd.f32 %v535_v55, %v448_v47  ;;  %1127 = vrot.lane.b32.xlu2 %v885_v56, %s1489_s9  ;;  %v889_v58 = vsub.f32 1.0, %v888_v54  ;;  %vm907_vm15 = vweird.f32 %v784_v51 }
  0xdd   : > { %v914_v33 = vor.u32 1.1754944e-38, %v913_v19  ;;  %vm912_vm1 = vcmp.eq.f32.partialorder %v911_v24, 8.507059e+37 }
  0xde   : > { %v1700_v61 = vadd.f32 %v1640_v28, %v577_v57  ;;  %v364_v62 = vpop.f32.mrf.mxu0  ;;  %v450_v0 = vpop.f32.mrf.mxu1  ;;  %v890_v1 = vmul.f32 %v1430_v49, %v889_v58 }
  0xdf   : > { %v451_v5 = vadd.f32 %v450_v0, %v364_v62 }
  0xe0   : > { %v1432_v3 = vpop.eup %1431  ;;  %v1375_v4 = vmul.f32 -1.442695, %v1700_v61  ;;  %v891_v6 = vadd.f32 %v1430_v49, %v890_v1 }
  0xe1   : > { %v1434_v7 = vpop.eup %1433  ;;  %v785_v8 = vadd.f32 1.0, %v1432_v3 }
  0xe2   : > { %1435 = vpow2.f32 %v1375_v4  ;;  %v895_v10 = vsel %vm894_vm12, %v1430_v49, %v891_v6  ;;  %v903_v11 = vmul.f32 %v1434_v7, %v784_v51  ;;  %vm908_vm14 = vweird.f32 %v1434_v7 }
  0xe3   : > { %1437 = vrcp.f32 %v785_v8  ;;  %v538_v13 = vpop.f32.mrf.mxu2  ;;  %v900_v14 = vsel %vm897_vm13, %v899_v9, %v895_v10  ;;  %vm909_vm0 = vmor %vm907_vm15, %vm908_vm14  ;;  %v928_v44 = vand.u32 2147483648, %v785_v8  ;;  %v926_v49 = vand.u32 2147483647, %v785_v8  ;;  %v1721_v9 = vpop.f32.mrf.mxu3 }
  0xe4   : > { %v578_v15 = vadd.f32 %v538_v13, %v451_v5  ;;  %1129 = vrot.lane.b32.xlu0 %v900_v14, %s1489_s9  ;;  %v904_v17 = vsub.f32 1.0, %v903_v11  ;;  %vm922_vm3 = vweird.f32 %v785_v8 }
  0xe5   : > { %v929_v57 = vor.u32 1.1754944e-38, %v928_v44  ;;  %vm927_vm5 = vcmp.eq.f32.partialorder %v926_v49, 8.507059e+37 }
  0xe6   : > { %v1707_v20 = vadd.f32 %v1640_v28, %v578_v15  ;;  %v367_v21 = vpop.f32.mrf.mxu0  ;;  %v453_v22 = vpop.f32.mrf.mxu1  ;;  %v905_v23 = vmul.f32 %v1434_v7, %v904_v17 }
  0xe7   : > { %v454_v27 = vadd.f32 %v453_v22, %v367_v21 }
  0xe8   : > { %v1436_v25 = vpop.eup %1435  ;;  %v1376_v26 = vmul.f32 -1.442695, %v1707_v20  ;;  %v906_v29 = vadd.f32 %v1434_v7, %v905_v23 }
  0xe9   : > { %v1438_v30 = vpop.eup %1437  ;;  %v786_v31 = vadd.f32 1.0, %v1436_v25 }
  0xea   : > { %1439 = vpow2.f32 %v1376_v26  ;;  %v910_v34 = vsel %vm909_vm0, %v1434_v7, %v906_v29  ;;  %v918_v35 = vmul.f32 %v1438_v30, %v785_v8  ;;  %vm923_vm2 = vweird.f32 %v1438_v30 }
  0xeb   : > { %1441 = vrcp.f32 %v786_v31  ;;  %v541_v36 = vpop.f32.mrf.mxu2  ;;  %v915_v37 = vsel %vm912_vm1, %v914_v33, %v910_v34  ;;  %vm924_vm4 = vmor %vm922_vm3, %vm923_vm2  ;;  %v943_v3 = vand.u32 2147483648, %v786_v31  ;;  %v941_v8 = vand.u32 2147483647, %v786_v31  ;;  %v1729_v44 = vpop.f32.mrf.mxu3 }
  0xec   : > { %v579_v41 = vadd.f32 %v541_v36, %v454_v27  ;;  %1131 = vrot.lane.b32.xlu1 %v915_v37, %s1489_s9  ;;  %v919_v42 = vsub.f32 1.0, %v918_v35  ;;  %vm937_vm7 = vweird.f32 %v786_v31 }
  0xed   : > { %v944_v19 = vor.u32 1.1754944e-38, %v943_v3  ;;  %vm942_vm9 = vcmp.eq.f32.partialorder %v941_v8, 8.507059e+37 }
  0xee   : > { %v1714_v45 = vadd.f32 %v1640_v28, %v579_v41  ;;  %v370_v46 = vpop.f32.mrf.mxu0  ;;  %v456_v47 = vpop.f32.mrf.mxu1  ;;  %v920_v48 = vmul.f32 %v1438_v30, %v919_v42 }
  0xef   : > { %v457_v53 = vadd.f32 %v456_v47, %v370_v46 }
  0xf0   : > { %v1440_v51 = vpop.eup %1439  ;;  %v1377_v52 = vmul.f32 -1.442695, %v1714_v45  ;;  %v921_v54 = vadd.f32 %v1438_v30, %v920_v48 }
  0xf1   : > { %v1442_v55 = vpop.eup %1441  ;;  %v787_v56 = vadd.f32 1.0, %v1440_v51 }
  0xf2   : > { %1443 = vpow2.f32 %v1377_v52  ;;  %v925_v58 = vsel %vm924_vm4, %v1438_v30, %v921_v54  ;;  %v933_v59 = vmul.f32 %v1442_v55, %v786_v31  ;;  %vm938_vm6 = vweird.f32 %v1442_v55 }
  0xf3   : > { %1445 = vrcp.f32 %v787_v56  ;;  %v544_v62 = vpop.f32.mrf.mxu2  ;;  %v930_v0 = vsel %vm927_vm5, %v929_v57, %v925_v58  ;;  %vm939_vm8 = vmor %vm937_vm7, %vm938_vm6  ;;  %v958_v27 = vand.u32 2147483648, %v787_v56  ;;  %v956_v34 = vand.u32 2147483647, %v787_v56 }
  0xf4   : > { %v580_v1 = vadd.f32 %v544_v62, %v457_v53  ;;  %1133 = vrot.lane.b32.xlu2 %v930_v0, %s1489_s9  ;;  %v934_v2 = vsub.f32 1.0, %v933_v59  ;;  %vm952_vm11 = vweird.f32 %v787_v56 }
  0xf5   : > { %v959_v47 = vor.u32 1.1754944e-38, %v958_v27  ;;  %vm957_vm13 = vcmp.eq.f32.partialorder %v956_v34, 8.507059e+37 }
  0xf6   : > { %v1719_v4 = vadd.f32 %v1640_v28, %v580_v1  ;;  %v373_v5 = vpop.f32.mrf.mxu0  ;;  %v459_v6 = vpop.f32.mrf.mxu1  ;;  %v935_v7 = vmul.f32 %v1442_v55, %v934_v2 }
  0xf7   : > { %v460_v13 = vadd.f32 %v459_v6, %v373_v5 }
  0xf8   : > { %v1444_v10 = vpop.eup %1443  ;;  %v1378_v11 = vmul.f32 -1.442695, %v1719_v4  ;;  %v936_v14 = vadd.f32 %v1442_v55, %v935_v7 }
  0xf9   : > { %v1446_v15 = vpop.eup %1445  ;;  %v788_v17 = vadd.f32 1.0, %v1444_v10 }
  0xfa   : > { %1447 = vpow2.f32 %v1378_v11  ;;  %v940_v21 = vsel %vm939_vm8, %v1442_v55, %v936_v14  ;;  %v948_v22 = vmul.f32 %v1446_v15, %v787_v56  ;;  %vm953_vm10 = vweird.f32 %v1446_v15  ;;  %v1736_v11 = vpop.f32.mrf.mxu3 }
  0xfb   : > { %1449 = vrcp.f32 %v788_v17  ;;  %v547_v23 = vpop.f32.mrf.mxu2  ;;  %v945_v24 = vsel %vm942_vm9, %v944_v19, %v940_v21  ;;  %vm954_vm12 = vmor %vm952_vm11, %vm953_vm10  ;;  %v973_v55 = vand.u32 2147483648, %v788_v17  ;;  %v971_v62 = vand.u32 2147483647, %v788_v17 }
  0xfc   : > { %v581_v25 = vadd.f32 %v547_v23, %v460_v13  ;;  %1135 = vrot.lane.b32.xlu0 %v945_v24, %s1489_s9  ;;  %v949_v26 = vsub.f32 1.0, %v948_v22  ;;  %vm967_vm15 = vweird.f32 %v788_v17 }
  0xfd   : > { %v974_v7 = vor.u32 1.1754944e-38, %v973_v55  ;;  %vm972_vm1 = vcmp.eq.f32.partialorder %v971_v62, 8.507059e+37 }
  0xfe   : > { %v1726_v29 = vadd.f32 %v1640_v28, %v581_v25  ;;  %v376_v30 = vpop.f32.mrf.mxu0  ;;  %v462_v31 = vpop.f32.mrf.mxu1  ;;  %v950_v33 = vmul.f32 %v1446_v15, %v949_v26 }
  0xff   : > { %v463_v37 = vadd.f32 %v462_v31, %v376_v30 }
 0x100   : > { %v1448_v35 = vpop.eup %1447  ;;  %v1379_v36 = vmul.f32 -1.442695, %v1726_v29  ;;  %v951_v41 = vadd.f32 %v1446_v15, %v950_v33 }
 0x101   : > { %v1450_v42 = vpop.eup %1449  ;;  %v789_v46 = vadd.f32 1.0, %v1448_v35 }
 0x102   : > { %1451 = vpow2.f32 %v1379_v36  ;;  %v955_v48 = vsel %vm954_vm12, %v1446_v15, %v951_v41  ;;  %v963_v49 = vmul.f32 %v1450_v42, %v788_v17  ;;  %vm968_vm14 = vweird.f32 %v1450_v42 }
 0x103   : > { %1453 = vrcp.f32 %v789_v46  ;;  %v550_v51 = vpop.f32.mrf.mxu2  ;;  %v960_v52 = vsel %vm957_vm13, %v959_v47, %v955_v48  ;;  %vm969_vm0 = vmor %vm967_vm15, %vm968_vm14  ;;  %v988_v21 = vand.u32 2147483648, %v789_v46  ;;  %v986_v25 = vand.u32 2147483647, %v789_v46 }
 0x104   : > { %v582_v53 = vadd.f32 %v550_v51, %v463_v37  ;;  %1137 = vrot.lane.b32.xlu1 %v960_v52, %s1489_s9  ;;  %v964_v54 = vsub.f32 1.0, %v963_v49  ;;  %vm982_vm3 = vweird.f32 %v789_v46  ;;  %v1744_v49 = vpop.f32.mrf.mxu3  ;;  %vm1197_vm14 = vcmask 261120  }
 0x105   : > { %v989_v35 = vor.u32 1.1754944e-38, %v988_v21  ;;  %vm987_vm5 = vcmp.eq.f32.partialorder %v986_v25, 8.507059e+37 }
 0x106   : > { %v1733_v56 = vadd.f32 %v1640_v28, %v582_v53  ;;  %v379_v57 = vpop.f32.mrf.mxu0  ;;  %v465_v58 = vpop.f32.mrf.mxu1  ;;  %v965_v59 = vmul.f32 %v1450_v42, %v964_v54 }
 0x107   : > { %v466_v2 = vadd.f32 %v465_v58, %v379_v57 }
 0x108   : > { %v1452_v0 = vpop.eup %1451  ;;  %v1380_v1 = vmul.f32 -1.442695, %v1733_v56  ;;  %v966_v3 = vadd.f32 %v1450_v42, %v965_v59 }
 0x109   : > { %v1454_v5 = vpop.eup %1453  ;;  %v790_v6 = vadd.f32 1.0, %v1452_v0 }
 0x10a   : > { %1455 = vpow2.f32 %v1380_v1  ;;  %v970_v8 = vsel %vm969_vm0, %v1450_v42, %v966_v3  ;;  %v978_v10 = vmul.f32 %v1454_v5, %v789_v46  ;;  %vm983_vm2 = vweird.f32 %v1454_v5 }
 0x10b   : > { %1457 = vrcp.f32 %v790_v6  ;;  %v553_v13 = vpop.f32.mrf.mxu2  ;;  %v975_v14 = vsel %vm972_vm1, %v974_v7, %v970_v8  ;;  %vm984_vm4 = vmor %vm982_vm3, %vm983_vm2  ;;  %v1003_v51 = vand.u32 2147483648, %v790_v6  ;;  %v1001_v55 = vand.u32 2147483647, %v790_v6 }
 0x10c   : > { %v583_v15 = vadd.f32 %v553_v13, %v466_v2  ;;  %1139 = vrot.lane.b32.xlu2 %v975_v14, %s1489_s9  ;;  %v979_v19 = vsub.f32 1.0, %v978_v10  ;;  %vm997_vm7 = vweird.f32 %v790_v6  ;;  %v1762_v25 = vpop.f32.mrf.mxu3 }
 0x10d   : > { %v1004_v2 = vor.u32 1.1754944e-38, %v1003_v51  ;;  %vm1002_vm9 = vcmp.eq.f32.partialorder %v1001_v55, 8.507059e+37 }
 0x10e   : > { %v1740_v17 = vadd.f32 %v1640_v28, %v583_v15  ;;  %v382_v22 = vpop.f32.mrf.mxu0  ;;  %v468_v23 = vpop.f32.mrf.mxu1  ;;  %v980_v24 = vmul.f32 %v1454_v5, %v979_v19 }
 0x10f   : > { %v469_v30 = vadd.f32 %v468_v23, %v382_v22 }
 0x110   : > { %v1456_v26 = vpop.eup %1455  ;;  %v1381_v27 = vmul.f32 -1.442695, %v1740_v17  ;;  %v981_v31 = vadd.f32 %v1454_v5, %v980_v24 }
 0x111   : > { %v1458_v33 = vpop.eup %1457  ;;  %v791_v34 = vadd.f32 1.0, %v1456_v26 }
 0x112   : > { %1459 = vpow2.f32 %v1381_v27  ;;  %v985_v36 = vsel %vm984_vm4, %v1454_v5, %v981_v31  ;;  %v993_v37 = vmul.f32 %v1458_v33, %v790_v6  ;;  %vm998_vm6 = vweird.f32 %v1458_v33  ;;  %v1757_v6 = vld [vmem:[%s1900_s4] ss:$0 sm:$0xff] }
 0x113   : > { %1461 = vrcp.f32 %v791_v34  ;;  %v556_v41 = vpop.f32.mrf.mxu2  ;;  %v990_v42 = vsel %vm987_vm5, %v989_v35, %v985_v36  ;;  %vm999_vm8 = vmor %vm997_vm7, %vm998_vm6  ;;  %v1018_v14 = vand.u32 2147483648, %v791_v34  ;;  %v1016_v23 = vand.u32 2147483647, %v791_v34 }
 0x114   : > { %v584_v47 = vadd.f32 %v556_v41, %v469_v30  ;;  %1141 = vrot.lane.b32.xlu0 %v990_v42, %s1489_s9  ;;  %v994_v48 = vsub.f32 1.0, %v993_v37  ;;  %vm1012_vm11 = vweird.f32 %v791_v34 }
 0x115   : > { %v1019_v36 = vor.u32 1.1754944e-38, %v1018_v14  ;;  %vm1017_vm13 = vcmp.eq.f32.partialorder %v1016_v23, 8.507059e+37 }
 0x116   : > { %v1747_v46 = vadd.f32 %v1640_v28, %v584_v47  ;;  %v385_v52 = vpop.f32.mrf.mxu0  ;;  %v471_v53 = vpop.f32.mrf.mxu1  ;;  %v995_v54 = vmul.f32 %v1458_v33, %v994_v48 }
 0x117   : > { %v472_v59 = vadd.f32 %v471_v53, %v385_v52 }
 0x118   : > { %v1460_v57 = vpop.eup %1459  ;;  %v1382_v58 = vmul.f32 -1.442695, %v1747_v46  ;;  %v996_v62 = vadd.f32 %v1458_v33, %v995_v54 }
 0x119   : > { %v1462_v0 = vpop.eup %1461  ;;  %v1750_v1 = vadd.f32 1.0, %v1460_v57 }
 0x11a   : > { %1463 = vpow2.f32 %v1382_v58  ;;  %v1000_v3 = vsel %vm999_vm8, %v1458_v33, %v996_v62  ;;  %v1008_v5 = vmul.f32 %v1462_v0, %v791_v34  ;;  %vm1013_vm10 = vweird.f32 %v1462_v0 }
 0x11b   : > { %1465 = vrcp.f32 %v1750_v1  ;;  %v559_v7 = vpop.f32.mrf.mxu2  ;;  %v1005_v8 = vsel %vm1002_vm9, %v1004_v2, %v1000_v3  ;;  %v638_v33 = vadd.f32 %v1757_v6, %v1703_v12  ;;  %vm1014_vm12 = vmor %vm1012_vm11, %vm1013_vm10  ;;  %v1033_v51 = vand.u32 2147483648, %v1750_v1 }
 0x11c   : > { %v585_v10 = vadd.f32 %v559_v7, %v472_v59  ;;  %1143 = vrot.lane.b32.xlu1 %v1005_v8, %s1489_s9  ;;  %v1009_v13 = vsub.f32 1.0, %v1008_v5  ;;  %v1031_v57 = vand.u32 2147483647, %v1750_v1  ;;  %vm1027_vm0 = vweird.f32 %v1750_v1 }
 0x11d   : > { %v697_v12 = vadd.f32 %v638_v33, %v1644_v32  ;;  %v641_v5 = vadd.f32 %v1757_v6, %v1711_v43  ;;  %v650_v7 = vadd.f32 %v1757_v6, %v1736_v11 }
 0x11e   : > { %v1760_v15 = vadd.f32 %v1640_v28, %v585_v10  ;;  %v388_v19 = vpop.f32.mrf.mxu0  ;;  %v474_v21 = vpop.f32.mrf.mxu1  ;;  %v1010_v22 = vmul.f32 %v1462_v0, %v1009_v13  ;;  %v1034_v10 = vor.u32 1.1754944e-38, %v1033_v51  ;;  %vm1032_vm2 = vcmp.eq.f32.partialorder %v1031_v57, 8.507059e+37 }
 0x11f   : > { %v475_v27 = vadd.f32 %v474_v21, %v388_v19  ;;  %v1794_v13 = vpop.f32.mrf.mxu3  ;;  %v698_v23 = vadd.f32 %v641_v5, %v1653_v40 }
 0x120   : > { %v1464_v24 = vpop.eup %1463  ;;  %v1383_v26 = vmul.f32 -1.442695, %v1760_v15  ;;  %v1011_v30 = vadd.f32 %v1462_v0, %v1010_v22  ;;  %v701_v22 = vadd.f32 %v650_v7, %v1675_v18 }
 0x121   : > { %v1466_v31 = vpop.eup %1465  ;;  %v1767_v35 = vadd.f32 1.0, %v1464_v24 }
 0x122   : > { %1467 = vpow2.f32 %v1383_v26  ;;  %v1015_v37 = vsel %vm1014_vm12, %v1462_v0, %v1011_v30  ;;  %v1023_v41 = vmul.f32 %v1466_v31, %v1750_v1  ;;  %vm1028_vm15 = vweird.f32 %v1466_v31 }
 0x123   : > { %1469 = vrcp.f32 %v1767_v35  ;;  %v562_v42 = vpop.f32.mrf.mxu2  ;;  %v1020_v47 = vsel %vm1017_vm13, %v1019_v36, %v1015_v37  ;;  %vm1029_vm1 = vmor %vm1027_vm0, %vm1028_vm15  ;;  %v1048_v24 = vand.u32 2147483648, %v1767_v35  ;;  %v1046_v33 = vand.u32 2147483647, %v1767_v35 }
 0x124   : > { %v586_v48 = vadd.f32 %v562_v42, %v475_v27  ;;  %1145 = vrot.lane.b32.xlu2 %v1020_v47, %s1489_s9  ;;  %v1024_v34 = vsub.f32 1.0, %v1023_v41  ;;  %vm1042_vm4 = vweird.f32 %v1767_v35  ;;  %v653_v47 = vadd.f32 %v1757_v6, %v1744_v49 }
 0x125   : > { %vm1047_vm6 = vcmp.eq.f32.partialorder %v1046_v33, 8.507059e+37 }
 0x126   : > { %v1776_v52 = vadd.f32 %v1640_v28, %v586_v48  ;;  %v1118_v53 = vpop.permute.xlu0 %1117  ;;  %v391_v54 = vpop.f32.mrf.mxu0  ;;  %v1025_v55 = vmul.f32 %v1466_v31, %v1024_v34  ;;  %v1049_v34 = vor.u32 1.1754944e-38, %v1048_v24  ;;  %v702_v49 = vadd.f32 %v653_v47, %v1680_v39 }
 0x127   : > { %v1177_v58 = vmul.f32 %v1118_v53, %v697_v12  ;;  %v477_v59 = vpop.f32.mrf.mxu1  ;;  %v661_v53 = vpop.f32.mrf.mxu3  ;;  %v647_v39 = vadd.f32 %v1757_v6, %v1729_v44 }
 0x128   : > { %v1468_v32 = vpop.eup %1467  ;;  %v1384_v62 = vmul.f32 -1.442695, %v1776_v52  ;;  %v478_v0 = vadd.f32 %v477_v59, %v391_v54  ;;  %v1026_v2 = vadd.f32 %v1466_v31, %v1025_v55 }
 0x129   : > { %v1470_v3 = vpop.eup %1469  ;;  %v1790_v8 = vadd.f32 1.0, %v1468_v32  ;;  %1198 = vst.msk [vmem:[%s1781_s15] sm:$0xff] %vm1197_vm14, %v1177_v58 }
 0x12a   : > { %1471 = vpow2.f32 %v1384_v62  ;;  %v1030_v14 = vsel %vm1029_vm1, %v1466_v31, %v1026_v2  ;;  %v1038_v1 = vmul.f32 %v1470_v3, %v1767_v35  ;;  %vm1043_vm3 = vweird.f32 %v1470_v3 }
 0x12b   : > { %1473 = vrcp.f32 %v1790_v8  ;;  %v565_v19 = vpop.f32.mrf.mxu2  ;;  %v1035_v43 = vsel %vm1032_vm2, %v1034_v10, %v1030_v14  ;;  %vm1044_vm5 = vmor %vm1042_vm4, %vm1043_vm3  ;;  %v1063_v55 = vand.u32 2147483648, %v1790_v8  ;;  %v1061_v32 = vand.u32 2147483647, %v1790_v8 }
 0x12c   : > { %v587_v21 = vadd.f32 %v565_v19, %v478_v0  ;;  %1147 = vrot.lane.b32.xlu0 %v1035_v43, %s1489_s9  ;;  %v1039_v11 = vsub.f32 1.0, %v1038_v1  ;;  %vm1057_vm8 = vweird.f32 %v1790_v8  ;;  %v700_v19 = vadd.f32 %v647_v39, %v1670_v63 }
 0x12d   : > { %v1064_v7 = vor.u32 1.1754944e-38, %v1063_v55  ;;  %vm1062_vm10 = vcmp.eq.f32.partialorder %v1061_v32, 8.507059e+37 }
 0x12e   : > { %v1803_v26 = vadd.f32 %v1640_v28, %v587_v21  ;;  %v1126_v27 = vpop.permute.xlu2 %1125  ;;  %v1120_v30 = vpop.permute.xlu0 %1119  ;;  %v1040_v31 = vmul.f32 %v1470_v3, %v1039_v11  ;;  %v644_v28 = vadd.f32 %v1757_v6, %v1721_v9 }
 0x12f   : > { %v1181_v36 = vmul.f32 %v1126_v27, %v701_v22  ;;  %v1178_v37 = vmul.f32 %v1120_v30, %v698_v23  ;;  %v664_v44 = vpop.f32.mrf.mxu3 }
 0x130   : > { %v1472_v41 = vpop.eup %1471  ;;  %v1385_v18 = vmul.f32 -1.442695, %v1803_v26  ;;  %v1041_v42 = vadd.f32 %v1470_v3, %v1040_v31  ;;  %v699_v54 = vadd.f32 %v644_v28, %v1662_v50  ;;  %v662_v28 = vadd.f32 %v1757_v6, %v661_v53 }
 0x131   : > { %v1474_v40 = vpop.eup %1473  ;;  %v795_v48 = vadd.f32 1.0, %v1472_v41  ;;  %1202 = vst.msk [vmem:[%s1781_s15 + $0x20] sm:$0xff] %vm1197_vm14, %v1181_v36 }
 0x132   : > { %1475 = vpow2.f32 %v1385_v18  ;;  %1199 = vst.msk [vmem:[%s1781_s15 + $0x8] sm:$0xff] %vm1197_vm14, %v1178_v37  ;;  %v1045_v12 = vsel %vm1044_vm5, %v1470_v3, %v1041_v42  ;;  %v1053_v51 = vmul.f32 %v1474_v40, %v1790_v8  ;;  %vm1058_vm7 = vweird.f32 %v1474_v40 }
 0x133   : > { %1477 = vrcp.f32 %v795_v48  ;;  %v1050_v35 = vsel %vm1047_vm6, %v1049_v34, %v1045_v12  ;;  %vm1059_vm9 = vmor %vm1057_vm8, %vm1058_vm7  ;;  %v1078_v43 = vand.u32 2147483648, %v795_v48  ;;  %v1076_v22 = vand.u32 2147483647, %v795_v48 }
 0x134   : > { %1149 = vrot.lane.b32.xlu1 %v1050_v35, %s1489_s9  ;;  %v1054_v9 = vsub.f32 1.0, %v1053_v51  ;;  %vm1072_vm12 = vweird.f32 %v795_v48  ;;  %v705_v12 = vadd.f32 %v662_v28, %v1695_v38 }
 0x135   : > { %v1079_v30 = vor.u32 1.1754944e-38, %v1078_v43  ;;  %vm1077_vm15 = vcmp.eq.f32.partialorder %v1076_v22, 8.507059e+37 }
 0x136   : > { %v1128_v57 = vpop.permute.xlu2 %1127  ;;  %v1122_v58 = vpop.permute.xlu1 %1121  ;;  %v1055_v59 = vmul.f32 %v1474_v40, %v1054_v9  ;;  %v656_v9 = vadd.f32 %v1757_v6, %v1762_v25 }
 0x137   : > { %v1182_v62 = vmul.f32 %v1128_v57, %v702_v49  ;;  %v1179_v0 = vmul.f32 %v1122_v58, %v699_v54  ;;  %v667_v42 = vpop.f32.mrf.mxu3  ;;  %v659_v57 = vadd.f32 %v1757_v6, %v1794_v13  ;;  %v665_v13 = vadd.f32 %v1757_v6, %v664_v44 }
 0x138   : > { %v1476_v2 = vpop.eup %1475  ;;  %v1056_v3 = vadd.f32 %v1474_v40, %v1055_v59  ;;  %v703_v53 = vadd.f32 %v656_v9, %v1685_v60 }
 0x139   : > { %v1478_v5 = vpop.eup %1477  ;;  %v796_v50 = vadd.f32 1.0, %v1476_v2  ;;  %1203 = vst.msk [vmem:[%s1781_s15 + $0x28] sm:$0xff] %vm1197_vm14, %v1182_v62  ;;  %v704_v58 = vadd.f32 %v659_v57, %v1690_v16 }
 0x13a   : > { %1200 = vst.msk [vmem:[%s1781_s15 + $0x10] sm:$0xff] %vm1197_vm14, %v1179_v0  ;;  %v1060_v10 = vsel %vm1059_vm9, %v1474_v40, %v1056_v3  ;;  %v1068_v14 = vmul.f32 %v1478_v5, %v795_v48  ;;  %vm1073_vm11 = vweird.f32 %v1478_v5  ;;  %v706_v3 = vadd.f32 %v665_v13, %v1700_v61 }
 0x13b   : > { %1479 = vrcp.f32 %v796_v50  ;;  %v1065_v1 = vsel %vm1062_vm10, %v1064_v7, %v1060_v10  ;;  %vm1074_vm13 = vmor %vm1072_vm12, %vm1073_vm11  ;;  %v1093_v37 = vand.u32 2147483648, %v796_v50  ;;  %v1091_v18 = vand.u32 2147483647, %v796_v50 }
 0x13c   : > { %1151 = vrot.lane.b32.xlu2 %v1065_v1, %s1489_s9  ;;  %v1069_v8 = vsub.f32 1.0, %v1068_v14  ;;  %vm1087_vm1 = vweird.f32 %v796_v50 }
 0x13d   : > { %v1094_v47 = vor.u32 1.1754944e-38, %v1093_v37  ;;  %vm1092_vm3 = vcmp.eq.f32.partialorder %v1091_v18, 8.507059e+37 }
 0x13e   : > { %v1124_v21 = vpop.permute.xlu1 %1123  ;;  %v1070_v11 = vmul.f32 %v1478_v5, %v1069_v8 }
 0x13f   : > { %v1180_v23 = vmul.f32 %v1124_v21, %v700_v19  ;;  %v670_v49 = vpop.f32.mrf.mxu3 }
 0x140   : > { %v1071_v24 = vadd.f32 %v1478_v5, %v1070_v11  ;;  %v671_v25 = vadd.f32 %v1757_v6, %v670_v49 }
 0x141   : > { %v1480_v27 = vpop.eup %1479  ;;  %1201 = vst.msk [vmem:[%s1781_s15 + $0x18] sm:$0xff] %vm1197_vm14, %v1180_v23 }
 0x142   : > { %v1075_v31 = vsel %vm1074_vm13, %v1478_v5, %v1071_v24  ;;  %v1083_v33 = vmul.f32 %v1480_v27, %v796_v50  ;;  %vm1088_vm0 = vweird.f32 %v1480_v27  ;;  %v708_v60 = vadd.f32 %v671_v25, %v1714_v45 }
 0x143   : > { %v1080_v36 = vsel %vm1077_vm15, %v1079_v30, %v1075_v31  ;;  %vm1089_vm2 = vmor %vm1087_vm1, %vm1088_vm0  ;;  %v668_v50 = vadd.f32 %v1757_v6, %v667_v42 }
 0x144   : > { %1153 = vrot.lane.b32.xlu0 %v1080_v36, %s1489_s9  ;;  %v1084_v63 = vsub.f32 1.0, %v1083_v33 }
 0x145   : > { %v707_v45 = vadd.f32 %v668_v50, %v1707_v20 }
 0x146   : > { %v1085_v41 = vmul.f32 %v1480_v27, %v1084_v63 }
 0x147   : > { %v673_v38 = vpop.f32.mrf.mxu3 }
 0x148   : > { %v1086_v40 = vadd.f32 %v1480_v27, %v1085_v41  ;;  %v674_v43 = vadd.f32 %v1757_v6, %v673_v38 }
 0x14a   : > { %v1090_v48 = vsel %vm1089_vm2, %v1480_v27, %v1086_v40  ;;  %v709_v20 = vadd.f32 %v674_v43, %v1719_v4 }
 0x14b   : > { %v1095_v34 = vsel %vm1092_vm3, %v1094_v47, %v1090_v48 }
 0x14c   : > { %1155 = vrot.lane.b32.xlu1 %v1095_v34, %s1489_s9 }
 0x14e   : > { %v1134_v51 = vpop.permute.xlu2 %1133 }
 0x14f   : > { %v1185_v35 = vmul.f32 %v1134_v51, %v705_v12  ;;  %v676_v62 = vpop.f32.mrf.mxu3 }
 0x150   : > { %v677_v22 = vadd.f32 %v1757_v6, %v676_v62 }
 0x151   : > { %1206 = vst.msk [vmem:[%s1781_s15 + $0x40] sm:$0xff] %vm1197_vm14, %v1185_v35 }
 0x156   : > { %v1130_v54 = vpop.permute.xlu0 %1129 }
 0x157   : > { %v1183_v55 = vmul.f32 %v1130_v54, %v703_v53  ;;  %v679_v39 = vpop.f32.mrf.mxu3 }
 0x158   : > { %v680_v14 = vadd.f32 %v1757_v6, %v679_v39 }
 0x159   : > { %1204 = vst.msk [vmem:[%s1781_s15 + $0x30] sm:$0xff] %vm1197_vm14, %v1183_v55 }
 0x15a   : > { %v711_v61 = vadd.f32 %v680_v14, %v1733_v56  ;;  %v710_v56 = vadd.f32 %v677_v22, %v1726_v29 }
 0x15e   : > { %v1132_v59 = vpop.permute.xlu1 %1131 }
 0x15f   : > { %v1184_v32 = vmul.f32 %v1132_v59, %v704_v58  ;;  %v682_v1 = vpop.f32.mrf.mxu3 }
 0x160   : > { %v683_v36 = vadd.f32 %v1757_v6, %v682_v1 }
 0x161   : > { %1205 = vst.msk [vmem:[%s1781_s15 + $0x38] sm:$0xff] %vm1197_vm14, %v1184_v32 }
 0x162   : > { %v712_v63 = vadd.f32 %v683_v36, %v1740_v17 }
 0x166   : > { %v1140_v0 = vpop.permute.xlu2 %1139 }
 0x167   : > { %v1188_v2 = vmul.f32 %v1140_v0, %v708_v60  ;;  %v685_v44 = vpop.f32.mrf.mxu3 }
 0x168   : > { %v686_v41 = vadd.f32 %v1757_v6, %v685_v44 }
 0x169   : > { %1209 = vst.msk [vmem:[%s1781_s15 + $0x58] sm:$0xff] %vm1197_vm14, %v1188_v2 }
 0x16a   : > { %v713_v18 = vadd.f32 %v686_v41, %v1747_v46 }
 0x16e   : > { %v1136_v16 = vpop.permute.xlu0 %1135 }
 0x16f   : > { %v1186_v5 = vmul.f32 %v1136_v16, %v706_v3  ;;  %v688_v23 = vpop.f32.mrf.mxu3 }
 0x170   : > { %v689_v30 = vadd.f32 %v1757_v6, %v688_v23 }
 0x171   : > { %1207 = vst.msk [vmem:[%s1781_s15 + $0x48] sm:$0xff] %vm1197_vm14, %v1186_v5 }
 0x172   : > { %v714_v31 = vadd.f32 %v689_v30, %v1760_v15 }
 0x176   : > { %v1138_v7 = vpop.permute.xlu1 %1137 }
 0x177   : > { %v1187_v10 = vmul.f32 %v1138_v7, %v707_v45  ;;  %v691_v40 = vpop.f32.mrf.mxu3 }
 0x178   : > { %v692_v28 = vadd.f32 %v1757_v6, %v691_v40 }
 0x179   : > { %1208 = vst.msk [vmem:[%s1781_s15 + $0x50] sm:$0xff] %vm1197_vm14, %v1187_v10 }
 0x17a   : > { %v715_v47 = vadd.f32 %v692_v28, %v1776_v52 }
 0x17e   : > { %v1146_v8 = vpop.permute.xlu2 %1145 }
 0x17f   : > { %v1191_v19 = vmul.f32 %v1146_v8, %v711_v61  ;;  %v694_v17 = vpop.f32.mrf.mxu3 }
 0x180   : > { %v695_v12 = vadd.f32 %v1757_v6, %v694_v17 }
 0x181   : > { %1212 = vst.msk [vmem:[%s1781_s15 + $0x70] sm:$0xff] %vm1197_vm14, %v1191_v19 }
 0x182   : > { %v716_v51 = vadd.f32 %v695_v12, %v1803_v26 }
 0x186   : > { %v1142_v21 = vpop.permute.xlu0 %1141 }
 0x187   : > { %v1189_v11 = vmul.f32 %v1142_v21, %v709_v20 }
 0x189   : > { %1210 = vst.msk [vmem:[%s1781_s15 + $0x60] sm:$0xff] %vm1197_vm14, %v1189_v11 }
 0x18e   : > { %v1144_v24 = vpop.permute.xlu1 %1143 }
 0x18f   : > { %v1190_v27 = vmul.f32 %v1144_v24, %v710_v56 }
 0x191   : > { %1211 = vst.msk [vmem:[%s1781_s15 + $0x68] sm:$0xff] %vm1197_vm14, %v1190_v27 }
 0x196   : > { %v1152_v4 = vpop.permute.xlu2 %1151 }
 0x197   : > { %v1194_v33 = vmul.f32 %v1152_v4, %v714_v31 }
 0x199   : > { %1215 = vst.msk [vmem:[%s1781_s15 + $0x88] sm:$0xff] %vm1197_vm14, %v1194_v33 }
 0x19e   : > { %v1148_v29 = vpop.permute.xlu0 %1147 }
 0x19f   : > { %v1192_v37 = vmul.f32 %v1148_v29, %v712_v63 }
 0x1a1   : > { %1213 = vst.msk [vmem:[%s1781_s15 + $0x78] sm:$0xff] %vm1197_vm14, %v1192_v37 }
 0x1a6   : > { %v1150_v42 = vpop.permute.xlu1 %1149 }
 0x1a7   : > { %v1193_v15 = vmul.f32 %v1150_v42, %v713_v18 }
 0x1a9   : > { %1214 = vst.msk [vmem:[%s1781_s15 + $0x80] sm:$0xff] %vm1197_vm14, %v1193_v15 }
 0x1b6   : > { %v1154_v48 = vpop.permute.xlu0 %1153 }
 0x1b7   : > { %v1195_v34 = vmul.f32 %v1154_v48, %v715_v47 }
 0x1b9   : > { %1216 = vst.msk [vmem:[%s1781_s15 + $0x90] sm:$0xff] %vm1197_vm14, %v1195_v34 }
 0x1be   : > { %v1156_v35 = vpop.permute.xlu1 %1155 }
 0x1bf   : > { %v1196_v46 = vmul.f32 %v1156_v35, %v716_v51 }
 0x1c1   : > { %1217 = vst.msk [vmem:[%s1781_s15 + $0x98] sm:$0xff] %vm1197_vm14, %v1196_v46 }
 0x1c2 PF: > { %s15_s18 = sadd.s32 1, %s1487_s18  }
 0x1c3   : > { %p12_p4 = scmp.ge.s32.totalorder %s15_s18, 4  }
 0x1c5   :  { %14 = sbr.rel (!%p12_p4) target bundleno = 1 (0x1), region = 72 }

// kernel: stconv_block.5
= control target key start
LH: loop header
LB: loop body
LE: loop exit
PB: predicated region body
PF: predicated region fallthrough
CT: control target
= control target key end

     0   :  { %s877_s1 = inlined_call_operand.vmem [shape: f32[512,256], index: 1, kind: input, shape index: {}]   ;;  %s878_s0 = inlined_call_operand.vmem [shape: f32[20,512], index: 0, kind: input, shape index: {}]   ;;  %s879_s2 = inlined_call_operand.vmem [shape: f32[1,256], index: 2, kind: input, shape index: {}]   ;;  %s880_s3 = inlined_call_operand.vmem [shape: f32[20,256], index: 3, kind: output, shape index: {}]  }
   0x1   :  { %v120_v0 = vld [vmem:[%s877_s1 + $0x2f0] sm:$0xff]  ;;  %v118_v2 = vld [vmem:[%s877_s1 + $0x2e0] sm:$0xff]  ;;  %v121_v62 = vld [vmem:[%s877_s1 + $0x2f8] sm:$0xff] }
   0x2   :  { %v56_v1 = vld [vmem:[%s877_s1 + $0xf0] sm:$0xff]  ;;  %212 = vmatpush.msra.mxu2 %v120_v0  ;;  %v54_v4 = vld [vmem:[%s877_s1 + $0xe0] sm:$0xff]  ;;  %v57_v0 = vld [vmem:[%s877_s1 + $0xf8] sm:$0xff] }
   0x3   :  { %160 = vmatpush.msra.mxu0 %v56_v1  ;;  %v152_v3 = vld [vmem:[%s877_s1 + $0x3f0] sm:$0xff]  ;;  %v150_v7 = vld [vmem:[%s877_s1 + $0x3e0] sm:$0xff]  ;;  %v153_v1 = vld [vmem:[%s877_s1 + $0x3f8] sm:$0xff] }
   0x4   :  { %v88_v5 = vld [vmem:[%s877_s1 + $0x1f0] sm:$0xff]  ;;  %238 = vmatpush.msra.mxu3 %v152_v3  ;;  %213 = vmatpush.msra.mxu2 %v118_v2  ;;  %v86_v9 = vld [vmem:[%s877_s1 + $0x1e0] sm:$0xff]  ;;  %v119_v2 = vld [vmem:[%s877_s1 + $0x2e8] sm:$0xff] }
   0x5   :  { %186 = vmatpush.msra.mxu1 %v88_v5  ;;  %v116_v6 = vld [vmem:[%s877_s1 + $0x2d0] sm:$0xff]  ;;  %161 = vmatpush.msra.mxu0 %v54_v4  ;;  %v114_v11 = vld [vmem:[%s877_s1 + $0x2c0] sm:$0xff]  ;;  %v55_v4 = vld [vmem:[%s877_s1 + $0xe8] sm:$0xff] }
   0x6   :  { %v52_v8 = vld [vmem:[%s877_s1 + $0xd0] sm:$0xff]  ;;  %239 = vmatpush.msra.mxu3 %v150_v7  ;;  %v50_v12 = vld [vmem:[%s877_s1 + $0xc0] sm:$0xff]  ;;  %214 = vmatpush.msra.mxu2 %v116_v6  ;;  %v89_v5 = vld [vmem:[%s877_s1 + $0x1f8] sm:$0xff] }
   0x7   :  { %v148_v10 = vld [vmem:[%s877_s1 + $0x3d0] sm:$0xff]  ;;  %187 = vmatpush.msra.mxu1 %v86_v9  ;;  %162 = vmatpush.msra.mxu0 %v52_v8  ;;  %v146_v14 = vld [vmem:[%s877_s1 + $0x3c0] sm:$0xff]  ;;  %v117_v6 = vld [vmem:[%s877_s1 + $0x2d8] sm:$0xff] }
   0x8   :  { %v84_v13 = vld [vmem:[%s877_s1 + $0x1d0] sm:$0xff]  ;;  %v82_v15 = vld [vmem:[%s877_s1 + $0x1c0] sm:$0xff]  ;;  %240 = vmatpush.msra.mxu3 %v148_v10  ;;  %215 = vmatpush.msra.mxu2 %v114_v11  ;;  %v151_v7 = vld [vmem:[%s877_s1 + $0x3e8] sm:$0xff] }
   0x9   :  { %188 = vmatpush.msra.mxu1 %v84_v13  ;;  %v112_v16 = vld [vmem:[%s877_s1 + $0x2b0] sm:$0xff]  ;;  %163 = vmatpush.msra.mxu0 %v50_v12  ;;  %v110_v20 = vld [vmem:[%s877_s1 + $0x2a0] sm:$0xff]  ;;  %v53_v8 = vld [vmem:[%s877_s1 + $0xd8] sm:$0xff] }
   0xa   :  { %v48_v17 = vld [vmem:[%s877_s1 + $0xb0] sm:$0xff]  ;;  %241 = vmatpush.msra.mxu3 %v146_v14  ;;  %v46_v21 = vld [vmem:[%s877_s1 + $0xa0] sm:$0xff]  ;;  %216 = vmatpush.msra.mxu2 %v112_v16  ;;  %v87_v9 = vld [vmem:[%s877_s1 + $0x1e8] sm:$0xff] }
   0xb   :  { %v144_v18 = vld [vmem:[%s877_s1 + $0x3b0] sm:$0xff]  ;;  %189 = vmatpush.msra.mxu1 %v82_v15  ;;  %164 = vmatpush.msra.mxu0 %v48_v17  ;;  %v142_v22 = vld [vmem:[%s877_s1 + $0x3a0] sm:$0xff]  ;;  %v115_v10 = vld [vmem:[%s877_s1 + $0x2c8] sm:$0xff] }
   0xc   :  { %v80_v19 = vld [vmem:[%s877_s1 + $0x1b0] sm:$0xff]  ;;  %v78_v23 = vld [vmem:[%s877_s1 + $0x1a0] sm:$0xff]  ;;  %242 = vmatpush.msra.mxu3 %v144_v18  ;;  %217 = vmatpush.msra.mxu2 %v110_v20  ;;  %v149_v11 = vld [vmem:[%s877_s1 + $0x3d8] sm:$0xff] }
   0xd   :  { %190 = vmatpush.msra.mxu1 %v80_v19  ;;  %v108_v24 = vld [vmem:[%s877_s1 + $0x290] sm:$0xff]  ;;  %165 = vmatpush.msra.mxu0 %v46_v21  ;;  %v106_v28 = vld [vmem:[%s877_s1 + $0x280] sm:$0xff]  ;;  %v51_v13 = vld [vmem:[%s877_s1 + $0xc8] sm:$0xff] }
   0xe   :  { %v44_v25 = vld [vmem:[%s877_s1 + $0x90] sm:$0xff]  ;;  %243 = vmatpush.msra.mxu3 %v142_v22  ;;  %v42_v29 = vld [vmem:[%s877_s1 + $0x80] sm:$0xff]  ;;  %218 = vmatpush.msra.mxu2 %v108_v24  ;;  %v85_v14 = vld [vmem:[%s877_s1 + $0x1d8] sm:$0xff] }
   0xf   :  { %v140_v26 = vld [vmem:[%s877_s1 + $0x390] sm:$0xff]  ;;  %191 = vmatpush.msra.mxu1 %v78_v23  ;;  %166 = vmatpush.msra.mxu0 %v44_v25  ;;  %v138_v30 = vld [vmem:[%s877_s1 + $0x380] sm:$0xff]  ;;  %v113_v15 = vld [vmem:[%s877_s1 + $0x2b8] sm:$0xff] }
  0x10   :  { %v76_v27 = vld [vmem:[%s877_s1 + $0x190] sm:$0xff]  ;;  %v74_v31 = vld [vmem:[%s877_s1 + $0x180] sm:$0xff]  ;;  %244 = vmatpush.msra.mxu3 %v140_v26  ;;  %219 = vmatpush.msra.mxu2 %v106_v28  ;;  %v147_v16 = vld [vmem:[%s877_s1 + $0x3c8] sm:$0xff] }
  0x11   :  { %192 = vmatpush.msra.mxu1 %v76_v27  ;;  %v104_v32 = vld [vmem:[%s877_s1 + $0x270] sm:$0xff]  ;;  %167 = vmatpush.msra.mxu0 %v42_v29  ;;  %v102_v36 = vld [vmem:[%s877_s1 + $0x260] sm:$0xff]  ;;  %v658_v18 = vld [vmem:[%s878_s0 + $0x18] sm:$0xff] }
  0x12   :  { %v40_v33 = vld [vmem:[%s877_s1 + $0x70] sm:$0xff]  ;;  %245 = vmatpush.msra.mxu3 %v138_v30  ;;  %v38_v37 = vld [vmem:[%s877_s1 + $0x60] sm:$0xff]  ;;  %220 = vmatpush.msra.mxu2 %v104_v32  ;;  %v49_v19 = vld [vmem:[%s877_s1 + $0xb8] sm:$0xff] }
  0x13   :  { %v136_v34 = vld [vmem:[%s877_s1 + $0x370] sm:$0xff]  ;;  %193 = vmatpush.msra.mxu1 %v74_v31  ;;  %168 = vmatpush.msra.mxu0 %v40_v33  ;;  %v134_v38 = vld [vmem:[%s877_s1 + $0x360] sm:$0xff]  ;;  %v83_v20 = vld [vmem:[%s877_s1 + $0x1c8] sm:$0xff] }
  0x14   :  { %v72_v35 = vld [vmem:[%s877_s1 + $0x170] sm:$0xff]  ;;  %v70_v39 = vld [vmem:[%s877_s1 + $0x160] sm:$0xff]  ;;  %246 = vmatpush.msra.mxu3 %v136_v34  ;;  %221 = vmatpush.msra.mxu2 %v102_v36  ;;  %v111_v21 = vld [vmem:[%s877_s1 + $0x2a8] sm:$0xff] }
  0x15   :  { %194 = vmatpush.msra.mxu1 %v72_v35  ;;  %v100_v40 = vld [vmem:[%s877_s1 + $0x250] sm:$0xff]  ;;  %169 = vmatpush.msra.mxu0 %v38_v37  ;;  %v98_v44 = vld [vmem:[%s877_s1 + $0x240] sm:$0xff]  ;;  %v145_v22 = vld [vmem:[%s877_s1 + $0x3b8] sm:$0xff] }
  0x16   :  { %v36_v41 = vld [vmem:[%s877_s1 + $0x50] sm:$0xff]  ;;  %247 = vmatpush.msra.mxu3 %v134_v38  ;;  %v34_v45 = vld [vmem:[%s877_s1 + $0x40] sm:$0xff]  ;;  %222 = vmatpush.msra.mxu2 %v100_v40  ;;  %v676_v23 = vld [vmem:[%s878_s0 + $0x8] sm:$0xff] }
  0x17   :  { %v132_v42 = vld [vmem:[%s877_s1 + $0x350] sm:$0xff]  ;;  %195 = vmatpush.msra.mxu1 %v70_v39  ;;  %170 = vmatpush.msra.mxu0 %v36_v41  ;;  %v130_v46 = vld [vmem:[%s877_s1 + $0x340] sm:$0xff]  ;;  %v47_v24 = vld [vmem:[%s877_s1 + $0xa8] sm:$0xff] }
  0x18   :  { %v68_v43 = vld [vmem:[%s877_s1 + $0x150] sm:$0xff]  ;;  %v66_v47 = vld [vmem:[%s877_s1 + $0x140] sm:$0xff]  ;;  %248 = vmatpush.msra.mxu3 %v132_v42  ;;  %223 = vmatpush.msra.mxu2 %v98_v44  ;;  %v81_v25 = vld [vmem:[%s877_s1 + $0x1b8] sm:$0xff] }
  0x19   :  { %196 = vmatpush.msra.mxu1 %v68_v43  ;;  %v96_v48 = vld [vmem:[%s877_s1 + $0x230] sm:$0xff]  ;;  %171 = vmatpush.msra.mxu0 %v34_v45  ;;  %v94_v52 = vld [vmem:[%s877_s1 + $0x220] sm:$0xff]  ;;  %v109_v26 = vld [vmem:[%s877_s1 + $0x298] sm:$0xff] }
  0x1a   :  { %v32_v49 = vld [vmem:[%s877_s1 + $0x30] sm:$0xff]  ;;  %249 = vmatpush.msra.mxu3 %v130_v46  ;;  %v30_v53 = vld [vmem:[%s877_s1 + $0x20] sm:$0xff]  ;;  %224 = vmatpush.msra.mxu2 %v96_v48  ;;  %v143_v27 = vld [vmem:[%s877_s1 + $0x3a8] sm:$0xff] }
  0x1b   :  { %v128_v50 = vld [vmem:[%s877_s1 + $0x330] sm:$0xff]  ;;  %197 = vmatpush.msra.mxu1 %v66_v47  ;;  %172 = vmatpush.msra.mxu0 %v32_v49  ;;  %v126_v54 = vld [vmem:[%s877_s1 + $0x320] sm:$0xff]  ;;  %v45_v28 = vld [vmem:[%s877_s1 + $0x98] sm:$0xff] }
  0x1c   :  { %v64_v51 = vld [vmem:[%s877_s1 + $0x130] sm:$0xff]  ;;  %v62_v55 = vld [vmem:[%s877_s1 + $0x120] sm:$0xff]  ;;  %250 = vmatpush.msra.mxu3 %v128_v50  ;;  %225 = vmatpush.msra.mxu2 %v94_v52  ;;  %v79_v29 = vld [vmem:[%s877_s1 + $0x1a8] sm:$0xff] }
  0x1d   :  { %198 = vmatpush.msra.mxu1 %v64_v51  ;;  %v92_v56 = vld [vmem:[%s877_s1 + $0x210] sm:$0xff]  ;;  %173 = vmatpush.msra.mxu0 %v30_v53  ;;  %v90_v60 = vld [vmem:[%s877_s1 + $0x200] sm:$0xff]  ;;  %v107_v30 = vld [vmem:[%s877_s1 + $0x288] sm:$0xff] }
  0x1e   :  { %v28_v57 = vld [vmem:[%s877_s1 + $0x10] sm:$0xff]  ;;  %251 = vmatpush.msra.mxu3 %v126_v54  ;;  %v26_v61 = vld [vmem:[%s877_s1] sm:$0xff]  ;;  %226 = vmatpush.msra.mxu2 %v92_v56  ;;  %v141_v31 = vld [vmem:[%s877_s1 + $0x398] sm:$0xff] }
  0x1f   :  { %v124_v58 = vld [vmem:[%s877_s1 + $0x310] sm:$0xff]  ;;  %199 = vmatpush.msra.mxu1 %v62_v55  ;;  %174 = vmatpush.msra.mxu0 %v28_v57  ;;  %v122_v63 = vld [vmem:[%s877_s1 + $0x300] sm:$0xff]  ;;  %v43_v33 = vld [vmem:[%s877_s1 + $0x88] sm:$0xff] }
  0x20   :  { %v60_v59 = vld [vmem:[%s877_s1 + $0x110] sm:$0xff]  ;;  %252 = vmatpush.msra.mxu3 %v124_v58  ;;  %227 = vmatpush.msra.mxu2 %v90_v60  ;;  %v58_v3 = vld [vmem:[%s877_s1 + $0x100] sm:$0xff]  ;;  %v77_v34 = vld [vmem:[%s877_s1 + $0x198] sm:$0xff] }
  0x21   :  { %200 = vmatpush.msra.mxu1 %v60_v59  ;;  %175 = vmatpush.msra.mxu0 %v26_v61  ;;  %v635_v12 = vld [vmem:[%s878_s0 + $0x10] sm:$0xff]  ;;  %v652_v17 = vld [vmem:[%s878_s0] sm:$0xff]  ;;  %v105_v35 = vld [vmem:[%s877_s1 + $0x278] sm:$0xff] }
  0x22   :  { %316 = vmatpush.msrb.mxu2 %v121_v62  ;;  %253 = vmatpush.msra.mxu3 %v122_v63  ;;  %v707_v32 = vld [vmem:[%s878_s0 + $0x30] sm:$0xff]  ;;  %v139_v36 = vld [vmem:[%s877_s1 + $0x388] sm:$0xff]  ;;  %v724_v37 = vld [vmem:[%s878_s0 + $0x20] sm:$0xff] }
  0x23   :  { %264 = vmatpush.msrb.mxu0 %v57_v0  ;;  %201 = vmatpush.msra.mxu1 %v58_v3  ;;  %v730_v38 = vld [vmem:[%s878_s0 + $0x38] sm:$0xff]  ;;  %v75_v40 = vld [vmem:[%s877_s1 + $0x188] sm:$0xff]  ;;  %v24_v52 = vld [vmem:[%s878_s0 + $0x50] sm:$0xf] }
  0x24   :  { %342 = vmatpush.msrb.mxu3 %v153_v1  ;;  %317 = vmatpush.msrb.mxu2 %v119_v2  ;;  %v41_v39 = vld [vmem:[%s877_s1 + $0x78] sm:$0xff]  ;;  %v103_v41 = vld [vmem:[%s877_s1 + $0x268] sm:$0xff]  ;;  %v22_v57 = vld [vmem:[%s878_s0 + $0x40] sm:$0xf] }
  0x25   :  { %265 = vmatpush.msrb.mxu0 %v55_v4  ;;  %290 = vmatpush.msrb.mxu1 %v89_v5  ;;  %v137_v42 = vld [vmem:[%s877_s1 + $0x378] sm:$0xff]  ;;  %v748_v43 = vld [vmem:[%s878_s0 + $0x28] sm:$0xff] }
  0x26   :  { %318 = vmatpush.msrb.mxu2 %v117_v6  ;;  %343 = vmatpush.msrb.mxu3 %v151_v7  ;;  %v39_v44 = vld [vmem:[%s877_s1 + $0x68] sm:$0xff]  ;;  %v73_v45 = vld [vmem:[%s877_s1 + $0x178] sm:$0xff] }
  0x27   :  { %266 = vmatpush.msrb.mxu0 %v53_v8  ;;  %291 = vmatpush.msrb.mxu1 %v87_v9  ;;  %v101_v46 = vld [vmem:[%s877_s1 + $0x258] sm:$0xff]  ;;  %v135_v47 = vld [vmem:[%s877_s1 + $0x368] sm:$0xff] }
  0x28   :  { %319 = vmatpush.msrb.mxu2 %v115_v10  ;;  %344 = vmatpush.msrb.mxu3 %v149_v11  ;;  %v37_v48 = vld [vmem:[%s877_s1 + $0x58] sm:$0xff]  ;;  %v71_v49 = vld [vmem:[%s877_s1 + $0x168] sm:$0xff] }
  0x29   :  { %228 = vmatmul.f32.vlgmr.msra.gmra.mxu2 %v635_v12  ;;  %267 = vmatpush.msrb.mxu0 %v51_v13  ;;  %v99_v50 = vld [vmem:[%s877_s1 + $0x248] sm:$0xff]  ;;  %v133_v51 = vld [vmem:[%s877_s1 + $0x358] sm:$0xff] }
  0x2a   :  { %292 = vmatpush.msrb.mxu1 %v85_v14  ;;  %320 = vmatpush.msrb.mxu2 %v113_v15  ;;  %v35_v53 = vld [vmem:[%s877_s1 + $0x48] sm:$0xff]  ;;  %v69_v54 = vld [vmem:[%s877_s1 + $0x158] sm:$0xff] }
  0x2b   :  { %345 = vmatpush.msrb.mxu3 %v147_v16  ;;  %176 = vmatmul.f32.vlgmr.msra.gmra.mxu0 %v652_v17  ;;  %v97_v55 = vld [vmem:[%s877_s1 + $0x238] sm:$0xff]  ;;  %v131_v56 = vld [vmem:[%s877_s1 + $0x348] sm:$0xff] }
  0x2c   :  { %254 = vmatmul.f32.vlgmr.msra.gmra.mxu3 %v658_v18  ;;  %268 = vmatpush.msrb.mxu0 %v49_v19  ;;  %v25_v58 = vld [vmem:[%s878_s0 + $0x58] sm:$0xf]  ;;  %v67_v60 = vld [vmem:[%s877_s1 + $0x148] sm:$0xff] }
  0x2d   :  { %293 = vmatpush.msrb.mxu1 %v83_v20  ;;  %321 = vmatpush.msrb.mxu2 %v111_v21  ;;  %v33_v59 = vld [vmem:[%s877_s1 + $0x38] sm:$0xff]  ;;  %v95_v61 = vld [vmem:[%s877_s1 + $0x228] sm:$0xff] }
  0x2e   :  { %346 = vmatpush.msrb.mxu3 %v145_v22  ;;  %202 = vmatmul.f32.vlgmr.msra.gmra.mxu1 %v676_v23  ;;  %v129_v62 = vld [vmem:[%s877_s1 + $0x338] sm:$0xff]  ;;  %v23_v63 = vld [vmem:[%s878_s0 + $0x48] sm:$0xf] }
  0x2f   :  { %269 = vmatpush.msrb.mxu0 %v47_v24  ;;  %294 = vmatpush.msrb.mxu1 %v81_v25  ;;  %v31_v0 = vld [vmem:[%s877_s1 + $0x28] sm:$0xff]  ;;  %v65_v1 = vld [vmem:[%s877_s1 + $0x138] sm:$0xff] }
  0x30   :  { %322 = vmatpush.msrb.mxu2 %v109_v26  ;;  %347 = vmatpush.msrb.mxu3 %v143_v27  ;;  %v93_v2 = vld [vmem:[%s877_s1 + $0x218] sm:$0xff]  ;;  %v127_v3 = vld [vmem:[%s877_s1 + $0x328] sm:$0xff] }
  0x31   :  { %270 = vmatpush.msrb.mxu0 %v45_v28  ;;  %295 = vmatpush.msrb.mxu1 %v79_v29  ;;  %v29_v4 = vld [vmem:[%s877_s1 + $0x18] sm:$0xff]  ;;  %v63_v5 = vld [vmem:[%s877_s1 + $0x128] sm:$0xff] }
  0x32   :  { %323 = vmatpush.msrb.mxu2 %v107_v30  ;;  %348 = vmatpush.msrb.mxu3 %v141_v31  ;;  %v91_v6 = vld [vmem:[%s877_s1 + $0x208] sm:$0xff]  ;;  %v125_v7 = vld [vmem:[%s877_s1 + $0x318] sm:$0xff] }
  0x33   :  { %231 = vmatmul.f32.gmra.mxu2 %v707_v32  ;;  %271 = vmatpush.msrb.mxu0 %v43_v33  ;;  %v27_v8 = vld [vmem:[%s877_s1 + $0x8] sm:$0xff]  ;;  %v61_v9 = vld [vmem:[%s877_s1 + $0x118] sm:$0xff] }
  0x34   :  { %296 = vmatpush.msrb.mxu1 %v77_v34  ;;  %324 = vmatpush.msrb.mxu2 %v105_v35  ;;  %v123_v10 = vld [vmem:[%s877_s1 + $0x308] sm:$0xff] }
  0x35   :  { %349 = vmatpush.msrb.mxu3 %v139_v36  ;;  %179 = vmatmul.f32.gmra.mxu0 %v724_v37  ;;  %v59_v11 = vld [vmem:[%s877_s1 + $0x108] sm:$0xff] }
  0x36   :  { %257 = vmatmul.f32.gmra.mxu3 %v730_v38  ;;  %272 = vmatpush.msrb.mxu0 %v41_v39 }
  0x37   :  { %297 = vmatpush.msrb.mxu1 %v75_v40  ;;  %325 = vmatpush.msrb.mxu2 %v103_v41 }
  0x38   :  { %350 = vmatpush.msrb.mxu3 %v137_v42  ;;  %205 = vmatmul.f32.gmra.mxu1 %v748_v43 }
  0x39   :  { %273 = vmatpush.msrb.mxu0 %v39_v44  ;;  %298 = vmatpush.msrb.mxu1 %v73_v45 }
  0x3a   :  { %326 = vmatpush.msrb.mxu2 %v101_v46  ;;  %351 = vmatpush.msrb.mxu3 %v135_v47 }
  0x3b   :  { %274 = vmatpush.msrb.mxu0 %v37_v48  ;;  %299 = vmatpush.msrb.mxu1 %v71_v49 }
  0x3c   :  { %327 = vmatpush.msrb.mxu2 %v99_v50  ;;  %352 = vmatpush.msrb.mxu3 %v133_v51 }
  0x3d   :  { %234 = vmatmul.f32.gmra.mxu2 %v24_v52  ;;  %275 = vmatpush.msrb.mxu0 %v35_v53 }
  0x3e   :  { %300 = vmatpush.msrb.mxu1 %v69_v54  ;;  %328 = vmatpush.msrb.mxu2 %v97_v55 }
  0x3f   :  { %353 = vmatpush.msrb.mxu3 %v131_v56  ;;  %182 = vmatmul.f32.gmra.mxu0 %v22_v57 }
  0x40   :  { %260 = vmatmul.f32.gmra.mxu3 %v25_v58  ;;  %276 = vmatpush.msrb.mxu0 %v33_v59 }
  0x41   :  { %301 = vmatpush.msrb.mxu1 %v67_v60  ;;  %329 = vmatpush.msrb.mxu2 %v95_v61 }
  0x42   :  { %354 = vmatpush.msrb.mxu3 %v129_v62  ;;  %208 = vmatmul.f32.gmra.mxu1 %v23_v63 }
  0x43   :  { %277 = vmatpush.msrb.mxu0 %v31_v0  ;;  %302 = vmatpush.msrb.mxu1 %v65_v1 }
  0x44   :  { %330 = vmatpush.msrb.mxu2 %v93_v2  ;;  %355 = vmatpush.msrb.mxu3 %v127_v3 }
  0x45   :  { %278 = vmatpush.msrb.mxu0 %v29_v4  ;;  %303 = vmatpush.msrb.mxu1 %v63_v5 }
  0x46   :  { %331 = vmatpush.msrb.mxu2 %v91_v6  ;;  %356 = vmatpush.msrb.mxu3 %v125_v7 }
  0x47   :  { %332 = vmatmul.f32.vlgmr.msrb.gmra.mxu2 %v635_v12  ;;  %279 = vmatpush.msrb.mxu0 %v27_v8  ;;  %v154_v12 = vld [vmem:[%s879_s2] sm:$0x3] }
  0x48   :  { %304 = vmatpush.msrb.mxu1 %v61_v9  ;;  %357 = vmatpush.msrb.mxu3 %v123_v10  ;;  %v156_v13 = vperm.slane %v154_v12, 0  ;;  %v157_v39 = vperm.slane %v154_v12, 1 }
  0x49   :  { %280 = vmatmul.f32.vlgmr.msrb.gmra.mxu0 %v652_v17  ;;  %358 = vmatmul.f32.vlgmr.msrb.gmra.mxu3 %v658_v18 }
  0x4a   :  { %305 = vmatpush.msrb.mxu1 %v59_v11 }
  0x4b   :  { %306 = vmatmul.f32.vlgmr.msrb.gmra.mxu1 %v676_v23 }
  0x4f   :  { %335 = vmatmul.f32.gmra.mxu2 %v707_v32 }
  0x51   :  { %283 = vmatmul.f32.gmra.mxu0 %v724_v37  ;;  %361 = vmatmul.f32.gmra.mxu3 %v730_v38 }
  0x53   :  { %309 = vmatmul.f32.gmra.mxu1 %v748_v43 }
  0x57   :  { %338 = vmatmul.f32.gmra.mxu2 %v24_v52 }
  0x59   :  { %286 = vmatmul.f32.gmra.mxu0 %v22_v57  ;;  %364 = vmatmul.f32.gmra.mxu3 %v25_v58 }
  0x5b   :  { %312 = vmatmul.f32.gmra.mxu1 %v23_v63 }
  0xa8   :  { %v177_v14 = vpop.f32.mrf.mxu0 }
  0xa9   :  { %v178_v15 = vadd.f32 %v177_v14, %v156_v13 }
  0xab   :  { %v203_v16 = vpop.f32.mrf.mxu1 }
  0xac   :  { %v204_v17 = vadd.f32 %v203_v16, %v178_v15  ;;  %v229_v18 = vpop.f32.mrf.mxu2 }
  0xae   :  { %v230_v19 = vadd.f32 %v229_v18, %v204_v17 }
  0xaf   :  { %v255_v20 = vpop.f32.mrf.mxu3 }
  0xb0   :  { %v256_v21 = vadd.f32 %v255_v20, %v230_v19 }
  0xb2   :  { %v368_v22 = vmax.f32 %v256_v21, 0.0  ;;  %v180_v23 = vpop.f32.mrf.mxu0 }
  0xb3   :  { %v181_v24 = vadd.f32 %v180_v23, %v156_v13 }
  0xb4   :  { %374 = vst [vmem:[%s880_s3] sm:$0xff] %v368_v22 }
  0xb5   :  { %v206_v25 = vpop.f32.mrf.mxu1 }
  0xb6   :  { %v207_v26 = vadd.f32 %v206_v25, %v181_v24  ;;  %v232_v27 = vpop.f32.mrf.mxu2 }
  0xb8   :  { %v233_v28 = vadd.f32 %v232_v27, %v207_v26 }
  0xb9   :  { %v258_v29 = vpop.f32.mrf.mxu3 }
  0xba   :  { %v259_v30 = vadd.f32 %v258_v29, %v233_v28 }
  0xbc   :  { %v370_v31 = vmax.f32 %v259_v30, 0.0  ;;  %v183_v32 = vpop.f32.mrf.mxu0 }
  0xbd   :  { %v184_v33 = vadd.f32 %v183_v32, %v156_v13 }
  0xbe   :  { %376 = vst [vmem:[%s880_s3 + $0x10] sm:$0xff] %v370_v31 }
  0xbf   :  { %v209_v34 = vpop.f32.mrf.mxu1 }
  0xc0   :  { %v210_v35 = vadd.f32 %v209_v34, %v184_v33  ;;  %v235_v36 = vpop.f32.mrf.mxu2 }
  0xc2   :  { %v236_v37 = vadd.f32 %v235_v36, %v210_v35 }
  0xc3   :  { %v261_v38 = vpop.f32.mrf.mxu3 }
  0xc4   :  { %v262_v40 = vadd.f32 %v261_v38, %v236_v37 }
  0xc6   :  { %v372_v41 = vmax.f32 %v262_v40, 0.0  ;;  %v281_v42 = vpop.f32.mrf.mxu0 }
  0xc7   :  { %v282_v43 = vadd.f32 %v281_v42, %v157_v39 }
  0xc8   :  { %378 = vst [vmem:[%s880_s3 + $0x20] sm:$0xf] %v372_v41  ;;  %v307_v44 = vpop.f32.mrf.mxu1 }
  0xc9   :  { %v308_v45 = vadd.f32 %v307_v44, %v282_v43 }
  0xca   :  { %v333_v46 = vpop.f32.mrf.mxu2 }
  0xcb   :  { %v334_v47 = vadd.f32 %v333_v46, %v308_v45 }
  0xcc   :  { %v359_v48 = vpop.f32.mrf.mxu3 }
  0xcd   :  { %v360_v49 = vadd.f32 %v359_v48, %v334_v47 }
  0xce   :  { %v284_v50 = vpop.f32.mrf.mxu0 }
  0xcf   :  { %v369_v51 = vmax.f32 %v360_v49, 0.0  ;;  %v285_v52 = vadd.f32 %v284_v50, %v157_v39 }
  0xd0   :  { %v310_v53 = vpop.f32.mrf.mxu1 }
  0xd1   :  { %375 = vst [vmem:[%s880_s3 + $0x8] sm:$0xff] %v369_v51  ;;  %v311_v54 = vadd.f32 %v310_v53, %v285_v52 }
  0xd2   :  { %v336_v55 = vpop.f32.mrf.mxu2 }
  0xd3   :  { %v337_v56 = vadd.f32 %v336_v55, %v311_v54 }
  0xd4   :  { %v362_v57 = vpop.f32.mrf.mxu3 }
  0xd5   :  { %v363_v58 = vadd.f32 %v362_v57, %v337_v56 }
  0xd6   :  { %v287_v59 = vpop.f32.mrf.mxu0 }
  0xd7   :  { %v371_v60 = vmax.f32 %v363_v58, 0.0  ;;  %v288_v61 = vadd.f32 %v287_v59, %v157_v39 }
  0xd8   :  { %v313_v62 = vpop.f32.mrf.mxu1 }
  0xd9   :  { %377 = vst [vmem:[%s880_s3 + $0x18] sm:$0xff] %v371_v60  ;;  %v314_v63 = vadd.f32 %v313_v62, %v288_v61 }
  0xda   :  { %v339_v0 = vpop.f32.mrf.mxu2 }
  0xdb   :  { %v340_v1 = vadd.f32 %v339_v0, %v314_v63 }
  0xdc   :  { %v365_v2 = vpop.f32.mrf.mxu3 }
  0xdd   :  { %v366_v3 = vadd.f32 %v365_v2, %v340_v1 }
  0xdf   :  { %v373_v4 = vmax.f32 %v366_v3, 0.0 }
  0xe1   :  { %379 = vst [vmem:[%s880_s3 + $0x28] sm:$0xf] %v373_v4 }

// kernel: stconv_block.7
= control target key start
LH: loop header
LB: loop body
LE: loop exit
PB: predicated region body
PF: predicated region fallthrough
CT: control target
= control target key end

     0   :  { %v154_v14 = vmov 512.0   ;;  %s249_s0 = inlined_call_operand.vmem [shape: f32[16,512], index: 0, kind: input, shape index: {}]   ;;  %s250_s1 = inlined_call_operand.vmem [shape: f32[1,512], index: 1, kind: input, shape index: {}]   ;;  %s251_s2 = inlined_call_operand.vmem [shape: f32[1,512], index: 2, kind: input, shape index: {}]   ;;  %s252_s3 = inlined_call_operand.vmem [shape: f32[16,512], index: 3, kind: output, shape index: {}]  }
   0x1   :  { %v14_v0 = vld [vmem:[%s249_s0] sm:$0xff]  ;;  %v15_v1 = vld [vmem:[%s249_s0 + $0x8] sm:$0xff]  ;;  %v16_v2 = vld [vmem:[%s249_s0 + $0x10] sm:$0xff]  ;;  %148 = vrcp.f32 %v154_v14 }
   0x2   :  { %v22_v3 = vadd.f32 %v15_v1, %v14_v0  ;;  %v18_v4 = vld [vmem:[%s249_s0 + $0x20] sm:$0xff]  ;;  %v19_v5 = vld [vmem:[%s249_s0 + $0x28] sm:$0xff]  ;;  %v17_v6 = vld [vmem:[%s249_s0 + $0x18] sm:$0xff] }
   0x3   :  { %v27_v8 = vadd.f32 %v19_v5, %v18_v4  ;;  %v20_v9 = vld [vmem:[%s249_s0 + $0x30] sm:$0xff]  ;;  %v21_v12 = vld [vmem:[%s249_s0 + $0x38] sm:$0xff]  ;;  %v99_v57 = vld [vmem:[%s250_s1] sm:$0xf] }
   0x4   :  { %v23_v7 = vadd.f32 %v22_v3, %v16_v2  ;;  %v117_v58 = vld [vmem:[%s251_s2] sm:$0xf]  ;;  %v101_v61 = vperm.slane %v99_v57, 0 }
   0x5   :  { %v28_v11 = vadd.f32 %v27_v8, %v20_v9  ;;  %v119_v3 = vperm.slane %v117_v58, 0 }
   0x6   :  { %v24_v10 = vadd.f32 %v23_v7, %v17_v6 }
   0x7   :  { %v29_v13 = vadd.f32 %v28_v11, %v21_v12  ;;  %v149_v15 = vpop.eup %148 }
   0x8   :  { %25 = vadd.xlane.f32.xlu0 %v24_v10  ;;  %v33_v16 = vmul.f32 512.0, %v149_v15  ;;  %vm37_vm0 = vweird.f32 %v149_v15 }
   0xa   :  { %v34_v17 = vsub.f32 1.0, %v33_v16 }
   0xc   :  { %v35_v18 = vmul.f32 %v149_v15, %v34_v17 }
   0xe   :  { %v36_v19 = vadd.f32 %v149_v15, %v35_v18 }
  0x10   :  { %30 = vadd.xlane.f32.xlu0 %v29_v13  ;;  %v38_v20 = vsel %vm37_vm0, %v149_v15, %v36_v19 }
  0x7b   :  { %v26_v21 = vpop.xlane.xlu0 %25 }
  0x7c   :  { %v39_v22 = vmul.f32 %v38_v20, %v26_v21 }
  0x7e   :  { %v41_v23 = vsub.f32 %v14_v0, %v39_v22  ;;  %v42_v24 = vsub.f32 %v15_v1, %v39_v22  ;;  %v43_v25 = vsub.f32 %v16_v2, %v39_v22  ;;  %v44_v26 = vsub.f32 %v17_v6, %v39_v22 }
  0x7f   :  { %v102_v0 = vperm.slane %v99_v57, 1  ;;  %v103_v1 = vperm.slane %v99_v57, 2  ;;  %v104_v2 = vperm.slane %v99_v57, 3 }
  0x80   :  { %v49_v27 = vmul.f32 %v41_v23, %v41_v23  ;;  %v50_v28 = vmul.f32 %v42_v24, %v42_v24  ;;  %v51_v29 = vmul.f32 %v43_v25, %v43_v25  ;;  %v52_v33 = vmul.f32 %v44_v26, %v44_v26 }
  0x82   :  { %v57_v30 = vadd.f32 %v50_v28, %v49_v27 }
  0x83   :  { %v31_v31 = vpop.xlane.xlu0 %30 }
  0x84   :  { %v40_v32 = vmul.f32 %v38_v20, %v31_v31  ;;  %v58_v34 = vadd.f32 %v57_v30, %v51_v29 }
  0x86   :  { %v199_v35 = vsub.f32 %v18_v4, %v40_v32  ;;  %v201_v36 = vsub.f32 %v19_v5, %v40_v32  ;;  %v59_v37 = vadd.f32 %v58_v34, %v52_v33  ;;  %v203_v38 = vsub.f32 %v20_v9, %v40_v32 }
  0x87   :  { %v205_v39 = vsub.f32 %v21_v12, %v40_v32  ;;  %v120_v4 = vperm.slane %v117_v58, 1  ;;  %v121_v5 = vperm.slane %v117_v58, 2  ;;  %v122_v12 = vperm.slane %v117_v58, 3 }
  0x88   :  { %60 = vadd.xlane.f32.xlu1 %v59_v37  ;;  %v53_v40 = vmul.f32 %v199_v35, %v199_v35  ;;  %v54_v41 = vmul.f32 %v201_v36, %v201_v36  ;;  %v55_v42 = vmul.f32 %v203_v38, %v203_v38 }
  0x89   :  { %v56_v44 = vmul.f32 %v205_v39, %v205_v39 }
  0x8a   :  { %v62_v43 = vadd.f32 %v54_v41, %v53_v40 }
  0x8c   :  { %v63_v45 = vadd.f32 %v62_v43, %v55_v42 }
  0x8e   :  { %v64_v46 = vadd.f32 %v63_v45, %v56_v44 }
  0x90   :  { %65 = vadd.xlane.f32.xlu1 %v64_v46 }
  0xfb   :  { %v61_v47 = vpop.xlane.xlu1 %60 }
  0xfc   :  { %v67_v48 = vmul.f32 %v61_v47, %v38_v20 }
  0xfe   :  { %v69_v49 = vadd.f32 1e-05, %v67_v48 }
 0x100   :  { %150 = vrsqrt.f32 %v69_v49  ;;  %vm77_vm2 = vweird.f32 %v69_v49 }
 0x103   :  { %v66_v50 = vpop.xlane.xlu1 %65 }
 0x104   :  { %v68_v51 = vmul.f32 %v66_v50, %v38_v20 }
 0x106   :  { %v151_v52 = vpop.eup %150  ;;  %v70_v53 = vadd.f32 1e-05, %v68_v51 }
 0x107   :  { %v72_v54 = vmul.f32 %v151_v52, %v69_v49  ;;  %vm78_vm1 = vweird.f32 %v151_v52 }
 0x108   :  { %152 = vrsqrt.f32 %v70_v53  ;;  %vm79_vm3 = vmor %vm77_vm2, %vm78_vm1  ;;  %vm87_vm5 = vweird.f32 %v70_v53 }
 0x109   :  { %v73_v55 = vmul.f32 %v151_v52, %v72_v54 }
 0x10b   :  { %v74_v56 = vmul.f32 0.5, %v73_v55 }
 0x10d   :  { %v75_v59 = vsub.f32 1.5, %v74_v56 }
 0x10e   :  { %v153_v60 = vpop.eup %152 }
 0x10f   :  { %v76_v62 = vmul.f32 %v151_v52, %v75_v59  ;;  %v82_v63 = vmul.f32 %v153_v60, %v70_v53  ;;  %vm88_vm4 = vweird.f32 %v153_v60 }
 0x110   :  { %vm89_vm6 = vmor %vm87_vm5, %vm88_vm4 }
 0x111   :  { %v80_v6 = vsel %vm79_vm3, %v151_v52, %v76_v62  ;;  %v83_v7 = vmul.f32 %v153_v60, %v82_v63 }
 0x112   :  { %v91_v8 = vmul.f32 %v80_v6, %v41_v23  ;;  %v92_v9 = vmul.f32 %v80_v6, %v42_v24  ;;  %v93_v10 = vmul.f32 %v80_v6, %v43_v25  ;;  %v94_v11 = vmul.f32 %v80_v6, %v44_v26 }
 0x113   :  { %v84_v13 = vmul.f32 0.5, %v83_v7 }
 0x114   :  { %v109_v14 = vmul.f32 %v101_v61, %v91_v8  ;;  %v110_v15 = vmul.f32 %v102_v0, %v92_v9  ;;  %v111_v16 = vmul.f32 %v103_v1, %v93_v10  ;;  %v112_v17 = vmul.f32 %v104_v2, %v94_v11 }
 0x115   :  { %v85_v18 = vsub.f32 1.5, %v84_v13 }
 0x116   :  { %v127_v19 = vadd.f32 %v119_v3, %v109_v14  ;;  %v128_v20 = vadd.f32 %v120_v4, %v110_v15  ;;  %v129_v21 = vadd.f32 %v121_v5, %v111_v16  ;;  %v130_v22 = vadd.f32 %v122_v12, %v112_v17 }
 0x117   :  { %v86_v27 = vmul.f32 %v153_v60, %v85_v18 }
 0x118   :  { %135 = vst [vmem:[%s252_s3] sm:$0xff] %v127_v19 }
 0x119   :  { %136 = vst [vmem:[%s252_s3 + $0x8] sm:$0xff] %v128_v20  ;;  %v90_v23 = vsel %vm89_vm6, %v153_v60, %v86_v27 }
 0x11a   :  { %137 = vst [vmem:[%s252_s3 + $0x10] sm:$0xff] %v129_v21  ;;  %v95_v24 = vmul.f32 %v90_v23, %v199_v35  ;;  %v96_v25 = vmul.f32 %v90_v23, %v201_v36  ;;  %v97_v26 = vmul.f32 %v90_v23, %v203_v38  ;;  %v98_v28 = vmul.f32 %v90_v23, %v205_v39 }
 0x11b   :  { %138 = vst [vmem:[%s252_s3 + $0x18] sm:$0xff] %v130_v22 }
 0x11c   :  { %v113_v29 = vmul.f32 %v101_v61, %v95_v24  ;;  %v114_v30 = vmul.f32 %v102_v0, %v96_v25  ;;  %v115_v31 = vmul.f32 %v103_v1, %v97_v26  ;;  %v116_v32 = vmul.f32 %v104_v2, %v98_v28 }
 0x11e   :  { %v131_v33 = vadd.f32 %v119_v3, %v113_v29  ;;  %v132_v34 = vadd.f32 %v120_v4, %v114_v30  ;;  %v133_v37 = vadd.f32 %v121_v5, %v115_v31  ;;  %v134_v40 = vadd.f32 %v122_v12, %v116_v32 }
 0x120   :  { %139 = vst [vmem:[%s252_s3 + $0x20] sm:$0xff] %v131_v33 }
 0x121   :  { %140 = vst [vmem:[%s252_s3 + $0x28] sm:$0xff] %v132_v34 }
 0x122   :  { %141 = vst [vmem:[%s252_s3 + $0x30] sm:$0xff] %v133_v37 }
 0x123   :  { %142 = vst [vmem:[%s252_s3 + $0x38] sm:$0xff] %v134_v40 }

// kernel: stconv_block.6
= control target key start
LH: loop header
LB: loop body
LE: loop exit
PB: predicated region body
PF: predicated region fallthrough
CT: control target
= control target key end

     0   :  { %s1298_s18 = smov 0   ;;  %s1597_s0 = inlined_call_operand.vmem [shape: f32[2,160,16], index: 0, kind: input, shape index: {}]   ;;  %s1598_s1 = inlined_call_operand.vmem [shape: f32[3,16,64], index: 1, kind: input, shape index: {}]   ;;  %s1599_s2 = inlined_call_operand.vmem [shape: f32[1,64], index: 2, kind: input, shape index: {}]   ;;  %s1600_s3 = inlined_call_operand.vmem [shape: f32[16,32], index: 3, kind: input, shape index: {}]   ;;  %s1601_s4 = inlined_call_operand.vmem [shape: f32[1,32], index: 4, kind: input, shape index: {}]   ;;  %s1602_s5 = inlined_call_operand.vmem [shape: f32[2,128,32], index: 5, kind: output, shape index: {}]  }
   0x1 LB: > { %s1088_s19 = sadd.s32 4294967295, %s1265_s18   ;;  %p1092_p0 = scmp.ge.s32.totalorder %s1265_s18, 1  ;;  %s1265_s18 = sphi %s1298_s18, %s15_s18  }
   0x2   : > { %p187_p1 = scmp.lt.s32.totalorder %s1265_s18, 3 }
   0x4   : > { %p188_p2 = pnand %p1092_p0, %p187_p1 }
   0x5   : > { %p215_p3 = scmp.lt.s32.totalorder (!%p188_p2), %s1088_s19, 1  ;;  %s1267_s17 = smov (!%p188_p2), 96  }
   0x6   : > { %191 = sbr.rel (%p188_p2) target bundleno = 418 (0x1a2), region = 40 }
   0xb   : > { %v1131_v0 = vld [vmem:[%s1598_s1 + $0x28] sm:$0xff]  ;;  %v1130_v1 = vld [vmem:[%s1598_s1 + $0x20] sm:$0xff]  ;;  %v1097_v3 = vld [vmem:[%s1598_s1 + $0x18] sm:$0xff]  ;;  %s1604_s19 = smov (!%p215_p3, %s1088_s19), 1  ;;  %vm250_vm0 = vcmask 130048  }
   0xc   : > { %v546_v2 = vld [vmem:[%s1600_s3 + $0x8] sm:$0xff]  ;;  %458 = vmatpush.msra.mxu2 %v1131_v0  ;;  %v545_v5 = vld [vmem:[%s1600_s3] sm:$0xff]  ;;  %313 = vmatpush.msra.mxu0 %v1097_v3  ;;  %v1096_v6 = vld [vmem:[%s1598_s1 + $0x10] sm:$0xff]  ;;  %s1183_s11 = smul.u32 160, %s1604_s19  ;;  %s1182_s22 = sshll.u32 %s1604_s19, 7 }
   0xd   : > { %565 = vmatpush.msra.mxu3 %v546_v2  ;;  %v246_v4 = vld [vmem:[%s1598_s1 + $0x8] sm:$0xff]  ;;  %v245_v7 = vld [vmem:[%s1598_s1] sm:$0xff]  ;;  %s1526_s25 = scalar_lea.vmem %s1602_s5, %s1182_s22 }
   0xe   : > { %384 = vmatpush.msra.mxu1 %v246_v4  ;;  %459 = vmatpush.msra.mxu2 %v1130_v1  ;;  %s1336_s14 = scalar_lea.vmem %s1597_s0, %s1183_s11  ;;  %v1425_v31 = vld [vmem:[%s1599_s2] ss:$0 sm:$0xff] }
   0xf   : > { %566 = vmatpush.msra.mxu3 %v545_v5  ;;  %314 = vmatpush.msra.mxu0 %v1096_v6  ;;  %v229_v8 = vld [vmem:[%s1336_s14 + $0x20] sm:$0xff]  ;;  %v227_v9 = vld [vmem:[%s1336_s14 + $0x10] sm:$0xff]  ;;  %v230_v11 = vld [vmem:[%s1336_s14 + $0x28] sm:$0xff] }
  0x10   : > { %385 = vmatpush.msra.mxu1 %v245_v7  ;;  %v225_v10 = vld [vmem:[%s1336_s14] sm:$0xff]  ;;  %1132 = vmatmul.msk.f32.vlgmr.msra.gmra.mxu2 %vm250_vm0, %v229_v8  ;;  %v228_v12 = vld [vmem:[%s1336_s14 + $0x18] sm:$0xff]  ;;  %v226_v13 = vld [vmem:[%s1336_s14 + $0x8] sm:$0xff] }
  0x11   : > { %1148 = vmatmul.msk.f32.vlgmr.msra.gmra.mxu3 %vm250_vm0, %v229_v8  ;;  %1098 = vmatmul.msk.f32.vlgmr.msra.gmra.mxu0 %vm250_vm0, %v227_v9  ;;  %v231_v14 = vld [vmem:[%s1336_s14 + $0x30] sm:$0xff]  ;;  %v232_v15 = vld [vmem:[%s1336_s14 + $0x38] sm:$0xff]  ;;  %v233_v16 = vld [vmem:[%s1336_s14 + $0x40] sm:$0xff] }
  0x12   : > { %1114 = vmatmul.msk.f32.vlgmr.msra.gmra.mxu1 %vm250_vm0, %v225_v10  ;;  %v234_v17 = vld [vmem:[%s1336_s14 + $0x48] sm:$0xff]  ;;  %v235_v18 = vld [vmem:[%s1336_s14 + $0x50] sm:$0xff]  ;;  %v236_v19 = vld [vmem:[%s1336_s14 + $0x58] sm:$0xff] }
  0x13   : > { %v237_v20 = vld [vmem:[%s1336_s14 + $0x60] sm:$0xff]  ;;  %v238_v21 = vld [vmem:[%s1336_s14 + $0x68] sm:$0xff]  ;;  %v239_v22 = vld [vmem:[%s1336_s14 + $0x70] sm:$0xff] }
  0x14   : > { %v240_v23 = vld [vmem:[%s1336_s14 + $0x78] sm:$0xff]  ;;  %v241_v24 = vld [vmem:[%s1336_s14 + $0x80] sm:$0xff]  ;;  %v242_v25 = vld [vmem:[%s1336_s14 + $0x88] sm:$0xff] }
  0x15   : > { %v243_v26 = vld [vmem:[%s1336_s14 + $0x90] sm:$0xff]  ;;  %v244_v27 = vld [vmem:[%s1336_s14 + $0x98] sm:$0xff] }
  0x18   : > { %1133 = vmatmul.msk.f32.gmra.mxu2 %vm250_vm0, %v230_v11 }
  0x19   : > { %1149 = vmatmul.msk.f32.gmra.mxu3 %vm250_vm0, %v230_v11  ;;  %1099 = vmatmul.msk.f32.gmra.mxu0 %vm250_vm0, %v228_v12 }
  0x1a   : > { %1115 = vmatmul.msk.f32.gmra.mxu1 %vm250_vm0, %v226_v13 }
  0x20   : > { %1134 = vmatmul.msk.f32.gmra.mxu2 %vm250_vm0, %v231_v14 }
  0x21   : > { %1150 = vmatmul.msk.f32.gmra.mxu3 %vm250_vm0, %v231_v14  ;;  %1100 = vmatmul.msk.f32.gmra.mxu0 %vm250_vm0, %v229_v8 }
  0x22   : > { %1116 = vmatmul.msk.f32.gmra.mxu1 %vm250_vm0, %v227_v9 }
  0x28   : > { %1135 = vmatmul.msk.f32.gmra.mxu2 %vm250_vm0, %v232_v15 }
  0x29   : > { %1151 = vmatmul.msk.f32.gmra.mxu3 %vm250_vm0, %v232_v15  ;;  %1101 = vmatmul.msk.f32.gmra.mxu0 %vm250_vm0, %v230_v11 }
  0x2a   : > { %1117 = vmatmul.msk.f32.gmra.mxu1 %vm250_vm0, %v228_v12 }
  0x30   : > { %1136 = vmatmul.msk.f32.gmra.mxu2 %vm250_vm0, %v233_v16 }
  0x31   : > { %1152 = vmatmul.msk.f32.gmra.mxu3 %vm250_vm0, %v233_v16  ;;  %1102 = vmatmul.msk.f32.gmra.mxu0 %vm250_vm0, %v231_v14 }
  0x32   : > { %1118 = vmatmul.msk.f32.gmra.mxu1 %vm250_vm0, %v229_v8 }
  0x38   : > { %1137 = vmatmul.msk.f32.gmra.mxu2 %vm250_vm0, %v234_v17 }
  0x39   : > { %1153 = vmatmul.msk.f32.gmra.mxu3 %vm250_vm0, %v234_v17  ;;  %1103 = vmatmul.msk.f32.gmra.mxu0 %vm250_vm0, %v232_v15 }
  0x3a   : > { %1119 = vmatmul.msk.f32.gmra.mxu1 %vm250_vm0, %v230_v11 }
  0x40   : > { %1138 = vmatmul.msk.f32.gmra.mxu2 %vm250_vm0, %v235_v18 }
  0x41   : > { %1154 = vmatmul.msk.f32.gmra.mxu3 %vm250_vm0, %v235_v18  ;;  %1104 = vmatmul.msk.f32.gmra.mxu0 %vm250_vm0, %v233_v16 }
  0x42   : > { %1120 = vmatmul.msk.f32.gmra.mxu1 %vm250_vm0, %v231_v14 }
  0x48   : > { %1139 = vmatmul.msk.f32.gmra.mxu2 %vm250_vm0, %v236_v19 }
  0x49   : > { %1155 = vmatmul.msk.f32.gmra.mxu3 %vm250_vm0, %v236_v19  ;;  %1105 = vmatmul.msk.f32.gmra.mxu0 %vm250_vm0, %v234_v17 }
  0x4a   : > { %1121 = vmatmul.msk.f32.gmra.mxu1 %vm250_vm0, %v232_v15 }
  0x50   : > { %1140 = vmatmul.msk.f32.gmra.mxu2 %vm250_vm0, %v237_v20 }
  0x51   : > { %1156 = vmatmul.msk.f32.gmra.mxu3 %vm250_vm0, %v237_v20  ;;  %1106 = vmatmul.msk.f32.gmra.mxu0 %vm250_vm0, %v235_v18 }
  0x52   : > { %1122 = vmatmul.msk.f32.gmra.mxu1 %vm250_vm0, %v233_v16 }
  0x58   : > { %1141 = vmatmul.msk.f32.gmra.mxu2 %vm250_vm0, %v238_v21 }
  0x59   : > { %1157 = vmatmul.msk.f32.gmra.mxu3 %vm250_vm0, %v238_v21  ;;  %1107 = vmatmul.msk.f32.gmra.mxu0 %vm250_vm0, %v236_v19 }
  0x5a   : > { %1123 = vmatmul.msk.f32.gmra.mxu1 %vm250_vm0, %v234_v17 }
  0x60   : > { %1142 = vmatmul.msk.f32.gmra.mxu2 %vm250_vm0, %v239_v22 }
  0x61   : > { %1158 = vmatmul.msk.f32.gmra.mxu3 %vm250_vm0, %v239_v22  ;;  %1108 = vmatmul.msk.f32.gmra.mxu0 %vm250_vm0, %v237_v20 }
  0x62   : > { %1124 = vmatmul.msk.f32.gmra.mxu1 %vm250_vm0, %v235_v18 }
  0x68   : > { %1143 = vmatmul.msk.f32.gmra.mxu2 %vm250_vm0, %v240_v23 }
  0x69   : > { %1159 = vmatmul.msk.f32.gmra.mxu3 %vm250_vm0, %v240_v23  ;;  %1109 = vmatmul.msk.f32.gmra.mxu0 %vm250_vm0, %v238_v21 }
  0x6a   : > { %1125 = vmatmul.msk.f32.gmra.mxu1 %vm250_vm0, %v236_v19 }
  0x70   : > { %1144 = vmatmul.msk.f32.gmra.mxu2 %vm250_vm0, %v241_v24 }
  0x71   : > { %1160 = vmatmul.msk.f32.gmra.mxu3 %vm250_vm0, %v241_v24  ;;  %1110 = vmatmul.msk.f32.gmra.mxu0 %vm250_vm0, %v239_v22 }
  0x72   : > { %1126 = vmatmul.msk.f32.gmra.mxu1 %vm250_vm0, %v237_v20 }
  0x78   : > { %1145 = vmatmul.msk.f32.gmra.mxu2 %vm250_vm0, %v242_v25 }
  0x79   : > { %1161 = vmatmul.msk.f32.gmra.mxu3 %vm250_vm0, %v242_v25  ;;  %1111 = vmatmul.msk.f32.gmra.mxu0 %vm250_vm0, %v240_v23 }
  0x7a   : > { %1127 = vmatmul.msk.f32.gmra.mxu1 %vm250_vm0, %v238_v21 }
  0x80   : > { %1146 = vmatmul.msk.f32.gmra.mxu2 %vm250_vm0, %v243_v26 }
  0x81   : > { %1162 = vmatmul.msk.f32.gmra.mxu3 %vm250_vm0, %v243_v26  ;;  %1112 = vmatmul.msk.f32.gmra.mxu0 %vm250_vm0, %v241_v24 }
  0x82   : > { %1128 = vmatmul.msk.f32.gmra.mxu1 %vm250_vm0, %v239_v22 }
  0x88   : > { %1147 = vmatmul.msk.f32.gmra.mxu2 %vm250_vm0, %v244_v27 }
  0x89   : > { %1163 = vmatmul.msk.f32.gmra.mxu3 %vm250_vm0, %v244_v27  ;;  %1113 = vmatmul.msk.f32.gmra.mxu0 %vm250_vm0, %v242_v25 }
  0x8a   : > { %1129 = vmatmul.msk.f32.gmra.mxu1 %vm250_vm0, %v240_v23 }
  0x8e   : > { %v316_v28 = vpop.f32.mrf.mxu0 }
  0x8f   : > { %v387_v29 = vpop.f32.mrf.mxu1 }
  0x90   : > { %v388_v30 = vadd.f32 %v387_v29, %v316_v28 }
  0x93   : > { %v461_v32 = vpop.f32.mrf.mxu2 }
  0x94   : > { %v509_v33 = vadd.f32 %v461_v32, %v388_v30 }
  0x96   : > { %v1428_v34 = vadd.f32 %v1425_v31, %v509_v33  ;;  %v319_v35 = vpop.f32.mrf.mxu0 }
  0x97   : > { %v390_v36 = vpop.f32.mrf.mxu1 }
  0x98   : > { %v1164_v37 = vmul.f32 -1.442695, %v1428_v34  ;;  %v391_v38 = vadd.f32 %v390_v36, %v319_v35 }
  0x9a   : > { %1195 = vpow2.f32 %v1164_v37 }
  0x9b   : > { %v464_v39 = vpop.f32.mrf.mxu2 }
  0x9c   : > { %v510_v40 = vadd.f32 %v464_v39, %v391_v38 }
  0x9e   : > { %v1432_v41 = vadd.f32 %v1425_v31, %v510_v40  ;;  %v322_v42 = vpop.f32.mrf.mxu0 }
  0x9f   : > { %v393_v43 = vpop.f32.mrf.mxu1 }
  0xa0   : > { %v1196_v44 = vpop.eup %1195  ;;  %v1165_v45 = vmul.f32 -1.442695, %v1432_v41  ;;  %v394_v46 = vadd.f32 %v393_v43, %v322_v42 }
  0xa1   : > { %v680_v47 = vadd.f32 1.0, %v1196_v44 }
  0xa2   : > { %1197 = vpow2.f32 %v1165_v45 }
  0xa3   : > { %1199 = vrcp.f32 %v680_v47  ;;  %v467_v48 = vpop.f32.mrf.mxu2  ;;  %v707_v62 = vand.u32 2147483648, %v680_v47  ;;  %v705_v3 = vand.u32 2147483647, %v680_v47  ;;  %vm701_vm2 = vweird.f32 %v680_v47 }
  0xa4   : > { %v511_v49 = vadd.f32 %v467_v48, %v394_v46 }
  0xa5   : > { %v708_v10 = vor.u32 1.1754944e-38, %v707_v62  ;;  %vm706_vm4 = vcmp.eq.f32.partialorder %v705_v3, 8.507059e+37 }
  0xa6   : > { %v1436_v50 = vadd.f32 %v1425_v31, %v511_v49  ;;  %v325_v51 = vpop.f32.mrf.mxu0 }
  0xa7   : > { %v396_v52 = vpop.f32.mrf.mxu1 }
  0xa8   : > { %v1198_v53 = vpop.eup %1197  ;;  %v1166_v54 = vmul.f32 -1.442695, %v1436_v50  ;;  %v397_v55 = vadd.f32 %v396_v52, %v325_v51 }
  0xa9   : > { %v1200_v56 = vpop.eup %1199  ;;  %v681_v57 = vadd.f32 1.0, %v1198_v53 }
  0xaa   : > { %1201 = vpow2.f32 %v1166_v54  ;;  %v697_v58 = vmul.f32 %v1200_v56, %v680_v47  ;;  %vm702_vm1 = vweird.f32 %v1200_v56 }
  0xab   : > { %1203 = vrcp.f32 %v681_v57  ;;  %v470_v59 = vpop.f32.mrf.mxu2  ;;  %vm703_vm3 = vmor %vm701_vm2, %vm702_vm1  ;;  %v722_v17 = vand.u32 2147483648, %v681_v57  ;;  %v720_v22 = vand.u32 2147483647, %v681_v57  ;;  %vm716_vm6 = vweird.f32 %v681_v57 }
  0xac   : > { %v512_v60 = vadd.f32 %v470_v59, %v397_v55  ;;  %v698_v61 = vsub.f32 1.0, %v697_v58 }
  0xad   : > { %v723_v29 = vor.u32 1.1754944e-38, %v722_v17  ;;  %vm721_vm8 = vcmp.eq.f32.partialorder %v720_v22, 8.507059e+37 }
  0xae   : > { %v1440_v63 = vadd.f32 %v1425_v31, %v512_v60  ;;  %v328_v0 = vpop.f32.mrf.mxu0  ;;  %v699_v2 = vmul.f32 %v1200_v56, %v698_v61 }
  0xaf   : > { %v399_v1 = vpop.f32.mrf.mxu1 }
  0xb0   : > { %v1202_v4 = vpop.eup %1201  ;;  %v1167_v5 = vmul.f32 -1.442695, %v1440_v63  ;;  %v400_v6 = vadd.f32 %v399_v1, %v328_v0  ;;  %v700_v7 = vadd.f32 %v1200_v56, %v699_v2 }
  0xb1   : > { %v1204_v8 = vpop.eup %1203  ;;  %v682_v9 = vadd.f32 1.0, %v1202_v4 }
  0xb2   : > { %1205 = vpow2.f32 %v1167_v5  ;;  %v704_v11 = vsel %vm703_vm3, %v1200_v56, %v700_v7  ;;  %v712_v12 = vmul.f32 %v1204_v8, %v681_v57  ;;  %vm717_vm5 = vweird.f32 %v1204_v8 }
  0xb3   : > { %1207 = vrcp.f32 %v682_v9  ;;  %v473_v13 = vpop.f32.mrf.mxu2  ;;  %v709_v14 = vsel %vm706_vm4, %v708_v10, %v704_v11  ;;  %vm718_vm7 = vmor %vm716_vm6, %vm717_vm5  ;;  %v737_v38 = vand.u32 2147483648, %v682_v9  ;;  %v735_v44 = vand.u32 2147483647, %v682_v9 }
  0xb4   : > { %v513_v15 = vadd.f32 %v473_v13, %v400_v6  ;;  %952 = vrot.lane.b32.xlu0 %v709_v14, %s1267_s17  ;;  %v713_v16 = vsub.f32 1.0, %v712_v12  ;;  %vm731_vm10 = vweird.f32 %v682_v9 }
  0xb5   : > { %v738_v52 = vor.u32 1.1754944e-38, %v737_v38  ;;  %vm736_vm12 = vcmp.eq.f32.partialorder %v735_v44, 8.507059e+37 }
  0xb6   : > { %v1445_v18 = vadd.f32 %v1425_v31, %v513_v15  ;;  %v331_v19 = vpop.f32.mrf.mxu0  ;;  %v714_v21 = vmul.f32 %v1204_v8, %v713_v16 }
  0xb7   : > { %v402_v20 = vpop.f32.mrf.mxu1 }
  0xb8   : > { %v1206_v23 = vpop.eup %1205  ;;  %v1168_v24 = vmul.f32 -1.442695, %v1445_v18  ;;  %v403_v25 = vadd.f32 %v402_v20, %v331_v19  ;;  %v715_v26 = vadd.f32 %v1204_v8, %v714_v21 }
  0xb9   : > { %v1208_v27 = vpop.eup %1207  ;;  %v683_v28 = vadd.f32 1.0, %v1206_v23 }
  0xba   : > { %1209 = vpow2.f32 %v1168_v24  ;;  %v719_v30 = vsel %vm718_vm7, %v1204_v8, %v715_v26  ;;  %v727_v32 = vmul.f32 %v1208_v27, %v682_v9  ;;  %vm732_vm9 = vweird.f32 %v1208_v27 }
  0xbb   : > { %1211 = vrcp.f32 %v683_v28  ;;  %v476_v33 = vpop.f32.mrf.mxu2  ;;  %v724_v35 = vsel %vm721_vm8, %v723_v29, %v719_v30  ;;  %vm733_vm11 = vmor %vm731_vm10, %vm732_vm9  ;;  %v752_v59 = vand.u32 2147483648, %v683_v28  ;;  %v750_v1 = vand.u32 2147483647, %v683_v28 }
  0xbc   : > { %v514_v36 = vadd.f32 %v476_v33, %v403_v25  ;;  %954 = vrot.lane.b32.xlu0 %v724_v35, %s1267_s17  ;;  %v728_v37 = vsub.f32 1.0, %v727_v32  ;;  %vm746_vm14 = vweird.f32 %v683_v28 }
  0xbd   : > { %v753_v8 = vor.u32 1.1754944e-38, %v752_v59  ;;  %vm751_vm0 = vcmp.eq.f32.partialorder %v750_v1, 8.507059e+37 }
  0xbe   : > { %v1450_v39 = vadd.f32 %v1425_v31, %v514_v36  ;;  %v334_v40 = vpop.f32.mrf.mxu0  ;;  %v729_v43 = vmul.f32 %v1208_v27, %v728_v37 }
  0xbf   : > { %v405_v42 = vpop.f32.mrf.mxu1 }
  0xc0   : > { %v1210_v45 = vpop.eup %1209  ;;  %v1169_v46 = vmul.f32 -1.442695, %v1450_v39  ;;  %v406_v47 = vadd.f32 %v405_v42, %v334_v40  ;;  %v730_v48 = vadd.f32 %v1208_v27, %v729_v43 }
  0xc1   : > { %v1212_v49 = vpop.eup %1211  ;;  %v684_v51 = vadd.f32 1.0, %v1210_v45 }
  0xc2   : > { %1213 = vpow2.f32 %v1169_v46  ;;  %v734_v53 = vsel %vm733_vm11, %v1208_v27, %v730_v48  ;;  %v742_v54 = vmul.f32 %v1212_v49, %v683_v28  ;;  %vm747_vm13 = vweird.f32 %v1212_v49 }
  0xc3   : > { %1215 = vrcp.f32 %v684_v51  ;;  %v479_v55 = vpop.f32.mrf.mxu2  ;;  %v739_v56 = vsel %vm736_vm12, %v738_v52, %v734_v53  ;;  %vm748_vm15 = vmor %vm746_vm14, %vm747_vm13  ;;  %v767_v15 = vand.u32 2147483648, %v684_v51  ;;  %v765_v21 = vand.u32 2147483647, %v684_v51 }
  0xc4   : > { %v515_v57 = vadd.f32 %v479_v55, %v406_v47  ;;  %956 = vrot.lane.b32.xlu1 %v739_v56, %s1267_s17  ;;  %v743_v58 = vsub.f32 1.0, %v742_v54  ;;  %vm761_vm2 = vweird.f32 %v684_v51 }
  0xc5   : > { %v768_v28 = vor.u32 1.1754944e-38, %v767_v15  ;;  %vm766_vm4 = vcmp.eq.f32.partialorder %v765_v21, 8.507059e+37 }
  0xc6   : > { %v1455_v60 = vadd.f32 %v1425_v31, %v515_v57  ;;  %v337_v61 = vpop.f32.mrf.mxu0  ;;  %v744_v0 = vmul.f32 %v1212_v49, %v743_v58 }
  0xc7   : > { %v408_v62 = vpop.f32.mrf.mxu1 }
  0xc8   : > { %v1214_v2 = vpop.eup %1213  ;;  %v1170_v3 = vmul.f32 -1.442695, %v1455_v60  ;;  %v409_v4 = vadd.f32 %v408_v62, %v337_v61  ;;  %v745_v5 = vadd.f32 %v1212_v49, %v744_v0 }
  0xc9   : > { %v1216_v6 = vpop.eup %1215  ;;  %v685_v7 = vadd.f32 1.0, %v1214_v2 }
  0xca   : > { %1217 = vpow2.f32 %v1170_v3  ;;  %v749_v9 = vsel %vm748_vm15, %v1212_v49, %v745_v5  ;;  %v757_v10 = vmul.f32 %v1216_v6, %v684_v51  ;;  %vm762_vm1 = vweird.f32 %v1216_v6 }
  0xcb   : > { %1219 = vrcp.f32 %v685_v7  ;;  %v482_v11 = vpop.f32.mrf.mxu2  ;;  %v754_v12 = vsel %vm751_vm0, %v753_v8, %v749_v9  ;;  %vm763_vm3 = vmor %vm761_vm2, %vm762_vm1  ;;  %v782_v37 = vand.u32 2147483648, %v685_v7  ;;  %v780_v44 = vand.u32 2147483647, %v685_v7 }
  0xcc   : > { %v516_v13 = vadd.f32 %v482_v11, %v409_v4  ;;  %958 = vrot.lane.b32.xlu1 %v754_v12, %s1267_s17  ;;  %v758_v14 = vsub.f32 1.0, %v757_v10  ;;  %vm776_vm6 = vweird.f32 %v685_v7 }
  0xcd   : > { %v783_v52 = vor.u32 1.1754944e-38, %v782_v37  ;;  %vm781_vm8 = vcmp.eq.f32.partialorder %v780_v44, 8.507059e+37 }
  0xce   : > { %v1460_v16 = vadd.f32 %v1425_v31, %v516_v13  ;;  %v340_v17 = vpop.f32.mrf.mxu0  ;;  %v759_v20 = vmul.f32 %v1216_v6, %v758_v14 }
  0xcf   : > { %v411_v19 = vpop.f32.mrf.mxu1 }
  0xd0   : > { %v1218_v22 = vpop.eup %1217  ;;  %v1171_v23 = vmul.f32 -1.442695, %v1460_v16  ;;  %v412_v24 = vadd.f32 %v411_v19, %v340_v17  ;;  %v760_v25 = vadd.f32 %v1216_v6, %v759_v20 }
  0xd1   : > { %v1220_v26 = vpop.eup %1219  ;;  %v686_v27 = vadd.f32 1.0, %v1218_v22 }
  0xd2   : > { %1221 = vpow2.f32 %v1171_v23  ;;  %v764_v29 = vsel %vm763_vm3, %v1216_v6, %v760_v25  ;;  %v772_v30 = vmul.f32 %v1220_v26, %v685_v7  ;;  %vm777_vm5 = vweird.f32 %v1220_v26 }
  0xd3   : > { %1223 = vrcp.f32 %v686_v27  ;;  %v485_v32 = vpop.f32.mrf.mxu2  ;;  %v769_v33 = vsel %vm766_vm4, %v768_v28, %v764_v29  ;;  %vm778_vm7 = vmor %vm776_vm6, %vm777_vm5  ;;  %v797_v59 = vand.u32 2147483648, %v686_v27  ;;  %v795_v2 = vand.u32 2147483647, %v686_v27  ;;  %v1478_v29 = vpop.f32.mrf.mxu3 }
  0xd4   : > { %v517_v35 = vadd.f32 %v485_v32, %v412_v24  ;;  %960 = vrot.lane.b32.xlu2 %v769_v33, %s1267_s17  ;;  %v773_v36 = vsub.f32 1.0, %v772_v30  ;;  %vm791_vm10 = vweird.f32 %v686_v27 }
  0xd5   : > { %v798_v9 = vor.u32 1.1754944e-38, %v797_v59  ;;  %vm796_vm12 = vcmp.eq.f32.partialorder %v795_v2, 8.507059e+37 }
  0xd6   : > { %v1465_v38 = vadd.f32 %v1425_v31, %v517_v35  ;;  %v343_v40 = vpop.f32.mrf.mxu0  ;;  %v774_v43 = vmul.f32 %v1220_v26, %v773_v36 }
  0xd7   : > { %v414_v42 = vpop.f32.mrf.mxu1 }
  0xd8   : > { %v1222_v45 = vpop.eup %1221  ;;  %v1172_v46 = vmul.f32 -1.442695, %v1465_v38  ;;  %v415_v47 = vadd.f32 %v414_v42, %v343_v40  ;;  %v775_v48 = vadd.f32 %v1220_v26, %v774_v43 }
  0xd9   : > { %v1224_v49 = vpop.eup %1223  ;;  %v687_v51 = vadd.f32 1.0, %v1222_v45 }
  0xda   : > { %1225 = vpow2.f32 %v1172_v46  ;;  %v779_v53 = vsel %vm778_vm7, %v1220_v26, %v775_v48  ;;  %v787_v54 = vmul.f32 %v1224_v49, %v686_v27  ;;  %vm792_vm9 = vweird.f32 %v1224_v49 }
  0xdb   : > { %1227 = vrcp.f32 %v687_v51  ;;  %v488_v55 = vpop.f32.mrf.mxu2  ;;  %v784_v56 = vsel %vm781_vm8, %v783_v52, %v779_v53  ;;  %vm793_vm11 = vmor %vm791_vm10, %vm792_vm9  ;;  %v812_v17 = vand.u32 2147483648, %v687_v51  ;;  %v810_v23 = vand.u32 2147483647, %v687_v51  ;;  %v1485_v59 = vpop.f32.mrf.mxu3 }
  0xdc   : > { %v518_v57 = vadd.f32 %v488_v55, %v415_v47  ;;  %962 = vrot.lane.b32.xlu2 %v784_v56, %s1267_s17  ;;  %v788_v58 = vsub.f32 1.0, %v787_v54  ;;  %vm806_vm14 = vweird.f32 %v687_v51 }
  0xdd   : > { %v813_v32 = vor.u32 1.1754944e-38, %v812_v17  ;;  %vm811_vm0 = vcmp.eq.f32.partialorder %v810_v23, 8.507059e+37 }
  0xde   : > { %v1470_v61 = vadd.f32 %v1425_v31, %v518_v57  ;;  %v346_v62 = vpop.f32.mrf.mxu0  ;;  %v789_v1 = vmul.f32 %v1224_v49, %v788_v58 }
  0xdf   : > { %v417_v0 = vpop.f32.mrf.mxu1 }
  0xe0   : > { %v1226_v3 = vpop.eup %1225  ;;  %v1173_v4 = vmul.f32 -1.442695, %v1470_v61  ;;  %v418_v5 = vadd.f32 %v417_v0, %v346_v62  ;;  %v790_v6 = vadd.f32 %v1224_v49, %v789_v1 }
  0xe1   : > { %v1228_v7 = vpop.eup %1227  ;;  %v688_v8 = vadd.f32 1.0, %v1226_v3 }
  0xe2   : > { %1229 = vpow2.f32 %v1173_v4  ;;  %v794_v10 = vsel %vm793_vm11, %v1224_v49, %v790_v6  ;;  %v802_v11 = vmul.f32 %v1228_v7, %v687_v51  ;;  %vm807_vm13 = vweird.f32 %v1228_v7 }
  0xe3   : > { %1231 = vrcp.f32 %v688_v8  ;;  %v491_v12 = vpop.f32.mrf.mxu2  ;;  %v799_v13 = vsel %vm796_vm12, %v798_v9, %v794_v10  ;;  %vm808_vm15 = vmor %vm806_vm14, %vm807_vm13  ;;  %v827_v43 = vand.u32 2147483648, %v688_v8  ;;  %v825_v48 = vand.u32 2147483647, %v688_v8 }
  0xe4   : > { %v519_v14 = vadd.f32 %v491_v12, %v418_v5  ;;  %964 = vrot.lane.b32.xlu0 %v799_v13, %s1267_s17  ;;  %v803_v15 = vsub.f32 1.0, %v802_v11  ;;  %vm821_vm2 = vweird.f32 %v688_v8 }
  0xe5   : > { %v828_v56 = vor.u32 1.1754944e-38, %v827_v43  ;;  %vm826_vm4 = vcmp.eq.f32.partialorder %v825_v48, 8.507059e+37 }
  0xe6   : > { %v1475_v19 = vadd.f32 %v1425_v31, %v519_v14  ;;  %v349_v20 = vpop.f32.mrf.mxu0  ;;  %v804_v22 = vmul.f32 %v1228_v7, %v803_v15 }
  0xe7   : > { %v420_v21 = vpop.f32.mrf.mxu1 }
  0xe8   : > { %v1230_v24 = vpop.eup %1229  ;;  %v1174_v25 = vmul.f32 -1.442695, %v1475_v19  ;;  %v421_v26 = vadd.f32 %v420_v21, %v349_v20  ;;  %v805_v27 = vadd.f32 %v1228_v7, %v804_v22 }
  0xe9   : > { %v1232_v28 = vpop.eup %1231  ;;  %v689_v30 = vadd.f32 1.0, %v1230_v24 }
  0xea   : > { %1233 = vpow2.f32 %v1174_v25  ;;  %v809_v33 = vsel %vm808_vm15, %v1228_v7, %v805_v27  ;;  %v817_v35 = vmul.f32 %v1232_v28, %v688_v8  ;;  %vm822_vm1 = vweird.f32 %v1232_v28  ;;  %v1493_v25 = vpop.f32.mrf.mxu3 }
  0xeb   : > { %1235 = vrcp.f32 %v689_v30  ;;  %v494_v36 = vpop.f32.mrf.mxu2  ;;  %v814_v37 = vsel %vm811_vm0, %v813_v32, %v809_v33  ;;  %vm823_vm3 = vmor %vm821_vm2, %vm822_vm1  ;;  %v842_v3 = vand.u32 2147483648, %v689_v30  ;;  %v840_v8 = vand.u32 2147483647, %v689_v30 }
  0xec   : > { %v520_v40 = vadd.f32 %v494_v36, %v421_v26  ;;  %966 = vrot.lane.b32.xlu1 %v814_v37, %s1267_s17  ;;  %v818_v42 = vsub.f32 1.0, %v817_v35  ;;  %vm836_vm6 = vweird.f32 %v689_v30 }
  0xed   : > { %v843_v15 = vor.u32 1.1754944e-38, %v842_v3  ;;  %vm841_vm8 = vcmp.eq.f32.partialorder %v840_v8, 8.507059e+37 }
  0xee   : > { %v1482_v44 = vadd.f32 %v1425_v31, %v520_v40  ;;  %v352_v45 = vpop.f32.mrf.mxu0  ;;  %v819_v47 = vmul.f32 %v1232_v28, %v818_v42 }
  0xef   : > { %v423_v46 = vpop.f32.mrf.mxu1 }
  0xf0   : > { %v1234_v49 = vpop.eup %1233  ;;  %v1175_v51 = vmul.f32 -1.442695, %v1482_v44  ;;  %v424_v52 = vadd.f32 %v423_v46, %v352_v45  ;;  %v820_v53 = vadd.f32 %v1232_v28, %v819_v47 }
  0xf1   : > { %v1236_v54 = vpop.eup %1235  ;;  %v690_v55 = vadd.f32 1.0, %v1234_v49 }
  0xf2   : > { %1237 = vpow2.f32 %v1175_v51  ;;  %v824_v57 = vsel %vm823_vm3, %v1232_v28, %v820_v53  ;;  %v832_v58 = vmul.f32 %v1236_v54, %v689_v30  ;;  %vm837_vm5 = vweird.f32 %v1236_v54 }
  0xf3   : > { %1239 = vrcp.f32 %v690_v55  ;;  %v497_v62 = vpop.f32.mrf.mxu2  ;;  %v829_v0 = vsel %vm826_vm4, %v828_v56, %v824_v57  ;;  %vm838_vm7 = vmor %vm836_vm6, %vm837_vm5  ;;  %v857_v26 = vand.u32 2147483648, %v690_v55  ;;  %v855_v33 = vand.u32 2147483647, %v690_v55 }
  0xf4   : > { %v521_v1 = vadd.f32 %v497_v62, %v424_v52  ;;  %968 = vrot.lane.b32.xlu2 %v829_v0, %s1267_s17  ;;  %v833_v2 = vsub.f32 1.0, %v832_v58  ;;  %vm851_vm10 = vweird.f32 %v690_v55  ;;  %v1503_v0 = vpop.f32.mrf.mxu3 }
  0xf5   : > { %v858_v45 = vor.u32 1.1754944e-38, %v857_v26  ;;  %vm856_vm12 = vcmp.eq.f32.partialorder %v855_v33, 8.507059e+37 }
  0xf6   : > { %v1489_v4 = vadd.f32 %v1425_v31, %v521_v1  ;;  %v355_v5 = vpop.f32.mrf.mxu0  ;;  %v834_v7 = vmul.f32 %v1236_v54, %v833_v2 }
  0xf7   : > { %v426_v6 = vpop.f32.mrf.mxu1 }
  0xf8   : > { %v1238_v9 = vpop.eup %1237  ;;  %v1176_v10 = vmul.f32 -1.442695, %v1489_v4  ;;  %v427_v11 = vadd.f32 %v426_v6, %v355_v5  ;;  %v835_v12 = vadd.f32 %v1236_v54, %v834_v7 }
  0xf9   : > { %v1240_v13 = vpop.eup %1239  ;;  %v691_v14 = vadd.f32 1.0, %v1238_v9 }
  0xfa   : > { %1241 = vpow2.f32 %v1176_v10  ;;  %v839_v17 = vsel %vm838_vm7, %v1236_v54, %v835_v12  ;;  %v847_v20 = vmul.f32 %v1240_v13, %v690_v55  ;;  %vm852_vm9 = vweird.f32 %v1240_v13 }
  0xfb   : > { %1243 = vrcp.f32 %v691_v14  ;;  %v500_v21 = vpop.f32.mrf.mxu2  ;;  %v844_v22 = vsel %vm841_vm8, %v843_v15, %v839_v17  ;;  %vm853_vm11 = vmor %vm851_vm10, %vm852_vm9  ;;  %v872_v53 = vand.u32 2147483648, %v691_v14  ;;  %v870_v58 = vand.u32 2147483647, %v691_v14 }
  0xfc   : > { %v522_v23 = vadd.f32 %v500_v21, %v427_v11  ;;  %970 = vrot.lane.b32.xlu0 %v844_v22, %s1267_s17  ;;  %v848_v24 = vsub.f32 1.0, %v847_v20  ;;  %vm866_vm14 = vweird.f32 %v691_v14 }
  0xfd   : > { %v873_v7 = vor.u32 1.1754944e-38, %v872_v53  ;;  %vm871_vm0 = vcmp.eq.f32.partialorder %v870_v58, 8.507059e+37 }
  0xfe   : > { %v1496_v27 = vadd.f32 %v1425_v31, %v522_v23  ;;  %v358_v28 = vpop.f32.mrf.mxu0  ;;  %v849_v32 = vmul.f32 %v1240_v13, %v848_v24 }
  0xff   : > { %v429_v30 = vpop.f32.mrf.mxu1 }
 0x100   : > { %v1242_v35 = vpop.eup %1241  ;;  %v1177_v36 = vmul.f32 -1.442695, %v1496_v27  ;;  %v430_v37 = vadd.f32 %v429_v30, %v358_v28  ;;  %v850_v40 = vadd.f32 %v1240_v13, %v849_v32  ;;  %v580_v30 = vpop.f32.mrf.mxu3 }
 0x101   : > { %v1244_v42 = vpop.eup %1243  ;;  %v692_v43 = vadd.f32 1.0, %v1242_v35 }
 0x102   : > { %1245 = vpow2.f32 %v1177_v36  ;;  %v854_v46 = vsel %vm853_vm11, %v1240_v13, %v850_v40  ;;  %v862_v47 = vmul.f32 %v1244_v42, %v691_v14  ;;  %vm867_vm13 = vweird.f32 %v1244_v42 }
 0x103   : > { %1247 = vrcp.f32 %v692_v43  ;;  %v503_v48 = vpop.f32.mrf.mxu2  ;;  %v859_v49 = vsel %vm856_vm12, %v858_v45, %v854_v46  ;;  %vm868_vm15 = vmor %vm866_vm14, %vm867_vm13  ;;  %v887_v15 = vand.u32 2147483648, %v692_v43  ;;  %v885_v20 = vand.u32 2147483647, %v692_v43 }
 0x104   : > { %v523_v51 = vadd.f32 %v503_v48, %v430_v37  ;;  %972 = vrot.lane.b32.xlu1 %v859_v49, %s1267_s17  ;;  %v863_v52 = vsub.f32 1.0, %v862_v47  ;;  %vm881_vm2 = vweird.f32 %v692_v43  ;;  %vm1016_vm13 = vcmask 261120  }
 0x105   : > { %v888_v28 = vor.u32 1.1754944e-38, %v887_v15  ;;  %vm886_vm4 = vcmp.eq.f32.partialorder %v885_v20, 8.507059e+37 }
 0x106   : > { %v1501_v54 = vadd.f32 %v1425_v31, %v523_v51  ;;  %v361_v55 = vpop.f32.mrf.mxu0  ;;  %v864_v57 = vmul.f32 %v1244_v42, %v863_v52 }
 0x107   : > { %v432_v56 = vpop.f32.mrf.mxu1 }
 0x108   : > { %v1246_v62 = vpop.eup %1245  ;;  %v1178_v1 = vmul.f32 -1.442695, %v1501_v54  ;;  %v433_v2 = vadd.f32 %v432_v56, %v361_v55  ;;  %v865_v3 = vadd.f32 %v1244_v42, %v864_v57  ;;  %v583_v52 = vpop.f32.mrf.mxu3  ;;  %v1516_v55 = vld [vmem:[%s1601_s4] ss:$0 sm:$0xff] }
 0x109   : > { %v1248_v5 = vpop.eup %1247  ;;  %v693_v6 = vadd.f32 1.0, %v1246_v62  ;;  %v572_v20 = vadd.f32 %v1516_v55, %v1485_v59 }
 0x10a   : > { %1249 = vpow2.f32 %v1178_v1  ;;  %v869_v8 = vsel %vm868_vm15, %v1244_v42, %v865_v3  ;;  %v877_v9 = vmul.f32 %v1248_v5, %v692_v43  ;;  %vm882_vm1 = vweird.f32 %v1248_v5 }
 0x10b   : > { %1251 = vrcp.f32 %v693_v6  ;;  %v506_v10 = vpop.f32.mrf.mxu2  ;;  %v874_v11 = vsel %vm871_vm0, %v873_v7, %v869_v8  ;;  %vm883_vm3 = vmor %vm881_vm2, %vm882_vm1  ;;  %v902_v36 = vand.u32 2147483648, %v693_v6  ;;  %v900_v40 = vand.u32 2147483647, %v693_v6 }
 0x10c   : > { %v524_v12 = vadd.f32 %v506_v10, %v433_v2  ;;  %974 = vrot.lane.b32.xlu2 %v874_v11, %s1267_s17  ;;  %v878_v13 = vsub.f32 1.0, %v877_v9  ;;  %vm896_vm6 = vweird.f32 %v693_v6  ;;  %v569_v2 = vadd.f32 %v1516_v55, %v1478_v29 }
 0x10d   : > { %v903_v47 = vor.u32 1.1754944e-38, %v902_v36  ;;  %vm901_vm8 = vcmp.eq.f32.partialorder %v900_v40, 8.507059e+37 }
 0x10e   : > { %v1508_v17 = vadd.f32 %v1425_v31, %v524_v12  ;;  %v879_v14 = vmul.f32 %v1248_v5, %v878_v13  ;;  %v616_v9 = vadd.f32 %v569_v2, %v1428_v34  ;;  %v581_v34 = vadd.f32 %v1516_v55, %v580_v30 }
 0x110   : > { %v1250_v21 = vpop.eup %1249  ;;  %v1179_v22 = vmul.f32 -1.442695, %v1508_v17  ;;  %v880_v23 = vadd.f32 %v1248_v5, %v879_v14  ;;  %v586_v11 = vpop.f32.mrf.mxu3 }
 0x111   : > { %v1252_v24 = vpop.eup %1251  ;;  %v694_v26 = vadd.f32 1.0, %v1250_v21 }
 0x112   : > { %1253 = vpow2.f32 %v1179_v22  ;;  %v884_v32 = vsel %vm883_vm3, %v1248_v5, %v880_v23  ;;  %v892_v33 = vmul.f32 %v1252_v24, %v693_v6  ;;  %vm897_vm5 = vweird.f32 %v1252_v24 }
 0x113   : > { %1255 = vrcp.f32 %v694_v26  ;;  %v889_v31 = vsel %vm886_vm4, %v888_v28, %v884_v32  ;;  %vm898_vm7 = vmor %vm896_vm6, %vm897_vm5  ;;  %v917_v56 = vand.u32 2147483648, %v694_v26  ;;  %v915_v58 = vand.u32 2147483647, %v694_v26 }
 0x114   : > { %976 = vrot.lane.b32.xlu0 %v889_v31, %s1267_s17  ;;  %v893_v35 = vsub.f32 1.0, %v892_v33  ;;  %vm911_vm10 = vweird.f32 %v694_v26  ;;  %v575_v31 = vadd.f32 %v1516_v55, %v1493_v25 }
 0x115   : > { %v918_v3 = vor.u32 1.1754944e-38, %v917_v56  ;;  %vm916_vm12 = vcmp.eq.f32.partialorder %v915_v58, 8.507059e+37 }
 0x116   : > { %v894_v37 = vmul.f32 %v1252_v24, %v893_v35  ;;  %v584_v35 = vadd.f32 %v1516_v55, %v583_v52  ;;  %v587_v52 = vadd.f32 %v1516_v55, %v586_v11 }
 0x118   : > { %v1254_v42 = vpop.eup %1253  ;;  %v895_v43 = vadd.f32 %v1252_v24, %v894_v37  ;;  %v589_v33 = vpop.f32.mrf.mxu3 }
 0x119   : > { %v1256_v45 = vpop.eup %1255  ;;  %v695_v46 = vadd.f32 1.0, %v1254_v42  ;;  %v590_v58 = vadd.f32 %v1516_v55, %v589_v33 }
 0x11a   : > { %v899_v48 = vsel %vm898_vm7, %v1252_v24, %v895_v43  ;;  %v907_v49 = vmul.f32 %v1256_v45, %v694_v26  ;;  %vm912_vm9 = vweird.f32 %v1256_v45  ;;  %v620_v24 = vadd.f32 %v581_v34, %v1445_v18 }
 0x11b   : > { %1257 = vrcp.f32 %v695_v46  ;;  %v904_v51 = vsel %vm901_vm8, %v903_v47, %v899_v48  ;;  %vm913_vm11 = vmor %vm911_vm10, %vm912_vm9  ;;  %v932_v10 = vand.u32 2147483648, %v695_v46  ;;  %v930_v13 = vand.u32 2147483647, %v695_v46 }
 0x11c   : > { %978 = vrot.lane.b32.xlu1 %v904_v51, %s1267_s17  ;;  %v908_v53 = vsub.f32 1.0, %v907_v49  ;;  %vm926_vm15 = vweird.f32 %v695_v46  ;;  %v617_v26 = vadd.f32 %v572_v20, %v1432_v41  ;;  %v621_v18 = vadd.f32 %v584_v35, %v1450_v39 }
 0x11d   : > { %v933_v21 = vor.u32 1.1754944e-38, %v932_v10  ;;  %vm931_vm1 = vcmp.eq.f32.partialorder %v930_v13, 8.507059e+37  ;;  %v618_v41 = vadd.f32 %v575_v31, %v1436_v50  ;;  %v578_v43 = vadd.f32 %v1516_v55, %v1503_v0 }
 0x11e   : > { %v909_v57 = vmul.f32 %v1256_v45, %v908_v53 }
 0x120   : > { %v910_v62 = vadd.f32 %v1256_v45, %v909_v57  ;;  %v592_v25 = vpop.f32.mrf.mxu3 }
 0x121   : > { %v1258_v1 = vpop.eup %1257  ;;  %v593_v47 = vadd.f32 %v1516_v55, %v592_v25 }
 0x122   : > { %v914_v5 = vsel %vm913_vm11, %v1256_v45, %v910_v62  ;;  %v922_v6 = vmul.f32 %v1258_v1, %v695_v46  ;;  %vm927_vm14 = vweird.f32 %v1258_v1  ;;  %v619_v45 = vadd.f32 %v578_v43, %v1440_v63 }
 0x123   : > { %v919_v7 = vsel %vm916_vm12, %v918_v3, %v914_v5  ;;  %vm928_vm0 = vmor %vm926_vm15, %vm927_vm14  ;;  %v624_v48 = vadd.f32 %v593_v47, %v1465_v38  ;;  %v622_v63 = vadd.f32 %v587_v52, %v1455_v60  ;;  %v623_v38 = vadd.f32 %v590_v58, %v1460_v16 }
 0x124   : > { %980 = vrot.lane.b32.xlu2 %v919_v7, %s1267_s17  ;;  %v923_v8 = vsub.f32 1.0, %v922_v6 }
 0x126   : > { %v953_v29 = vpop.permute.xlu0 %952  ;;  %v924_v12 = vmul.f32 %v1258_v1, %v923_v8 }
 0x127   : > { %v1000_v15 = vmul.f32 %v953_v29, %v616_v9 }
 0x128   : > { %v925_v14 = vadd.f32 %v1258_v1, %v924_v12  ;;  %v595_v50 = vpop.f32.mrf.mxu3 }
 0x129   : > { %1017 = vst.msk [vmem:[%s1526_s25] sm:$0xff] %vm1016_vm13, %v1000_v15  ;;  %v596_v7 = vadd.f32 %v1516_v55, %v595_v50 }
 0x12a   : > { %v929_v22 = vsel %vm928_vm0, %v1258_v1, %v925_v14 }
 0x12b   : > { %v934_v23 = vsel %vm931_vm1, %v933_v21, %v929_v22  ;;  %v625_v16 = vadd.f32 %v596_v7, %v1470_v61 }
 0x12c   : > { %982 = vrot.lane.b32.xlu0 %v934_v23, %s1267_s17 }
 0x12e   : > { %v961_v28 = vpop.permute.xlu2 %960  ;;  %v955_v59 = vpop.permute.xlu0 %954 }
 0x12f   : > { %v1004_v32 = vmul.f32 %v961_v28, %v620_v24  ;;  %v1001_v30 = vmul.f32 %v955_v59, %v617_v26 }
 0x130   : > { %v598_v49 = vpop.f32.mrf.mxu3 }
 0x131   : > { %1021 = vst.msk [vmem:[%s1526_s25 + $0x20] sm:$0xff] %vm1016_vm13, %v1004_v32  ;;  %v599_v11 = vadd.f32 %v1516_v55, %v598_v49 }
 0x132   : > { %1018 = vst.msk [vmem:[%s1526_s25 + $0x8] sm:$0xff] %vm1016_vm13, %v1001_v30 }
 0x136   : > { %v963_v36 = vpop.permute.xlu2 %962  ;;  %v957_v37 = vpop.permute.xlu1 %956 }
 0x137   : > { %v1005_v40 = vmul.f32 %v963_v36, %v621_v18  ;;  %v1002_v42 = vmul.f32 %v957_v37, %v618_v41 }
 0x138   : > { %v601_v57 = vpop.f32.mrf.mxu3 }
 0x139   : > { %1022 = vst.msk [vmem:[%s1526_s25 + $0x28] sm:$0xff] %vm1016_vm13, %v1005_v40  ;;  %v602_v2 = vadd.f32 %v1516_v55, %v601_v57 }
 0x13a   : > { %1019 = vst.msk [vmem:[%s1526_s25 + $0x10] sm:$0xff] %vm1016_vm13, %v1002_v42 }
 0x13b   : > { %v627_v60 = vadd.f32 %v602_v2, %v1482_v44  ;;  %v626_v44 = vadd.f32 %v599_v11, %v1475_v19 }
 0x13e   : > { %v959_v46 = vpop.permute.xlu1 %958 }
 0x13f   : > { %v1003_v39 = vmul.f32 %v959_v46, %v619_v45 }
 0x140   : > { %v604_v3 = vpop.f32.mrf.mxu3 }
 0x141   : > { %1020 = vst.msk [vmem:[%s1526_s25 + $0x18] sm:$0xff] %vm1016_vm13, %v1003_v39  ;;  %v605_v34 = vadd.f32 %v1516_v55, %v604_v3 }
 0x143   : > { %v628_v21 = vadd.f32 %v605_v34, %v1489_v4 }
 0x148   : > { %v607_v8 = vpop.f32.mrf.mxu3 }
 0x149   : > { %v608_v23 = vadd.f32 %v1516_v55, %v607_v8 }
 0x14b   : > { %v629_v24 = vadd.f32 %v608_v23, %v1496_v27 }
 0x14e   : > { %v969_v0 = vpop.permute.xlu2 %968 }
 0x14f   : > { %v1008_v51 = vmul.f32 %v969_v0, %v624_v48 }
 0x150   : > { %v610_v29 = vpop.f32.mrf.mxu3 }
 0x151   : > { %1025 = vst.msk [vmem:[%s1526_s25 + $0x40] sm:$0xff] %vm1016_vm13, %v1008_v51  ;;  %v611_v15 = vadd.f32 %v1516_v55, %v610_v29 }
 0x153   : > { %v630_v14 = vadd.f32 %v611_v15, %v1501_v54 }
 0x156   : > { %v965_v53 = vpop.permute.xlu0 %964 }
 0x157   : > { %v1006_v56 = vmul.f32 %v965_v53, %v622_v63 }
 0x158   : > { %v613_v54 = vpop.f32.mrf.mxu3 }
 0x159   : > { %1023 = vst.msk [vmem:[%s1526_s25 + $0x30] sm:$0xff] %vm1016_vm13, %v1006_v56  ;;  %v614_v59 = vadd.f32 %v1516_v55, %v613_v54 }
 0x15b   : > { %v631_v32 = vadd.f32 %v614_v59, %v1508_v17 }
 0x15e   : > { %v967_v62 = vpop.permute.xlu1 %966 }
 0x15f   : > { %v1007_v1 = vmul.f32 %v967_v62, %v623_v38 }
 0x161   : > { %1024 = vst.msk [vmem:[%s1526_s25 + $0x38] sm:$0xff] %vm1016_vm13, %v1007_v1 }
 0x166   : > { %v975_v5 = vpop.permute.xlu2 %974 }
 0x167   : > { %v1011_v6 = vmul.f32 %v975_v5, %v627_v60 }
 0x169   : > { %1028 = vst.msk [vmem:[%s1526_s25 + $0x58] sm:$0xff] %vm1016_vm13, %v1011_v6 }
 0x16e   : > { %v971_v9 = vpop.permute.xlu0 %970 }
 0x16f   : > { %v1009_v10 = vmul.f32 %v971_v9, %v625_v16 }
 0x171   : > { %1026 = vst.msk [vmem:[%s1526_s25 + $0x48] sm:$0xff] %vm1016_vm13, %v1009_v10 }
 0x176   : > { %v973_v12 = vpop.permute.xlu1 %972 }
 0x177   : > { %v1010_v13 = vmul.f32 %v973_v12, %v626_v44 }
 0x179   : > { %1027 = vst.msk [vmem:[%s1526_s25 + $0x50] sm:$0xff] %vm1016_vm13, %v1010_v13 }
 0x17e   : > { %v981_v61 = vpop.permute.xlu2 %980 }
 0x17f   : > { %v1014_v20 = vmul.f32 %v981_v61, %v630_v14 }
 0x181   : > { %1031 = vst.msk [vmem:[%s1526_s25 + $0x70] sm:$0xff] %vm1016_vm13, %v1014_v20 }
 0x186   : > { %v977_v19 = vpop.permute.xlu0 %976 }
 0x187   : > { %v1012_v22 = vmul.f32 %v977_v19, %v628_v21 }
 0x189   : > { %1029 = vst.msk [vmem:[%s1526_s25 + $0x60] sm:$0xff] %vm1016_vm13, %v1012_v22 }
 0x18e   : > { %v979_v26 = vpop.permute.xlu1 %978 }
 0x18f   : > { %v1013_v28 = vmul.f32 %v979_v26, %v629_v24 }
 0x191   : > { %1030 = vst.msk [vmem:[%s1526_s25 + $0x68] sm:$0xff] %vm1016_vm13, %v1013_v28 }
 0x19e   : > { %v983_v30 = vpop.permute.xlu0 %982 }
 0x19f   : > { %v1015_v33 = vmul.f32 %v983_v30, %v631_v32 }
 0x1a1   : > { %1032 = vst.msk [vmem:[%s1526_s25 + $0x78] sm:$0xff] %vm1016_vm13, %v1015_v33 }
 0x1a2 PF: > { %s15_s18 = sadd.s32 1, %s1265_s18  }
 0x1a3   : > { %p12_p4 = scmp.ge.s32.totalorder %s15_s18, 4  }
 0x1a5   :  { %14 = sbr.rel (!%p12_p4) target bundleno = 1 (0x1), region = 72 }

</bundles_post_ra>
